<compile_context>
chip_gen: v7x
topology: tpu7x:2x2x1
jax: 0.10.0
libtpu: 0.0.40
codegen_flags: <defaults>
</compile_context>

<pallas_src>
import jax
import jax.numpy as jnp
import numpy as np
from jax.experimental import pallas as pl
from jax.experimental.pallas import tpu as pltpu


def encoder_kernel(x_ref, wex_ref, weh_ref, be_ref,
                   wout_ref, bout_ref,
                   mu_ref, logvar_ref):
    T, B, _ = x_ref.shape            # x is time-major: (T, B, 2)
    H = weh_ref.shape[0]
    Z = mu_ref.shape[1]

    x = x_ref[...]                   # (T, B, 2)
    wex = wex_ref[...]               # (2, 4H)

    # Hoisted input projection + bias fold for ALL timesteps: (T, B, 4H).
    # K=2, so use VPU broadcast-multiplies instead of an MXU op per step.
    xg_all = (x[:, :, 0:1] * wex[0:1, :]
              + x[:, :, 1:2] * wex[1:2, :]
              + be_ref[...])

    weh = weh_ref[...]               # (H, 4H), loaded once

    h = jnp.zeros((B, H), jnp.float32)
    c = jnp.zeros((B, H), jnp.float32)
    # T is small & static: full static unroll.  xg_all[t] is a static leading-axis
    # slab (free address offset); gate slices are lane-aligned (H multiple of 128).
    for t in range(T):
        gates = xg_all[t] + jnp.dot(h, weh, preferred_element_type=jnp.float32)
        i = jax.nn.sigmoid(gates[:, 0:H])
        f = jax.nn.sigmoid(gates[:, H:2 * H])
        g = jnp.tanh(gates[:, 2 * H:3 * H])
        o = jax.nn.sigmoid(gates[:, 3 * H:4 * H])
        c = f * c + i * g
        h = o * jnp.tanh(c)

    # Fused head: one (B,H)@(H,2Z) matmul, then static lane-aligned split stores.
    out = jnp.dot(h, wout_ref[...], preferred_element_type=jnp.float32) + bout_ref[...]
    mu_ref[...] = out[:, 0:Z]
    logvar_ref[...] = out[:, Z:2 * Z]


def encoder_forward(x, p, *, batch_block=None):
    """Runs the Pallas encoder. Returns (mu, logvar).

    batch_block: batch tile size.  Default = B (single block).  On v7x with large B,
    pick batch_block = B // 2 (a multiple of 8) so the parallel grid axis uses both TCs.
    """
    B, T, _ = x.shape
    H = p["we_h"].shape[0]
    Z = p["wmu"].shape[1]
    TB = B if batch_block is None else batch_block

    # Time-major layout for the kernel; fused mu|logvar head weights.
    xt = jnp.transpose(x, (1, 0, 2))                          # (T, B, 2)
    wout = jnp.concatenate([p["wmu"], p["wlv"]], axis=1)      # (H, 2Z)
    bout = jnp.concatenate([p["bmu"], p["blv"]], axis=1)      # (1, 2Z)

    full2 = lambda i: (0, 0)
    in_specs = [
        pl.BlockSpec((T, TB, 2), lambda i: (0, i, 0)),        # x (time-major), batch-tiled
        pl.BlockSpec((2, 4 * H), full2),                      # we_x
        pl.BlockSpec((H, 4 * H), full2),                      # we_h
        pl.BlockSpec((1, 4 * H), full2),                      # be (b_ih + b_hh)
        pl.BlockSpec((H, 2 * Z), full2),                      # [wmu | wlv]
        pl.BlockSpec((1, 2 * Z), full2),                      # [bmu | blv]
    ]
    out_specs = (
        pl.BlockSpec((TB, Z), lambda i: (i, 0)),              # mu
        pl.BlockSpec((TB, Z), lambda i: (i, 0)),              # logvar
    )
    return pl.pallas_call(
        encoder_kernel,
        out_shape=(jax.ShapeDtypeStruct((B, Z), jnp.float32),
                   jax.ShapeDtypeStruct((B, Z), jnp.float32)),
        grid=(pl.cdiv(B, TB),),
        in_specs=in_specs,
        out_specs=out_specs,
        compiler_params=pltpu.CompilerParams(dimension_semantics=("parallel",)),
    )(xt, p["we_x"], p["we_h"], p["be"], wout, bout)


def init_params(key, H=256, Z=128):
    """PyTorch-style uniform(-1/sqrt(H), 1/sqrt(H)) init, weights pre-transposed."""
    ks = jax.random.split(key, 8)

    def u(k, shape, scale):
        return jax.random.uniform(k, shape, jnp.float32, -scale, scale)

    s = 1.0 / np.sqrt(H)
    p = {}
    p["we_x"] = u(ks[0], (2, 4 * H), s)                               # W_ih^T
    p["we_h"] = u(ks[1], (H, 4 * H), s)                               # W_hh^T
    p["be"] = u(ks[2], (1, 4 * H), s) + u(ks[3], (1, 4 * H), s)       # b_ih + b_hh
    p["wmu"] = u(ks[4], (H, Z), s)
    p["bmu"] = u(ks[5], (1, Z), s)
    p["wlv"] = u(ks[6], (H, Z), s)
    p["blv"] = u(ks[7], (1, Z), s)
    return p


def reference_forward(x, p):
    """Pure-JAX reference mirroring the PyTorch Encoder.forward."""
    B, T, _ = x.shape
    H = p["we_h"].shape[0]
    h = jnp.zeros((B, H), jnp.float32)
    c = jnp.zeros((B, H), jnp.float32)
    for t in range(T):
        g = x[:, t] @ p["we_x"] + h @ p["we_h"] + p["be"][0]
        i = jax.nn.sigmoid(g[:, :H])
        f = jax.nn.sigmoid(g[:, H:2 * H])
        gg = jnp.tanh(g[:, 2 * H:3 * H])
        o = jax.nn.sigmoid(g[:, 3 * H:])
        c = f * c + i * gg
        h = o * jnp.tanh(c)
    mu = h @ p["wmu"] + p["bmu"][0]
    logvar = h @ p["wlv"] + p["blv"][0]
    return mu, logvar


if __name__ == "__main__":
    B, T = 2, 8
    H, Z = 256, 128   # enc_rnn_size, z_size (module defaults; lane-aligned)

    key = jax.random.PRNGKey(0)
    k_x, k_p = jax.random.split(key)
    x = jax.random.normal(k_x, (B, T, 2), jnp.float32)
    params = init_params(k_p, H=H, Z=Z)

    mu, logvar = encoder_forward(x, params)
    mu = jax.block_until_ready(mu)
    logvar = jax.block_until_ready(logvar)

    mu_ref, lv_ref = reference_forward(x, params)
    assert mu.shape == (B, Z) and logvar.shape == (B, Z)
    assert np.allclose(np.asarray(mu), np.asarray(mu_ref), atol=1e-3, rtol=1e-3)
    assert np.allclose(np.asarray(logvar), np.asarray(lv_ref), atol=1e-3, rtol=1e-3)

    print("KERNEL_OK")
</pallas_src>

<mosaic_0001>
module attributes {stable_mosaic.version = 11 : i64} {
  func.func @encoder_kernel(%arg0: i32, %arg1: memref<8x2x2xf32, #tpu.memory_space<vmem>>, %arg2: memref<2x1024xf32, #tpu.memory_space<vmem>>, %arg3: memref<256x1024xf32, #tpu.memory_space<vmem>>, %arg4: memref<1x1024xf32, #tpu.memory_space<vmem>>, %arg5: memref<256x256xf32, #tpu.memory_space<vmem>>, %arg6: memref<1x256xf32, #tpu.memory_space<vmem>>, %arg7: memref<2x128xf32, #tpu.memory_space<vmem>>, %arg8: memref<2x128xf32, #tpu.memory_space<vmem>>) attributes {dimension_semantics = [#tpu.dimension_semantics<parallel>], iteration_bounds = array<i64: 1>, scalar_prefetch = 0 : i64, scratch_operands = 0 : i64, tpu.core_type = #tpu.core_type<tc>, window_params = [{transform_indices = @transform_0, window_bounds = array<i64: 8, 2, 2>}, {pipeline_mode = #tpu.pipeline_mode<synchronous>, transform_indices = @transform_1, window_bounds = array<i64: 2, 1024>}, {pipeline_mode = #tpu.pipeline_mode<synchronous>, transform_indices = @transform_2, window_bounds = array<i64: 256, 1024>}, {pipeline_mode = #tpu.pipeline_mode<synchronous>, transform_indices = @transform_3, window_bounds = array<i64: 1, 1024>}, {pipeline_mode = #tpu.pipeline_mode<synchronous>, transform_indices = @transform_4, window_bounds = array<i64: 256, 256>}, {pipeline_mode = #tpu.pipeline_mode<synchronous>, transform_indices = @transform_5, window_bounds = array<i64: 1, 256>}, {transform_indices = @transform_6, window_bounds = array<i64: 2, 128>}, {transform_indices = @transform_7, window_bounds = array<i64: 2, 128>}]} {
    %c0 = arith.constant 0 : index
    %c0_0 = arith.constant 0 : index
    %c0_1 = arith.constant 0 : index
    %0 = vector.load %arg1[%c0, %c0_0, %c0_1] : memref<8x2x2xf32, #tpu.memory_space<vmem>>, vector<8x2x2xf32>
    %c0_2 = arith.constant 0 : index
    %c0_3 = arith.constant 0 : index
    %1 = vector.load %arg2[%c0_2, %c0_3] : memref<2x1024xf32, #tpu.memory_space<vmem>>, vector<2x1024xf32>
    %2 = vector.extract_strided_slice %0 {offsets = [0, 0, 0], sizes = [8, 2, 1], strides = [1, 1, 1]} : vector<8x2x2xf32> to vector<8x2x1xf32>
    %3 = vector.extract_strided_slice %1 {offsets = [0, 0], sizes = [1, 1024], strides = [1, 1]} : vector<2x1024xf32> to vector<1x1024xf32>
    %4 = vector.shape_cast %3 : vector<1x1024xf32> to vector<1x1x1024xf32>
    %5 = vector.broadcast %2 : vector<8x2x1xf32> to vector<8x2x1024xf32>
    %6 = vector.broadcast %4 : vector<1x1x1024xf32> to vector<8x2x1024xf32>
    %7 = arith.mulf %5, %6 : vector<8x2x1024xf32>
    %8 = vector.extract_strided_slice %0 {offsets = [0, 0, 1], sizes = [8, 2, 1], strides = [1, 1, 1]} : vector<8x2x2xf32> to vector<8x2x1xf32>
    %9 = vector.extract_strided_slice %1 {offsets = [1, 0], sizes = [1, 1024], strides = [1, 1]} : vector<2x1024xf32> to vector<1x1024xf32>
    %10 = vector.shape_cast %9 : vector<1x1024xf32> to vector<1x1x1024xf32>
    %11 = vector.broadcast %8 : vector<8x2x1xf32> to vector<8x2x1024xf32>
    %12 = vector.broadcast %10 : vector<1x1x1024xf32> to vector<8x2x1024xf32>
    %13 = arith.mulf %11, %12 : vector<8x2x1024xf32>
    %14 = arith.addf %7, %13 : vector<8x2x1024xf32>
    %c0_4 = arith.constant 0 : index
    %c0_5 = arith.constant 0 : index
    %15 = vector.load %arg4[%c0_4, %c0_5] : memref<1x1024xf32, #tpu.memory_space<vmem>>, vector<1x1024xf32>
    %16 = vector.shape_cast %15 : vector<1x1024xf32> to vector<1x1x1024xf32>
    %17 = vector.broadcast %16 : vector<1x1x1024xf32> to vector<8x2x1024xf32>
    %18 = arith.addf %14, %17 : vector<8x2x1024xf32>
    %c0_6 = arith.constant 0 : index
    %c0_7 = arith.constant 0 : index
    %19 = vector.load %arg3[%c0_6, %c0_7] : memref<256x1024xf32, #tpu.memory_space<vmem>>, vector<256x1024xf32>
    %cst = arith.constant 0.000000e+00 : f32
    %20 = vector.broadcast %cst : f32 to vector<2x256xf32>
    %cst_8 = arith.constant 0.000000e+00 : f32
    %21 = vector.broadcast %cst_8 : f32 to vector<2x256xf32>
    %22 = vector.extract_strided_slice %18 {offsets = [0, 0, 0], sizes = [1, 2, 1024], strides = [1, 1, 1]} : vector<8x2x1024xf32> to vector<1x2x1024xf32>
    %23 = vector.shape_cast %22 : vector<1x2x1024xf32> to vector<2x1024xf32>
    %cst_9 = arith.constant dense<0.000000e+00> : vector<2x1024xf32>
    %24 = tpu.matmul %20, %19, %cst_9 {dimension_numbers = #tpu.dot_dimension_numbers<[1], [0], [0], [1], [0, 0, 1, 1], [], []>} : vector<2x256xf32>, vector<256x1024xf32>, vector<2x1024xf32> -> vector<2x1024xf32>
    %25 = arith.addf %23, %24 : vector<2x1024xf32>
    %26 = vector.extract_strided_slice %25 {offsets = [0, 0], sizes = [2, 256], strides = [1, 1]} : vector<2x1024xf32> to vector<2x256xf32>
    %27 = arith.negf %26 : vector<2x256xf32>
    %28 = math.exp %27 : vector<2x256xf32>
    %cst_10 = arith.constant 1.000000e+00 : f32
    %29 = vector.broadcast %cst_10 : f32 to vector<2x256xf32>
    %30 = arith.addf %29, %28 : vector<2x256xf32>
    %31 = arith.divf %29, %30 : vector<2x256xf32>
    %32 = vector.extract_strided_slice %25 {offsets = [0, 256], sizes = [2, 256], strides = [1, 1]} : vector<2x1024xf32> to vector<2x256xf32>
    %33 = arith.negf %32 : vector<2x256xf32>
    %34 = math.exp %33 : vector<2x256xf32>
    %cst_11 = arith.constant 1.000000e+00 : f32
    %35 = vector.broadcast %cst_11 : f32 to vector<2x256xf32>
    %36 = arith.addf %35, %34 : vector<2x256xf32>
    %37 = arith.divf %35, %36 : vector<2x256xf32>
    %38 = vector.extract_strided_slice %25 {offsets = [0, 512], sizes = [2, 256], strides = [1, 1]} : vector<2x1024xf32> to vector<2x256xf32>
    %39 = math.tanh %38 : vector<2x256xf32>
    %40 = vector.extract_strided_slice %25 {offsets = [0, 768], sizes = [2, 256], strides = [1, 1]} : vector<2x1024xf32> to vector<2x256xf32>
    %41 = arith.negf %40 : vector<2x256xf32>
    %42 = math.exp %41 : vector<2x256xf32>
    %cst_12 = arith.constant 1.000000e+00 : f32
    %43 = vector.broadcast %cst_12 : f32 to vector<2x256xf32>
    %44 = arith.addf %43, %42 : vector<2x256xf32>
    %45 = arith.divf %43, %44 : vector<2x256xf32>
    %46 = arith.mulf %37, %21 : vector<2x256xf32>
    %47 = arith.mulf %31, %39 : vector<2x256xf32>
    %48 = arith.addf %46, %47 : vector<2x256xf32>
    %49 = math.tanh %48 : vector<2x256xf32>
    %50 = arith.mulf %45, %49 : vector<2x256xf32>
    %51 = vector.extract_strided_slice %18 {offsets = [1, 0, 0], sizes = [1, 2, 1024], strides = [1, 1, 1]} : vector<8x2x1024xf32> to vector<1x2x1024xf32>
    %52 = vector.shape_cast %51 : vector<1x2x1024xf32> to vector<2x1024xf32>
    %cst_13 = arith.constant dense<0.000000e+00> : vector<2x1024xf32>
    %53 = tpu.matmul %50, %19, %cst_13 {dimension_numbers = #tpu.dot_dimension_numbers<[1], [0], [0], [1], [0, 0, 1, 1], [], []>} : vector<2x256xf32>, vector<256x1024xf32>, vector<2x1024xf32> -> vector<2x1024xf32>
    %54 = arith.addf %52, %53 : vector<2x1024xf32>
    %55 = vector.extract_strided_slice %54 {offsets = [0, 0], sizes = [2, 256], strides = [1, 1]} : vector<2x1024xf32> to vector<2x256xf32>
    %56 = arith.negf %55 : vector<2x256xf32>
    %57 = math.exp %56 : vector<2x256xf32>
    %cst_14 = arith.constant 1.000000e+00 : f32
    %58 = vector.broadcast %cst_14 : f32 to vector<2x256xf32>
    %59 = arith.addf %58, %57 : vector<2x256xf32>
    %60 = arith.divf %58, %59 : vector<2x256xf32>
    %61 = vector.extract_strided_slice %54 {offsets = [0, 256], sizes = [2, 256], strides = [1, 1]} : vector<2x1024xf32> to vector<2x256xf32>
    %62 = arith.negf %61 : vector<2x256xf32>
    %63 = math.exp %62 : vector<2x256xf32>
    %cst_15 = arith.constant 1.000000e+00 : f32
    %64 = vector.broadcast %cst_15 : f32 to vector<2x256xf32>
    %65 = arith.addf %64, %63 : vector<2x256xf32>
    %66 = arith.divf %64, %65 : vector<2x256xf32>
    %67 = vector.extract_strided_slice %54 {offsets = [0, 512], sizes = [2, 256], strides = [1, 1]} : vector<2x1024xf32> to vector<2x256xf32>
    %68 = math.tanh %67 : vector<2x256xf32>
    %69 = vector.extract_strided_slice %54 {offsets = [0, 768], sizes = [2, 256], strides = [1, 1]} : vector<2x1024xf32> to vector<2x256xf32>
    %70 = arith.negf %69 : vector<2x256xf32>
    %71 = math.exp %70 : vector<2x256xf32>
    %cst_16 = arith.constant 1.000000e+00 : f32
    %72 = vector.broadcast %cst_16 : f32 to vector<2x256xf32>
    %73 = arith.addf %72, %71 : vector<2x256xf32>
    %74 = arith.divf %72, %73 : vector<2x256xf32>
    %75 = arith.mulf %66, %48 : vector<2x256xf32>
    %76 = arith.mulf %60, %68 : vector<2x256xf32>
    %77 = arith.addf %75, %76 : vector<2x256xf32>
    %78 = math.tanh %77 : vector<2x256xf32>
    %79 = arith.mulf %74, %78 : vector<2x256xf32>
    %80 = vector.extract_strided_slice %18 {offsets = [2, 0, 0], sizes = [1, 2, 1024], strides = [1, 1, 1]} : vector<8x2x1024xf32> to vector<1x2x1024xf32>
    %81 = vector.shape_cast %80 : vector<1x2x1024xf32> to vector<2x1024xf32>
    %cst_17 = arith.constant dense<0.000000e+00> : vector<2x1024xf32>
    %82 = tpu.matmul %79, %19, %cst_17 {dimension_numbers = #tpu.dot_dimension_numbers<[1], [0], [0], [1], [0, 0, 1, 1], [], []>} : vector<2x256xf32>, vector<256x1024xf32>, vector<2x1024xf32> -> vector<2x1024xf32>
    %83 = arith.addf %81, %82 : vector<2x1024xf32>
    %84 = vector.extract_strided_slice %83 {offsets = [0, 0], sizes = [2, 256], strides = [1, 1]} : vector<2x1024xf32> to vector<2x256xf32>
    %85 = arith.negf %84 : vector<2x256xf32>
    %86 = math.exp %85 : vector<2x256xf32>
    %cst_18 = arith.constant 1.000000e+00 : f32
    %87 = vector.broadcast %cst_18 : f32 to vector<2x256xf32>
    %88 = arith.addf %87, %86 : vector<2x256xf32>
    %89 = arith.divf %87, %88 : vector<2x256xf32>
    %90 = vector.extract_strided_slice %83 {offsets = [0, 256], sizes = [2, 256], strides = [1, 1]} : vector<2x1024xf32> to vector<2x256xf32>
    %91 = arith.negf %90 : vector<2x256xf32>
    %92 = math.exp %91 : vector<2x256xf32>
    %cst_19 = arith.constant 1.000000e+00 : f32
    %93 = vector.broadcast %cst_19 : f32 to vector<2x256xf32>
    %94 = arith.addf %93, %92 : vector<2x256xf32>
    %95 = arith.divf %93, %94 : vector<2x256xf32>
    %96 = vector.extract_strided_slice %83 {offsets = [0, 512], sizes = [2, 256], strides = [1, 1]} : vector<2x1024xf32> to vector<2x256xf32>
    %97 = math.tanh %96 : vector<2x256xf32>
    %98 = vector.extract_strided_slice %83 {offsets = [0, 768], sizes = [2, 256], strides = [1, 1]} : vector<2x1024xf32> to vector<2x256xf32>
    %99 = arith.negf %98 : vector<2x256xf32>
    %100 = math.exp %99 : vector<2x256xf32>
    %cst_20 = arith.constant 1.000000e+00 : f32
    %101 = vector.broadcast %cst_20 : f32 to vector<2x256xf32>
    %102 = arith.addf %101, %100 : vector<2x256xf32>
    %103 = arith.divf %101, %102 : vector<2x256xf32>
    %104 = arith.mulf %95, %77 : vector<2x256xf32>
    %105 = arith.mulf %89, %97 : vector<2x256xf32>
    %106 = arith.addf %104, %105 : vector<2x256xf32>
    %107 = math.tanh %106 : vector<2x256xf32>
    %108 = arith.mulf %103, %107 : vector<2x256xf32>
    %109 = vector.extract_strided_slice %18 {offsets = [3, 0, 0], sizes = [1, 2, 1024], strides = [1, 1, 1]} : vector<8x2x1024xf32> to vector<1x2x1024xf32>
    %110 = vector.shape_cast %109 : vector<1x2x1024xf32> to vector<2x1024xf32>
    %cst_21 = arith.constant dense<0.000000e+00> : vector<2x1024xf32>
    %111 = tpu.matmul %108, %19, %cst_21 {dimension_numbers = #tpu.dot_dimension_numbers<[1], [0], [0], [1], [0, 0, 1, 1], [], []>} : vector<2x256xf32>, vector<256x1024xf32>, vector<2x1024xf32> -> vector<2x1024xf32>
    %112 = arith.addf %110, %111 : vector<2x1024xf32>
    %113 = vector.extract_strided_slice %112 {offsets = [0, 0], sizes = [2, 256], strides = [1, 1]} : vector<2x1024xf32> to vector<2x256xf32>
    %114 = arith.negf %113 : vector<2x256xf32>
    %115 = math.exp %114 : vector<2x256xf32>
    %cst_22 = arith.constant 1.000000e+00 : f32
    %116 = vector.broadcast %cst_22 : f32 to vector<2x256xf32>
    %117 = arith.addf %116, %115 : vector<2x256xf32>
    %118 = arith.divf %116, %117 : vector<2x256xf32>
    %119 = vector.extract_strided_slice %112 {offsets = [0, 256], sizes = [2, 256], strides = [1, 1]} : vector<2x1024xf32> to vector<2x256xf32>
    %120 = arith.negf %119 : vector<2x256xf32>
    %121 = math.exp %120 : vector<2x256xf32>
    %cst_23 = arith.constant 1.000000e+00 : f32
    %122 = vector.broadcast %cst_23 : f32 to vector<2x256xf32>
    %123 = arith.addf %122, %121 : vector<2x256xf32>
    %124 = arith.divf %122, %123 : vector<2x256xf32>
    %125 = vector.extract_strided_slice %112 {offsets = [0, 512], sizes = [2, 256], strides = [1, 1]} : vector<2x1024xf32> to vector<2x256xf32>
    %126 = math.tanh %125 : vector<2x256xf32>
    %127 = vector.extract_strided_slice %112 {offsets = [0, 768], sizes = [2, 256], strides = [1, 1]} : vector<2x1024xf32> to vector<2x256xf32>
    %128 = arith.negf %127 : vector<2x256xf32>
    %129 = math.exp %128 : vector<2x256xf32>
    %cst_24 = arith.constant 1.000000e+00 : f32
    %130 = vector.broadcast %cst_24 : f32 to vector<2x256xf32>
    %131 = arith.addf %130, %129 : vector<2x256xf32>
    %132 = arith.divf %130, %131 : vector<2x256xf32>
    %133 = arith.mulf %124, %106 : vector<2x256xf32>
    %134 = arith.mulf %118, %126 : vector<2x256xf32>
    %135 = arith.addf %133, %134 : vector<2x256xf32>
    %136 = math.tanh %135 : vector<2x256xf32>
    %137 = arith.mulf %132, %136 : vector<2x256xf32>
    %138 = vector.extract_strided_slice %18 {offsets = [4, 0, 0], sizes = [1, 2, 1024], strides = [1, 1, 1]} : vector<8x2x1024xf32> to vector<1x2x1024xf32>
    %139 = vector.shape_cast %138 : vector<1x2x1024xf32> to vector<2x1024xf32>
    %cst_25 = arith.constant dense<0.000000e+00> : vector<2x1024xf32>
    %140 = tpu.matmul %137, %19, %cst_25 {dimension_numbers = #tpu.dot_dimension_numbers<[1], [0], [0], [1], [0, 0, 1, 1], [], []>} : vector<2x256xf32>, vector<256x1024xf32>, vector<2x1024xf32> -> vector<2x1024xf32>
    %141 = arith.addf %139, %140 : vector<2x1024xf32>
    %142 = vector.extract_strided_slice %141 {offsets = [0, 0], sizes = [2, 256], strides = [1, 1]} : vector<2x1024xf32> to vector<2x256xf32>
    %143 = arith.negf %142 : vector<2x256xf32>
    %144 = math.exp %143 : vector<2x256xf32>
    %cst_26 = arith.constant 1.000000e+00 : f32
    %145 = vector.broadcast %cst_26 : f32 to vector<2x256xf32>
    %146 = arith.addf %145, %144 : vector<2x256xf32>
    %147 = arith.divf %145, %146 : vector<2x256xf32>
    %148 = vector.extract_strided_slice %141 {offsets = [0, 256], sizes = [2, 256], strides = [1, 1]} : vector<2x1024xf32> to vector<2x256xf32>
    %149 = arith.negf %148 : vector<2x256xf32>
    %150 = math.exp %149 : vector<2x256xf32>
    %cst_27 = arith.constant 1.000000e+00 : f32
    %151 = vector.broadcast %cst_27 : f32 to vector<2x256xf32>
    %152 = arith.addf %151, %150 : vector<2x256xf32>
    %153 = arith.divf %151, %152 : vector<2x256xf32>
    %154 = vector.extract_strided_slice %141 {offsets = [0, 512], sizes = [2, 256], strides = [1, 1]} : vector<2x1024xf32> to vector<2x256xf32>
    %155 = math.tanh %154 : vector<2x256xf32>
    %156 = vector.extract_strided_slice %141 {offsets = [0, 768], sizes = [2, 256], strides = [1, 1]} : vector<2x1024xf32> to vector<2x256xf32>
    %157 = arith.negf %156 : vector<2x256xf32>
    %158 = math.exp %157 : vector<2x256xf32>
    %cst_28 = arith.constant 1.000000e+00 : f32
    %159 = vector.broadcast %cst_28 : f32 to vector<2x256xf32>
    %160 = arith.addf %159, %158 : vector<2x256xf32>
    %161 = arith.divf %159, %160 : vector<2x256xf32>
    %162 = arith.mulf %153, %135 : vector<2x256xf32>
    %163 = arith.mulf %147, %155 : vector<2x256xf32>
    %164 = arith.addf %162, %163 : vector<2x256xf32>
    %165 = math.tanh %164 : vector<2x256xf32>
    %166 = arith.mulf %161, %165 : vector<2x256xf32>
    %167 = vector.extract_strided_slice %18 {offsets = [5, 0, 0], sizes = [1, 2, 1024], strides = [1, 1, 1]} : vector<8x2x1024xf32> to vector<1x2x1024xf32>
    %168 = vector.shape_cast %167 : vector<1x2x1024xf32> to vector<2x1024xf32>
    %cst_29 = arith.constant dense<0.000000e+00> : vector<2x1024xf32>
    %169 = tpu.matmul %166, %19, %cst_29 {dimension_numbers = #tpu.dot_dimension_numbers<[1], [0], [0], [1], [0, 0, 1, 1], [], []>} : vector<2x256xf32>, vector<256x1024xf32>, vector<2x1024xf32> -> vector<2x1024xf32>
    %170 = arith.addf %168, %169 : vector<2x1024xf32>
    %171 = vector.extract_strided_slice %170 {offsets = [0, 0], sizes = [2, 256], strides = [1, 1]} : vector<2x1024xf32> to vector<2x256xf32>
    %172 = arith.negf %171 : vector<2x256xf32>
    %173 = math.exp %172 : vector<2x256xf32>
    %cst_30 = arith.constant 1.000000e+00 : f32
    %174 = vector.broadcast %cst_30 : f32 to vector<2x256xf32>
    %175 = arith.addf %174, %173 : vector<2x256xf32>
    %176 = arith.divf %174, %175 : vector<2x256xf32>
    %177 = vector.extract_strided_slice %170 {offsets = [0, 256], sizes = [2, 256], strides = [1, 1]} : vector<2x1024xf32> to vector<2x256xf32>
    %178 = arith.negf %177 : vector<2x256xf32>
    %179 = math.exp %178 : vector<2x256xf32>
    %cst_31 = arith.constant 1.000000e+00 : f32
    %180 = vector.broadcast %cst_31 : f32 to vector<2x256xf32>
    %181 = arith.addf %180, %179 : vector<2x256xf32>
    %182 = arith.divf %180, %181 : vector<2x256xf32>
    %183 = vector.extract_strided_slice %170 {offsets = [0, 512], sizes = [2, 256], strides = [1, 1]} : vector<2x1024xf32> to vector<2x256xf32>
    %184 = math.tanh %183 : vector<2x256xf32>
    %185 = vector.extract_strided_slice %170 {offsets = [0, 768], sizes = [2, 256], strides = [1, 1]} : vector<2x1024xf32> to vector<2x256xf32>
    %186 = arith.negf %185 : vector<2x256xf32>
    %187 = math.exp %186 : vector<2x256xf32>
    %cst_32 = arith.constant 1.000000e+00 : f32
    %188 = vector.broadcast %cst_32 : f32 to vector<2x256xf32>
    %189 = arith.addf %188, %187 : vector<2x256xf32>
    %190 = arith.divf %188, %189 : vector<2x256xf32>
    %191 = arith.mulf %182, %164 : vector<2x256xf32>
    %192 = arith.mulf %176, %184 : vector<2x256xf32>
    %193 = arith.addf %191, %192 : vector<2x256xf32>
    %194 = math.tanh %193 : vector<2x256xf32>
    %195 = arith.mulf %190, %194 : vector<2x256xf32>
    %196 = vector.extract_strided_slice %18 {offsets = [6, 0, 0], sizes = [1, 2, 1024], strides = [1, 1, 1]} : vector<8x2x1024xf32> to vector<1x2x1024xf32>
    %197 = vector.shape_cast %196 : vector<1x2x1024xf32> to vector<2x1024xf32>
    %cst_33 = arith.constant dense<0.000000e+00> : vector<2x1024xf32>
    %198 = tpu.matmul %195, %19, %cst_33 {dimension_numbers = #tpu.dot_dimension_numbers<[1], [0], [0], [1], [0, 0, 1, 1], [], []>} : vector<2x256xf32>, vector<256x1024xf32>, vector<2x1024xf32> -> vector<2x1024xf32>
    %199 = arith.addf %197, %198 : vector<2x1024xf32>
    %200 = vector.extract_strided_slice %199 {offsets = [0, 0], sizes = [2, 256], strides = [1, 1]} : vector<2x1024xf32> to vector<2x256xf32>
    %201 = arith.negf %200 : vector<2x256xf32>
    %202 = math.exp %201 : vector<2x256xf32>
    %cst_34 = arith.constant 1.000000e+00 : f32
    %203 = vector.broadcast %cst_34 : f32 to vector<2x256xf32>
    %204 = arith.addf %203, %202 : vector<2x256xf32>
    %205 = arith.divf %203, %204 : vector<2x256xf32>
    %206 = vector.extract_strided_slice %199 {offsets = [0, 256], sizes = [2, 256], strides = [1, 1]} : vector<2x1024xf32> to vector<2x256xf32>
    %207 = arith.negf %206 : vector<2x256xf32>
    %208 = math.exp %207 : vector<2x256xf32>
    %cst_35 = arith.constant 1.000000e+00 : f32
    %209 = vector.broadcast %cst_35 : f32 to vector<2x256xf32>
    %210 = arith.addf %209, %208 : vector<2x256xf32>
    %211 = arith.divf %209, %210 : vector<2x256xf32>
    %212 = vector.extract_strided_slice %199 {offsets = [0, 512], sizes = [2, 256], strides = [1, 1]} : vector<2x1024xf32> to vector<2x256xf32>
    %213 = math.tanh %212 : vector<2x256xf32>
    %214 = vector.extract_strided_slice %199 {offsets = [0, 768], sizes = [2, 256], strides = [1, 1]} : vector<2x1024xf32> to vector<2x256xf32>
    %215 = arith.negf %214 : vector<2x256xf32>
    %216 = math.exp %215 : vector<2x256xf32>
    %cst_36 = arith.constant 1.000000e+00 : f32
    %217 = vector.broadcast %cst_36 : f32 to vector<2x256xf32>
    %218 = arith.addf %217, %216 : vector<2x256xf32>
    %219 = arith.divf %217, %218 : vector<2x256xf32>
    %220 = arith.mulf %211, %193 : vector<2x256xf32>
    %221 = arith.mulf %205, %213 : vector<2x256xf32>
    %222 = arith.addf %220, %221 : vector<2x256xf32>
    %223 = math.tanh %222 : vector<2x256xf32>
    %224 = arith.mulf %219, %223 : vector<2x256xf32>
    %225 = vector.extract_strided_slice %18 {offsets = [7, 0, 0], sizes = [1, 2, 1024], strides = [1, 1, 1]} : vector<8x2x1024xf32> to vector<1x2x1024xf32>
    %226 = vector.shape_cast %225 : vector<1x2x1024xf32> to vector<2x1024xf32>
    %cst_37 = arith.constant dense<0.000000e+00> : vector<2x1024xf32>
    %227 = tpu.matmul %224, %19, %cst_37 {dimension_numbers = #tpu.dot_dimension_numbers<[1], [0], [0], [1], [0, 0, 1, 1], [], []>} : vector<2x256xf32>, vector<256x1024xf32>, vector<2x1024xf32> -> vector<2x1024xf32>
    %228 = arith.addf %226, %227 : vector<2x1024xf32>
    %229 = vector.extract_strided_slice %228 {offsets = [0, 0], sizes = [2, 256], strides = [1, 1]} : vector<2x1024xf32> to vector<2x256xf32>
    %230 = arith.negf %229 : vector<2x256xf32>
    %231 = math.exp %230 : vector<2x256xf32>
    %cst_38 = arith.constant 1.000000e+00 : f32
    %232 = vector.broadcast %cst_38 : f32 to vector<2x256xf32>
    %233 = arith.addf %232, %231 : vector<2x256xf32>
    %234 = arith.divf %232, %233 : vector<2x256xf32>
    %235 = vector.extract_strided_slice %228 {offsets = [0, 256], sizes = [2, 256], strides = [1, 1]} : vector<2x1024xf32> to vector<2x256xf32>
    %236 = arith.negf %235 : vector<2x256xf32>
    %237 = math.exp %236 : vector<2x256xf32>
    %cst_39 = arith.constant 1.000000e+00 : f32
    %238 = vector.broadcast %cst_39 : f32 to vector<2x256xf32>
    %239 = arith.addf %238, %237 : vector<2x256xf32>
    %240 = arith.divf %238, %239 : vector<2x256xf32>
    %241 = vector.extract_strided_slice %228 {offsets = [0, 512], sizes = [2, 256], strides = [1, 1]} : vector<2x1024xf32> to vector<2x256xf32>
    %242 = math.tanh %241 : vector<2x256xf32>
    %243 = vector.extract_strided_slice %228 {offsets = [0, 768], sizes = [2, 256], strides = [1, 1]} : vector<2x1024xf32> to vector<2x256xf32>
    %244 = arith.negf %243 : vector<2x256xf32>
    %245 = math.exp %244 : vector<2x256xf32>
    %cst_40 = arith.constant 1.000000e+00 : f32
    %246 = vector.broadcast %cst_40 : f32 to vector<2x256xf32>
    %247 = arith.addf %246, %245 : vector<2x256xf32>
    %248 = arith.divf %246, %247 : vector<2x256xf32>
    %249 = arith.mulf %240, %222 : vector<2x256xf32>
    %250 = arith.mulf %234, %242 : vector<2x256xf32>
    %251 = arith.addf %249, %250 : vector<2x256xf32>
    %252 = math.tanh %251 : vector<2x256xf32>
    %253 = arith.mulf %248, %252 : vector<2x256xf32>
    %c0_41 = arith.constant 0 : index
    %c0_42 = arith.constant 0 : index
    %254 = vector.load %arg5[%c0_41, %c0_42] : memref<256x256xf32, #tpu.memory_space<vmem>>, vector<256x256xf32>
    %cst_43 = arith.constant dense<0.000000e+00> : vector<2x256xf32>
    %255 = tpu.matmul %253, %254, %cst_43 {dimension_numbers = #tpu.dot_dimension_numbers<[1], [0], [0], [1], [0, 0, 1, 1], [], []>} : vector<2x256xf32>, vector<256x256xf32>, vector<2x256xf32> -> vector<2x256xf32>
    %c0_44 = arith.constant 0 : index
    %c0_45 = arith.constant 0 : index
    %256 = vector.load %arg6[%c0_44, %c0_45] : memref<1x256xf32, #tpu.memory_space<vmem>>, vector<1x256xf32>
    %257 = vector.broadcast %256 : vector<1x256xf32> to vector<2x256xf32>
    %258 = arith.addf %255, %257 : vector<2x256xf32>
    %259 = vector.extract_strided_slice %258 {offsets = [0, 0], sizes = [2, 128], strides = [1, 1]} : vector<2x256xf32> to vector<2x128xf32>
    %c0_46 = arith.constant 0 : index
    %c0_47 = arith.constant 0 : index
    %260 = vector.load %arg7[%c0_46, %c0_47] : memref<2x128xf32, #tpu.memory_space<vmem>>, vector<2x128xf32>
    tpu.vector_store %arg7[%c0_46, %c0_47], %259 {strides = array<i32>} : memref<2x128xf32, #tpu.memory_space<vmem>>, vector<2x128xf32>,
    %261 = vector.extract_strided_slice %258 {offsets = [0, 128], sizes = [2, 128], strides = [1, 1]} : vector<2x256xf32> to vector<2x128xf32>
    %c0_48 = arith.constant 0 : index
    %c0_49 = arith.constant 0 : index
    %262 = vector.load %arg8[%c0_48, %c0_49] : memref<2x128xf32, #tpu.memory_space<vmem>>, vector<2x128xf32>
    tpu.vector_store %arg8[%c0_48, %c0_49], %261 {strides = array<i32>} : memref<2x128xf32, #tpu.memory_space<vmem>>, vector<2x128xf32>,
    return
  }
  func.func @transform_0(%arg0: i32) -> (i32, i32, i32) {
    %c0_i32 = arith.constant 0 : i32
    %c0_i32_0 = arith.constant 0 : i32
    %c0_i32_1 = arith.constant 0 : i32
    return %c0_i32, %arg0, %c0_i32_0 : i32, i32, i32
  }
  func.func @transform_1(%arg0: i32) -> (i32, i32) {
    %c0_i32 = arith.constant 0 : i32
    %c0_i32_0 = arith.constant 0 : i32
    %c0_i32_1 = arith.constant 0 : i32
    return %c0_i32, %c0_i32_0 : i32, i32
  }
  func.func @transform_2(%arg0: i32) -> (i32, i32) {
    %c0_i32 = arith.constant 0 : i32
    %c0_i32_0 = arith.constant 0 : i32
    %c0_i32_1 = arith.constant 0 : i32
    return %c0_i32, %c0_i32_0 : i32, i32
  }
  func.func @transform_3(%arg0: i32) -> (i32, i32) {
    %c0_i32 = arith.constant 0 : i32
    %c0_i32_0 = arith.constant 0 : i32
    %c0_i32_1 = arith.constant 0 : i32
    return %c0_i32, %c0_i32_0 : i32, i32
  }
  func.func @transform_4(%arg0: i32) -> (i32, i32) {
    %c0_i32 = arith.constant 0 : i32
    %c0_i32_0 = arith.constant 0 : i32
    %c0_i32_1 = arith.constant 0 : i32
    return %c0_i32, %c0_i32_0 : i32, i32
  }
  func.func @transform_5(%arg0: i32) -> (i32, i32) {
    %c0_i32 = arith.constant 0 : i32
    %c0_i32_0 = arith.constant 0 : i32
    %c0_i32_1 = arith.constant 0 : i32
    return %c0_i32, %c0_i32_0 : i32, i32
  }
  func.func @transform_6(%arg0: i32) -> (i32, i32) {
    %c0_i32 = arith.constant 0 : i32
    %c0_i32_0 = arith.constant 0 : i32
    return %arg0, %c0_i32 : i32, i32
  }
  func.func @transform_7(%arg0: i32) -> (i32, i32) {
    %c0_i32 = arith.constant 0 : i32
    %c0_i32_0 = arith.constant 0 : i32
    return %arg0, %c0_i32 : i32, i32
  }
}

</mosaic_0001>

<bundles_post_ra>
// kernel: tpu_custom_call.1
= control target key start
LH: loop header
LB: loop body
LE: loop exit
PB: predicated region body
PF: predicated region fallthrough
CT: control target
= control target key end

     0   :  { %13 = vsyncpa [#allocation3], 0  ;;  %s8116_s0 = inlined_call_operand.vmem [shape: f32[8,2,2], index: 0, kind: input, shape index: {}]   ;;  %s8117_s1 = inlined_call_operand.vmem [shape: f32[2,1024], index: 1, kind: input, shape index: {}]   ;;  %s8118_s2 = inlined_call_operand.hbm [shape: f32[256,1024], index: 2, kind: input, shape index: {}]   ;;  %s8119_s3 = inlined_call_operand.vmem [shape: f32[1,1024], index: 3, kind: input, shape index: {}]   ;;  %s8120_s4 = inlined_call_operand.hbm [shape: f32[256,256], index: 4, kind: input, shape index: {}]   ;;  %s8121_s5 = inlined_call_operand.vmem [shape: f32[1,256], index: 5, kind: input, shape index: {}]   ;;  %s8122_s6 = inlined_call_operand.hbm [shape: f32[2,128], index: 6, kind: output, shape index: {0}]   ;;  %s8123_s7 = inlined_call_operand.hbm [shape: f32[2,128], index: 7, kind: output, shape index: {1}]  }
   0x1   :  { %14 = vsyncpa [#allocation6], 0 }
   0x2   :  { %15 = vsyncpa [#allocation4], 0 }
   0x3   :  { %16 = vsyncpa [#allocation9], 0  ;;  %s6264_s24 = smov [#allocation2]   ;;  %s6168_s28 = scalar_lea.hbm %s8118_s2, 32768 }
   0x4   :  { %s26_s25 = sshll.u32 %s6264_s24, 4  ;;  %p6169_p0 = scmp.ne.s32.totalorder %s8118_s2, %s6168_s28  ;;  %s27_s25 = int_to_ptr.vmem [resolvable:$true] %s26_s25 }
   0x5   :  { %p6172_p1 = scmp.lt.u32.totalorder %s6168_s28, %s8118_s2 }
   0x7   :  { %p6174_p2 = pnand %p6172_p1, %p6169_p0 }
   0x9   :  { %6177 = shalt.err (!%p6174_p2)
}
   0xa   :  { %s6178_s10 = scalar_lea.vmem %s27_s25, 32768  ;;  %p6183_p4 = scmp.lt.s32.totalorder %s27_s25, %s27_s25 }
   0xb   :  { %p6179_p3 = scmp.ne.s32.totalorder %s27_s25, %s6178_s10  ;;  %p6184_p5 = scmp.lt.s32.totalorder %s6178_s10, %s6178_s10 }
   0xd   :  { %p6185_p6 = por %p6184_p5, %p6183_p4 }
   0xf   :  { %p6186_p7 = pnand %p6185_p6, %p6179_p3 }
  0x11   :  { %6189 = shalt.err (!%p6186_p7)
}
  0x12   :  { %s6265_s11 = smov 1024   ;;  %s6266_s12 = smov 64  }
  0x13   :  { %32 = dma.hbm_to_vmem [thread:$0]  %s8118_s2, 32768, %s27_s25, [#allocation3], %s6265_s11, %s6265_s11, %s6266_s12  }
  0x14   :  { %s6267_s15 = smov [#allocation5]   ;;  %s6190_s19 = scalar_lea.hbm %s8120_s4, 8192 }
  0x15   :  { %s40_s16 = sshll.u32 %s6267_s15, 4  ;;  %p6191_p8 = scmp.ne.s32.totalorder %s8120_s4, %s6190_s19  ;;  %s41_s16 = int_to_ptr.vmem [resolvable:$true] %s40_s16 }
  0x16   :  { %p6194_p9 = scmp.lt.u32.totalorder %s6190_s19, %s8120_s4 }
  0x18   :  { %p6196_p10 = pnand %p6194_p9, %p6191_p8 }
  0x1a   :  { %6199 = shalt.err (!%p6196_p10)
}
  0x1b   :  { %s6200_s24 = scalar_lea.vmem %s41_s16, 8192  ;;  %p6205_p12 = scmp.lt.s32.totalorder %s41_s16, %s41_s16 }
  0x1c   :  { %p6201_p11 = scmp.ne.s32.totalorder %s41_s16, %s6200_s24  ;;  %p6206_p13 = scmp.lt.s32.totalorder %s6200_s24, %s6200_s24 }
  0x1e   :  { %p6207_p0 = por %p6206_p13, %p6205_p12 }
  0x20   :  { %p6208_p1 = pnand %p6207_p0, %p6201_p11 }
  0x22   :  { %6211 = shalt.err (!%p6208_p1)
}
  0x23   :  { %s6268_s2 = smov 256   ;;  %s6269_s25 = smov 16  }
  0x24   :  { %46 = dma.hbm_to_vmem [thread:$0]  %s8120_s4, 8192, %s41_s16, [#allocation6], %s6268_s2, %s6268_s2, %s6269_s25  }
  0x25   :  { %6256 = dma.done.wait [#allocation3], 32768  }
  0x26   :  { %6257 = vsyncadd [#allocation3], 4294934528 }
  0x27   :  { %6258 = dma.done.wait [#allocation6], 8192  }
  0x28   :  { %6259 = vsyncadd [#allocation6], 4294959104  ;;  %v8125_v0 = vmov 0.0   ;;  %v582_v1 = vld [vmem:[#allocation2 + $0x8] sm:$0xff]  ;;  %v584_v3 = vld [vmem:[#allocation2 + $0x18] sm:$0xff]  ;;  %v8124_v26 = vmov 0  }
  0x29   :  { %901 = vmatprep.mubr.f32.mxu0 %v8125_v0  ;;  %972 = vmatprep.mubr.f32.mxu1 %v8125_v0  ;;  %v590_v2 = vld [vmem:[#allocation2 + $0x48] sm:$0xff]  ;;  %v592_v5 = vld [vmem:[#allocation2 + $0x58] sm:$0xff]  ;;  %v581_v6 = vld [vmem:[#allocation2] sm:$0xff]  ;;  %s6273_s2 = smov [#allocation7]   ;;  %s6274_s26 = smov [#allocation8]  }
  0x2a   :  { %v6341_v4 = vpack.c.bf16 %v590_v2, %v582_v1  ;;  %v589_v7 = vld [vmem:[#allocation2 + $0x40] sm:$0xff]  ;;  %v6343_v8 = vpack.c.bf16 %v592_v5, %v584_v3  ;;  %v583_v10 = vld [vmem:[#allocation2 + $0x10] sm:$0xff]  ;;  %v598_v12 = vld [vmem:[#allocation2 + $0x88] sm:$0xff]  ;;  %5907 = vset.pattern.permute.xlu0 %v8124_v26  ;;  %5909 = vset.pattern.permute.xlu1 %v8124_v26  ;;  %s3712_s25 = sshll.u32 %s6273_s2, 4  ;;  %s3722_s27 = sshll.u32 %s6274_s26, 4  ;;  %s3713_s25 = int_to_ptr.vmem [resolvable:$true] %s3712_s25  ;;  %s3723_s27 = int_to_ptr.vmem [resolvable:$true] %s3722_s27 }
  0x2b   :  { %v6345_v9 = vpack.c.bf16 %v589_v7, %v581_v6  ;;  %v591_v11 = vld [vmem:[#allocation2 + $0x50] sm:$0xff]  ;;  %v606_v14 = vld [vmem:[#allocation2 + $0xc8] sm:$0xff]  ;;  %v600_v15 = vld [vmem:[#allocation2 + $0x98] sm:$0xff]  ;;  %s6212_s4 = scalar_lea.vmem %s3713_s25, 32  ;;  %p6217_p3 = scmp.lt.s32.totalorder %s3713_s25, %s3713_s25 }
  0x2c   :  { %8416 = vst [vmem:[#allocation14_spill] sm:$0xff] %v6341_v4  ;;  %8417 = vst [vmem:[#allocation15_spill] sm:$0xff] %v6343_v8  ;;  %3785 = vmatprep.subr.bf16.mxu0 %v6341_v4  ;;  %v6348_v13 = vpack.c.bf16 %v591_v11, %v583_v10  ;;  %v608_v16 = vld [vmem:[#allocation2 + $0xd8] sm:$0xff]  ;;  %3849 = vmatprep.subr.bf16.mxu1 %v6343_v8  ;;  %v6352_v17 = vpack.c.bf16 %v606_v14, %v598_v12  ;;  %v597_v19 = vld [vmem:[#allocation2 + $0x80] sm:$0xff]  ;;  %p6213_p2 = scmp.ne.s32.totalorder %s3713_s25, %s6212_s4  ;;  %p6218_p4 = scmp.lt.s32.totalorder %s6212_s4, %s6212_s4 }
  0x2d   :  { %8418 = vst [vmem:[#allocation16_spill] sm:$0xff] %v6345_v9  ;;  %3787 = vmatpush1.bf16.msra.mxu0 %v6345_v9  ;;  %v6354_v18 = vpack.c.bf16 %v608_v16, %v600_v15  ;;  %v605_v20 = vld [vmem:[#allocation2 + $0xc0] sm:$0xff]  ;;  %v599_v21 = vld [vmem:[#allocation2 + $0x90] sm:$0xff]  ;;  %v614_v24 = vld [vmem:[#allocation2 + $0x108] sm:$0xff] }
  0x2e   :  { %8419 = vst [vmem:[#allocation17_spill] sm:$0xff] %v6348_v13  ;;  %8420 = vst [vmem:[#allocation18_spill] sm:$0xff] %v6352_v17  ;;  %3851 = vmatpush1.bf16.msra.mxu1 %v6348_v13  ;;  %v6357_v22 = vpack.c.bf16 %v605_v20, %v597_v19  ;;  %v607_v23 = vld [vmem:[#allocation2 + $0xd0] sm:$0xff]  ;;  %v622_v25 = vld [vmem:[#allocation2 + $0x148] sm:$0xff]  ;;  %3789 = vmatprep.subr.bf16.mxu0 %v6352_v17  ;;  %p6219_p5 = por %p6218_p4, %p6217_p3 }
  0x2f   :  { %8421 = vst [vmem:[#allocation19_spill] sm:$0xff] %v6354_v18  ;;  %3853 = vmatprep.subr.bf16.mxu1 %v6354_v18  ;;  %v6362_v27 = vpack.c.bf16 %v607_v23, %v599_v21  ;;  %v6364_v28 = vpack.c.bf16 %v622_v25, %v614_v24  ;;  %v616_v29 = vld [vmem:[#allocation2 + $0x118] sm:$0xff]  ;;  %v613_v31 = vld [vmem:[#allocation2 + $0x100] sm:$0xff]  ;;  %v615_v34 = vld [vmem:[#allocation2 + $0x110] sm:$0xff] }
  0x30   :  { %8422 = vst [vmem:[#allocation20_spill] sm:$0xff] %v6357_v22  ;;  %v624_v30 = vld [vmem:[#allocation2 + $0x158] sm:$0xff]  ;;  %v621_v33 = vld [vmem:[#allocation2 + $0x140] sm:$0xff]  ;;  %v623_v35 = vld [vmem:[#allocation2 + $0x150] sm:$0xff]  ;;  %p6220_p6 = pnand %p6219_p5, %p6213_p2 }
  0x31   :  { %8423 = vst [vmem:[#allocation21_spill] sm:$0xff] %v6362_v27  ;;  %8424 = vst [vmem:[#allocation22_spill] sm:$0xff] %v6364_v28  ;;  %v6366_v32 = vpack.c.bf16 %v624_v30, %v616_v29  ;;  %3791 = vmatpush1.bf16.msra.mxu0 %v6357_v22  ;;  %v6370_v36 = vpack.c.bf16 %v621_v33, %v613_v31  ;;  %v630_v37 = vld [vmem:[#allocation2 + $0x188] sm:$0xff]  ;;  %v632_v39 = vld [vmem:[#allocation2 + $0x198] sm:$0xff]  ;;  %v6374_v40 = vpack.c.bf16 %v623_v35, %v615_v34 }
  0x32   :  { %v638_v38 = vld [vmem:[#allocation2 + $0x1c8] sm:$0xff]  ;;  %3855 = vmatpush1.bf16.msra.mxu1 %v6362_v27  ;;  %3793 = vmatprep.subr.bf16.mxu0 %v6364_v28  ;;  %v640_v42 = vld [vmem:[#allocation2 + $0x1d8] sm:$0xff]  ;;  %v629_v43 = vld [vmem:[#allocation2 + $0x180] sm:$0xff] }
  0x33   :  { %8425 = vst [vmem:[#allocation23_spill] sm:$0xff] %v6366_v32  ;;  %8426 = vst [vmem:[#allocation24_spill] sm:$0xff] %v6370_v36  ;;  %v6376_v41 = vpack.c.bf16 %v638_v38, %v630_v37  ;;  %v637_v44 = vld [vmem:[#allocation2 + $0x1c0] sm:$0xff]  ;;  %3857 = vmatprep.subr.bf16.mxu1 %v6366_v32  ;;  %v6379_v45 = vpack.c.bf16 %v640_v42, %v632_v39  ;;  %v631_v46 = vld [vmem:[#allocation2 + $0x190] sm:$0xff] }
  0x34   :  { %8427 = vst [vmem:[#allocation25_spill] sm:$0xff] %v6374_v40  ;;  %v639_v47 = vld [vmem:[#allocation2 + $0x1d0] sm:$0xff]  ;;  %v646_v48 = vld [vmem:[#allocation2 + $0x208] sm:$0xff]  ;;  %v648_v50 = vld [vmem:[#allocation2 + $0x218] sm:$0xff]  ;;  %v6382_v52 = vpack.c.bf16 %v637_v44, %v629_v43 }
  0x35   :  { %8428 = vst [vmem:[#allocation26_spill] sm:$0xff] %v6376_v41  ;;  %8429 = vst [vmem:[#allocation27_spill] sm:$0xff] %v6379_v45  ;;  %v654_v49 = vld [vmem:[#allocation2 + $0x248] sm:$0xff]  ;;  %v656_v51 = vld [vmem:[#allocation2 + $0x258] sm:$0xff]  ;;  %3795 = vmatpush1.bf16.msra.mxu0 %v6370_v36  ;;  %v6386_v53 = vpack.c.bf16 %v639_v47, %v631_v46 }
  0x36   :  { %8430 = vst [vmem:[#allocation28_spill] sm:$0xff] %v6382_v52  ;;  %3859 = vmatpush1.bf16.msra.mxu1 %v6374_v40  ;;  %3797 = vmatprep.subr.bf16.mxu0 %v6376_v41  ;;  %v6388_v54 = vpack.c.bf16 %v654_v49, %v646_v48  ;;  %v645_v55 = vld [vmem:[#allocation2 + $0x200] sm:$0xff]  ;;  %v647_v57 = vld [vmem:[#allocation2 + $0x210] sm:$0xff]  ;;  %v6391_v58 = vpack.c.bf16 %v656_v51, %v648_v50  ;;  %v662_v60 = vld [vmem:[#allocation2 + $0x288] sm:$0xff] }
  0x37   :  { %8431 = vst [vmem:[#allocation29_spill] sm:$0xff] %v6386_v53  ;;  %v653_v56 = vld [vmem:[#allocation2 + $0x240] sm:$0xff]  ;;  %3861 = vmatprep.subr.bf16.mxu1 %v6379_v45  ;;  %v655_v59 = vld [vmem:[#allocation2 + $0x250] sm:$0xff]  ;;  %v670_v61 = vld [vmem:[#allocation2 + $0x2c8] sm:$0xff] }
  0x38   :  { %8432 = vst [vmem:[#allocation30_spill] sm:$0xff] %v6388_v54  ;;  %8433 = vst [vmem:[#allocation31_spill] sm:$0xff] %v6391_v58  ;;  %v664_v62 = vld [vmem:[#allocation2 + $0x298] sm:$0xff]  ;;  %v6394_v1 = vpack.c.bf16 %v653_v56, %v645_v55  ;;  %v6398_v2 = vpack.c.bf16 %v655_v59, %v647_v57  ;;  %v6400_v3 = vpack.c.bf16 %v670_v61, %v662_v60  ;;  %v661_v5 = vld [vmem:[#allocation2 + $0x280] sm:$0xff] }
  0x39   :  { %v672_v63 = vld [vmem:[#allocation2 + $0x2d8] sm:$0xff]  ;;  %3799 = vmatpush1.bf16.msra.mxu0 %v6382_v52  ;;  %v669_v6 = vld [vmem:[#allocation2 + $0x2c0] sm:$0xff]  ;;  %v663_v7 = vld [vmem:[#allocation2 + $0x290] sm:$0xff] }
  0x3a   :  { %8434 = vst [vmem:[#allocation32_spill] sm:$0xff] %v6394_v1  ;;  %3863 = vmatpush1.bf16.msra.mxu1 %v6386_v53  ;;  %3801 = vmatprep.subr.bf16.mxu0 %v6388_v54  ;;  %8435 = vst [vmem:[#allocation33_spill] sm:$0xff] %v6398_v2  ;;  %v6403_v10 = vpack.c.bf16 %v672_v63, %v664_v62  ;;  %v671_v11 = vld [vmem:[#allocation2 + $0x2d0] sm:$0xff]  ;;  %v678_v12 = vld [vmem:[#allocation2 + $0x308] sm:$0xff]  ;;  %v6406_v19 = vpack.c.bf16 %v669_v6, %v661_v5 }
  0x3b   :  { %8436 = vst [vmem:[#allocation34_spill] sm:$0xff] %v6400_v3  ;;  %3865 = vmatprep.subr.bf16.mxu1 %v6391_v58  ;;  %v686_v14 = vld [vmem:[#allocation2 + $0x348] sm:$0xff]  ;;  %v680_v15 = vld [vmem:[#allocation2 + $0x318] sm:$0xff]  ;;  %v6410_v20 = vpack.c.bf16 %v671_v11, %v663_v7  ;;  %v677_v23 = vld [vmem:[#allocation2 + $0x300] sm:$0xff] }
  0x3c   :  { %8437 = vst [vmem:[#allocation35_spill] sm:$0xff] %v6403_v10  ;;  %v688_v16 = vld [vmem:[#allocation2 + $0x358] sm:$0xff]  ;;  %8438 = vst [vmem:[#allocation36_spill] sm:$0xff] %v6406_v19  ;;  %v6412_v21 = vpack.c.bf16 %v686_v14, %v678_v12  ;;  %v685_v24 = vld [vmem:[#allocation2 + $0x340] sm:$0xff] }
  0x3d   :  { %3803 = vmatpush1.bf16.msra.mxu0 %v6394_v1  ;;  %8439 = vst [vmem:[#allocation37_spill] sm:$0xff] %v6410_v20  ;;  %v679_v25 = vld [vmem:[#allocation2 + $0x310] sm:$0xff]  ;;  %v6415_v29 = vpack.c.bf16 %v688_v16, %v680_v15  ;;  %v694_v31 = vld [vmem:[#allocation2 + $0x388] sm:$0xff]  ;;  %v696_v34 = vld [vmem:[#allocation2 + $0x398] sm:$0xff]  ;;  %v6418_v37 = vpack.c.bf16 %v685_v24, %v677_v23 }
  0x3e   :  { %3867 = vmatpush1.bf16.msra.mxu1 %v6398_v2  ;;  %3805 = vmatprep.subr.bf16.mxu0 %v6400_v3  ;;  %8440 = vst [vmem:[#allocation38_spill] sm:$0xff] %v6412_v21  ;;  %v687_v30 = vld [vmem:[#allocation2 + $0x350] sm:$0xff]  ;;  %v702_v33 = vld [vmem:[#allocation2 + $0x3c8] sm:$0xff]  ;;  %v704_v35 = vld [vmem:[#allocation2 + $0x3d8] sm:$0xff] }
  0x3f   :  { %3869 = vmatprep.subr.bf16.mxu1 %v6403_v10  ;;  %8441 = vst [vmem:[#allocation39_spill] sm:$0xff] %v6415_v29  ;;  %8442 = vst [vmem:[#allocation40_spill] sm:$0xff] %v6418_v37  ;;  %v6422_v38 = vpack.c.bf16 %v687_v30, %v679_v25  ;;  %v6424_v39 = vpack.c.bf16 %v702_v33, %v694_v31  ;;  %v693_v42 = vld [vmem:[#allocation2 + $0x380] sm:$0xff]  ;;  %v695_v44 = vld [vmem:[#allocation2 + $0x390] sm:$0xff]  ;;  %v6427_v46 = vpack.c.bf16 %v704_v35, %v696_v34 }
  0x40   :  { %v701_v43 = vld [vmem:[#allocation2 + $0x3c0] sm:$0xff]  ;;  %v703_v47 = vld [vmem:[#allocation2 + $0x3d0] sm:$0xff]  ;;  %v710_v48 = vld [vmem:[#allocation2 + $0x408] sm:$0xff] }
  0x41   :  { %3807 = vmatpush1.bf16.msra.mxu0 %v6406_v19  ;;  %8443 = vst [vmem:[#allocation41_spill] sm:$0xff] %v6422_v38  ;;  %8444 = vst [vmem:[#allocation42_spill] sm:$0xff] %v6424_v39  ;;  %v718_v49 = vld [vmem:[#allocation2 + $0x448] sm:$0xff]  ;;  %v712_v50 = vld [vmem:[#allocation2 + $0x418] sm:$0xff]  ;;  %v6430_v55 = vpack.c.bf16 %v701_v43, %v693_v42  ;;  %v6434_v56 = vpack.c.bf16 %v703_v47, %v695_v44 }
  0x42   :  { %3871 = vmatpush1.bf16.msra.mxu1 %v6410_v20  ;;  %3809 = vmatprep.subr.bf16.mxu0 %v6412_v21  ;;  %8445 = vst [vmem:[#allocation43_spill] sm:$0xff] %v6427_v46  ;;  %v720_v51 = vld [vmem:[#allocation2 + $0x458] sm:$0xff]  ;;  %v6436_v57 = vpack.c.bf16 %v718_v49, %v710_v48  ;;  %v709_v59 = vld [vmem:[#allocation2 + $0x400] sm:$0xff]  ;;  %v711_v61 = vld [vmem:[#allocation2 + $0x410] sm:$0xff] }
  0x43   :  { %3873 = vmatprep.subr.bf16.mxu1 %v6415_v29  ;;  %8446 = vst [vmem:[#allocation44_spill] sm:$0xff] %v6430_v55  ;;  %8447 = vst [vmem:[#allocation45_spill] sm:$0xff] %v6434_v56  ;;  %v717_v60 = vld [vmem:[#allocation2 + $0x440] sm:$0xff]  ;;  %v6439_v62 = vpack.c.bf16 %v720_v51, %v712_v50  ;;  %v719_v63 = vld [vmem:[#allocation2 + $0x450] sm:$0xff] }
  0x44   :  { %8448 = vst [vmem:[#allocation46_spill] sm:$0xff] %v6436_v57  ;;  %v726_v5 = vld [vmem:[#allocation2 + $0x488] sm:$0xff]  ;;  %v728_v7 = vld [vmem:[#allocation2 + $0x498] sm:$0xff]  ;;  %v6442_v12 = vpack.c.bf16 %v717_v60, %v709_v59  ;;  %v6446_v14 = vpack.c.bf16 %v719_v63, %v711_v61  ;;  %v725_v16 = vld [vmem:[#allocation2 + $0x480] sm:$0xff] }
  0x45   :  { %3811 = vmatpush1.bf16.msra.mxu0 %v6418_v37  ;;  %8449 = vst [vmem:[#allocation47_spill] sm:$0xff] %v6439_v62  ;;  %v734_v6 = vld [vmem:[#allocation2 + $0x4c8] sm:$0xff]  ;;  %v736_v11 = vld [vmem:[#allocation2 + $0x4d8] sm:$0xff]  ;;  %v733_v23 = vld [vmem:[#allocation2 + $0x4c0] sm:$0xff] }
  0x46   :  { %3875 = vmatpush1.bf16.msra.mxu1 %v6422_v38  ;;  %3813 = vmatprep.subr.bf16.mxu0 %v6424_v39  ;;  %8450 = vst [vmem:[#allocation48_spill] sm:$0xff] %v6442_v12  ;;  %8451 = vst [vmem:[#allocation49_spill] sm:$0xff] %v6446_v14  ;;  %v6448_v15 = vpack.c.bf16 %v734_v6, %v726_v5  ;;  %v727_v24 = vld [vmem:[#allocation2 + $0x490] sm:$0xff]  ;;  %v6451_v25 = vpack.c.bf16 %v736_v11, %v728_v7  ;;  %v742_v31 = vld [vmem:[#allocation2 + $0x508] sm:$0xff] }
  0x47   :  { %3877 = vmatprep.subr.bf16.mxu1 %v6427_v46  ;;  %v735_v30 = vld [vmem:[#allocation2 + $0x4d0] sm:$0xff]  ;;  %v750_v33 = vld [vmem:[#allocation2 + $0x548] sm:$0xff]  ;;  %v744_v34 = vld [vmem:[#allocation2 + $0x518] sm:$0xff]  ;;  %v6454_v42 = vpack.c.bf16 %v733_v23, %v725_v16 }
  0x48   :  { %8452 = vst [vmem:[#allocation50_spill] sm:$0xff] %v6448_v15  ;;  %8453 = vst [vmem:[#allocation51_spill] sm:$0xff] %v6451_v25  ;;  %v752_v35 = vld [vmem:[#allocation2 + $0x558] sm:$0xff]  ;;  %v6458_v43 = vpack.c.bf16 %v735_v30, %v727_v24  ;;  %v6460_v44 = vpack.c.bf16 %v750_v33, %v742_v31  ;;  %v741_v47 = vld [vmem:[#allocation2 + $0x500] sm:$0xff] }
  0x49   :  { %3815 = vmatpush1.bf16.msra.mxu0 %v6430_v55  ;;  %8454 = vst [vmem:[#allocation52_spill] sm:$0xff] %v6454_v42  ;;  %v749_v48 = vld [vmem:[#allocation2 + $0x540] sm:$0xff]  ;;  %v743_v49 = vld [vmem:[#allocation2 + $0x510] sm:$0xff]  ;;  %v6463_v50 = vpack.c.bf16 %v752_v35, %v744_v34  ;;  %v758_v59 = vld [vmem:[#allocation2 + $0x588] sm:$0xff] }
  0x4a   :  { %3879 = vmatpush1.bf16.msra.mxu1 %v6434_v56  ;;  %3817 = vmatprep.subr.bf16.mxu0 %v6436_v57  ;;  %8455 = vst [vmem:[#allocation53_spill] sm:$0xff] %v6458_v43  ;;  %8456 = vst [vmem:[#allocation54_spill] sm:$0xff] %v6460_v44  ;;  %v751_v51 = vld [vmem:[#allocation2 + $0x550] sm:$0xff]  ;;  %v766_v60 = vld [vmem:[#allocation2 + $0x5c8] sm:$0xff]  ;;  %v6466_v5 = vpack.c.bf16 %v749_v48, %v741_v47 }
  0x4b   :  { %3881 = vmatprep.subr.bf16.mxu1 %v6439_v62  ;;  %8457 = vst [vmem:[#allocation55_spill] sm:$0xff] %v6463_v50  ;;  %v760_v61 = vld [vmem:[#allocation2 + $0x598] sm:$0xff]  ;;  %v6470_v6 = vpack.c.bf16 %v751_v51, %v743_v49  ;;  %v6472_v7 = vpack.c.bf16 %v766_v60, %v758_v59  ;;  %v757_v11 = vld [vmem:[#allocation2 + $0x580] sm:$0xff]  ;;  %v759_v23 = vld [vmem:[#allocation2 + $0x590] sm:$0xff] }
  0x4c   :  { %v768_v63 = vld [vmem:[#allocation2 + $0x5d8] sm:$0xff]  ;;  %8458 = vst [vmem:[#allocation56_spill] sm:$0xff] %v6466_v5  ;;  %v765_v16 = vld [vmem:[#allocation2 + $0x5c0] sm:$0xff]  ;;  %v767_v30 = vld [vmem:[#allocation2 + $0x5d0] sm:$0xff] }
  0x4d   :  { %3819 = vmatpush1.bf16.msra.mxu0 %v6442_v12  ;;  %8459 = vst [vmem:[#allocation57_spill] sm:$0xff] %v6470_v6  ;;  %8460 = vst [vmem:[#allocation58_spill] sm:$0xff] %v6472_v7  ;;  %v6475_v24 = vpack.c.bf16 %v768_v63, %v760_v61  ;;  %v774_v31 = vld [vmem:[#allocation2 + $0x608] sm:$0xff]  ;;  %v776_v34 = vld [vmem:[#allocation2 + $0x618] sm:$0xff]  ;;  %v6478_v47 = vpack.c.bf16 %v765_v16, %v757_v11  ;;  %v6482_v48 = vpack.c.bf16 %v767_v30, %v759_v23 }
  0x4e   :  { %3883 = vmatpush1.bf16.msra.mxu1 %v6446_v14  ;;  %3821 = vmatprep.subr.bf16.mxu0 %v6448_v15  ;;  %v782_v33 = vld [vmem:[#allocation2 + $0x648] sm:$0xff]  ;;  %v784_v35 = vld [vmem:[#allocation2 + $0x658] sm:$0xff]  ;;  %v773_v51 = vld [vmem:[#allocation2 + $0x600] sm:$0xff] }
  0x4f   :  { %3885 = vmatprep.subr.bf16.mxu1 %v6451_v25  ;;  %8461 = vst [vmem:[#allocation59_spill] sm:$0xff] %v6475_v24  ;;  %8462 = vst [vmem:[#allocation60_spill] sm:$0xff] %v6478_v47  ;;  %v6484_v49 = vpack.c.bf16 %v782_v33, %v774_v31  ;;  %v781_v59 = vld [vmem:[#allocation2 + $0x640] sm:$0xff]  ;;  %v775_v60 = vld [vmem:[#allocation2 + $0x610] sm:$0xff]  ;;  %v6487_v61 = vpack.c.bf16 %v784_v35, %v776_v34 }
  0x50   :  { %8463 = vst [vmem:[#allocation61_spill] sm:$0xff] %v6482_v48  ;;  %v783_v63 = vld [vmem:[#allocation2 + $0x650] sm:$0xff]  ;;  %v790_v26 = vld [vmem:[#allocation2 + $0x688] sm:$0xff]  ;;  %v792_v11 = vld [vmem:[#allocation2 + $0x698] sm:$0xff] }
  0x51   :  { %3823 = vmatpush1.bf16.msra.mxu0 %v6454_v42  ;;  %8464 = vst [vmem:[#allocation62_spill] sm:$0xff] %v6484_v49  ;;  %8465 = vst [vmem:[#allocation63_spill] sm:$0xff] %v6487_v61  ;;  %v798_v0 = vld [vmem:[#allocation2 + $0x6c8] sm:$0xff]  ;;  %v800_v16 = vld [vmem:[#allocation2 + $0x6d8] sm:$0xff]  ;;  %v6494_v23 = vpack.c.bf16 %v783_v63, %v775_v60 }
  0x52   :  { %3887 = vmatpush1.bf16.msra.mxu1 %v6458_v43  ;;  %3825 = vmatprep.subr.bf16.mxu0 %v6460_v44  ;;  %v6496_v30 = vpack.c.bf16 %v798_v0, %v790_v26  ;;  %v789_v31 = vld [vmem:[#allocation2 + $0x680] sm:$0xff]  ;;  %v791_v34 = vld [vmem:[#allocation2 + $0x690] sm:$0xff]  ;;  %v6499_v35 = vpack.c.bf16 %v800_v16, %v792_v11  ;;  %v714_v44 = vld [vmem:[#allocation2 + $0x428] sm:$0xff] }
  0x53   :  { %3889 = vmatprep.subr.bf16.mxu1 %v6463_v50  ;;  %8467 = vst [vmem:[#allocation65_spill] sm:$0xff] %v6494_v23  ;;  %v797_v33 = vld [vmem:[#allocation2 + $0x6c0] sm:$0xff]  ;;  %v807_v11 = vld [vmem:[#allocation2 + $0x710] sm:$0xff] }
  0x54   :  { %8468 = vst [vmem:[#allocation66_spill] sm:$0xff] %v6496_v30  ;;  %8469 = vst [vmem:[#allocation67_spill] sm:$0xff] %v6499_v35  ;;  %v805_v60 = vld [vmem:[#allocation2 + $0x700] sm:$0xff]  ;;  %v707_v50 = vld [vmem:[#allocation2 + $0x3f0] sm:$0xff] }
  0x55   :  { %3827 = vmatpush1.bf16.msra.mxu0 %v6466_v5  ;;  %v813_v63 = vld [vmem:[#allocation2 + $0x740] sm:$0xff]  ;;  %v634_v5 = vld [vmem:[#allocation2 + $0x1a8] sm:$0xff] }
  0x56   :  { %3891 = vmatpush1.bf16.msra.mxu1 %v6470_v6  ;;  %3829 = vmatprep.subr.bf16.mxu0 %v6472_v7  ;;  %v6490_v6 = vpack.c.bf16 %v781_v59, %v773_v51  ;;  %v806_v7 = vld [vmem:[#allocation2 + $0x708] sm:$0xff]  ;;  %v808_v51 = vld [vmem:[#allocation2 + $0x718] sm:$0xff] }
  0x57   :  { %3893 = vmatprep.subr.bf16.mxu1 %v6475_v24  ;;  %v799_v24 = vld [vmem:[#allocation2 + $0x6d0] sm:$0xff]  ;;  %v816_v59 = vld [vmem:[#allocation2 + $0x758] sm:$0xff] }
  0x58   :  { %8466 = vst [vmem:[#allocation64_spill] sm:$0xff] %v6490_v6  ;;  %v6506_v0 = vpack.c.bf16 %v799_v24, %v791_v34  ;;  %v6511_v16 = vpack.c.bf16 %v816_v59, %v808_v51  ;;  %v829_v34 = vld [vmem:[#allocation2 + $0x7c0] sm:$0xff]  ;;  %v823_v51 = vld [vmem:[#allocation2 + $0x790] sm:$0xff] }
  0x59   :  { %3831 = vmatpush1.bf16.msra.mxu0 %v6478_v47  ;;  %v814_v47 = vld [vmem:[#allocation2 + $0x748] sm:$0xff] }
  0x5a   :  { %3895 = vmatpush1.bf16.msra.mxu1 %v6482_v48  ;;  %3833 = vmatprep.subr.bf16.mxu0 %v6484_v49  ;;  %v6502_v48 = vpack.c.bf16 %v797_v33, %v789_v31  ;;  %8471 = vst [vmem:[#allocation69_spill] sm:$0xff] %v6506_v0  ;;  %v6508_v26 = vpack.c.bf16 %v814_v47, %v806_v7  ;;  %8473 = vst [vmem:[#allocation71_spill] sm:$0xff] %v6511_v16  ;;  %v822_v49 = vld [vmem:[#allocation2 + $0x788] sm:$0xff]  ;;  %v824_v31 = vld [vmem:[#allocation2 + $0x798] sm:$0xff] }
  0x5b   :  { %3897 = vmatprep.subr.bf16.mxu1 %v6487_v61  ;;  %v815_v61 = vld [vmem:[#allocation2 + $0x750] sm:$0xff]  ;;  %v832_v33 = vld [vmem:[#allocation2 + $0x7d8] sm:$0xff]  ;;  %v821_v47 = vld [vmem:[#allocation2 + $0x780] sm:$0xff] }
  0x5c   :  { %8470 = vst [vmem:[#allocation68_spill] sm:$0xff] %v6502_v48  ;;  %8472 = vst [vmem:[#allocation70_spill] sm:$0xff] %v6508_v26  ;;  %v6518_v7 = vpack.c.bf16 %v815_v61, %v807_v11  ;;  %v6523_v59 = vpack.c.bf16 %v832_v33, %v824_v31  ;;  %v585_v61 = vld [vmem:[#allocation2 + $0x20] sm:$0xff]  ;;  %v587_v31 = vld [vmem:[#allocation2 + $0x30] sm:$0xff] }
  0x5d   :  { %3835 = vmatpush1.bf16.msra.mxu0 %v6490_v6  ;;  %v830_v6 = vld [vmem:[#allocation2 + $0x7c8] sm:$0xff]  ;;  %v593_v11 = vld [vmem:[#allocation2 + $0x60] sm:$0xff] }
  0x5e   :  { %3899 = vmatpush1.bf16.msra.mxu1 %v6494_v23  ;;  %3837 = vmatprep.subr.bf16.mxu0 %v6496_v30  ;;  %v6514_v23 = vpack.c.bf16 %v813_v63, %v805_v60  ;;  %8475 = vst [vmem:[#allocation73_spill] sm:$0xff] %v6518_v7  ;;  %v6520_v24 = vpack.c.bf16 %v830_v6, %v822_v49  ;;  %8477 = vst [vmem:[#allocation75_spill] sm:$0xff] %v6523_v59  ;;  %v586_v30 = vld [vmem:[#allocation2 + $0x28] sm:$0xff]  ;;  %v588_v60 = vld [vmem:[#allocation2 + $0x38] sm:$0xff] }
  0x5f   :  { %3901 = vmatprep.subr.bf16.mxu1 %v6499_v35  ;;  %v831_v35 = vld [vmem:[#allocation2 + $0x7d0] sm:$0xff]  ;;  %v596_v63 = vld [vmem:[#allocation2 + $0x78] sm:$0xff] }
  0x60   :  { %8474 = vst [vmem:[#allocation72_spill] sm:$0xff] %v6514_v23  ;;  %8476 = vst [vmem:[#allocation74_spill] sm:$0xff] %v6520_v24  ;;  %v6530_v6 = vpack.c.bf16 %v831_v35, %v823_v51  ;;  %v6535_v33 = vpack.c.bf16 %v596_v63, %v588_v60  ;;  %v601_v35 = vld [vmem:[#allocation2 + $0xa0] sm:$0xff]  ;;  %v603_v60 = vld [vmem:[#allocation2 + $0xb0] sm:$0xff] }
  0x61   :  { %3839 = vmatpush1.bf16.msra.mxu0 %v6502_v48  ;;  %v594_v48 = vld [vmem:[#allocation2 + $0x68] sm:$0xff]  ;;  %v609_v51 = vld [vmem:[#allocation2 + $0xe0] sm:$0xff] }
  0x62   :  { %3903 = vmatpush1.bf16.msra.mxu1 %v6506_v0  ;;  %3841 = vmatprep.subr.bf16.mxu0 %v6508_v26  ;;  %v6526_v0 = vpack.c.bf16 %v829_v34, %v821_v47  ;;  %8479 = vst [vmem:[#allocation77_spill] sm:$0xff] %v6530_v6  ;;  %v6532_v49 = vpack.c.bf16 %v594_v48, %v586_v30  ;;  %8481 = vst [vmem:[#allocation79_spill] sm:$0xff] %v6535_v33  ;;  %v602_v26 = vld [vmem:[#allocation2 + $0xa8] sm:$0xff]  ;;  %v604_v47 = vld [vmem:[#allocation2 + $0xb8] sm:$0xff] }
  0x63   :  { %3905 = vmatprep.subr.bf16.mxu1 %v6511_v16  ;;  %v595_v16 = vld [vmem:[#allocation2 + $0x70] sm:$0xff]  ;;  %v612_v34 = vld [vmem:[#allocation2 + $0xf8] sm:$0xff] }
  0x64   :  { %8478 = vst [vmem:[#allocation76_spill] sm:$0xff] %v6526_v0  ;;  %8480 = vst [vmem:[#allocation78_spill] sm:$0xff] %v6532_v49  ;;  %v6542_v48 = vpack.c.bf16 %v595_v16, %v587_v31  ;;  %v6547_v63 = vpack.c.bf16 %v612_v34, %v604_v47  ;;  %v617_v31 = vld [vmem:[#allocation2 + $0x120] sm:$0xff]  ;;  %v619_v34 = vld [vmem:[#allocation2 + $0x130] sm:$0xff] }
  0x65   :  { %3843 = vmatpush1.bf16.msra.mxu0 %v6514_v23  ;;  %v610_v23 = vld [vmem:[#allocation2 + $0xe8] sm:$0xff]  ;;  %v625_v47 = vld [vmem:[#allocation2 + $0x160] sm:$0xff] }
  0x66   :  { %3907 = vmatpush1.bf16.msra.mxu1 %v6518_v7  ;;  %3845 = vmatprep.subr.bf16.mxu0 %v6520_v24  ;;  %v6538_v7 = vpack.c.bf16 %v593_v11, %v585_v61  ;;  %8483 = vst [vmem:[#allocation81_spill] sm:$0xff] %v6542_v48  ;;  %v6544_v30 = vpack.c.bf16 %v610_v23, %v602_v26  ;;  %8485 = vst [vmem:[#allocation83_spill] sm:$0xff] %v6547_v63  ;;  %v618_v24 = vld [vmem:[#allocation2 + $0x128] sm:$0xff]  ;;  %v8486_v61 = vmov 0.0   ;;  %v620_v11 = vld [vmem:[#allocation2 + $0x138] sm:$0xff] }
  0x67   :  { %3909 = vmatprep.subr.bf16.mxu1 %v6523_v59  ;;  %v611_v59 = vld [vmem:[#allocation2 + $0xf0] sm:$0xff]  ;;  %v6552_v23 = vpack.c.bf16 %v609_v51, %v601_v35  ;;  %v636_v35 = vld [vmem:[#allocation2 + $0x1b8] sm:$0xff] }
  0x68   :  { %8482 = vst [vmem:[#allocation80_spill] sm:$0xff] %v6538_v7  ;;  %8484 = vst [vmem:[#allocation82_spill] sm:$0xff] %v6544_v30  ;;  %v6556_v26 = vpack.c.bf16 %v611_v59, %v603_v60  ;;  %v644_v51 = vld [vmem:[#allocation2 + $0x1f8] sm:$0xff]  ;;  %v641_v60 = vld [vmem:[#allocation2 + $0x1e0] sm:$0xff] }
  0x69   :  { %3847 = vmatpush1.bf16.msra.mxu0 %v6526_v0  ;;  %v626_v0 = vld [vmem:[#allocation2 + $0x168] sm:$0xff]  ;;  %8487 = vst [vmem:[#allocation84_spill] sm:$0xff] %v6552_v23 }
  0x6a   :  { %3911 = vmatpush1.bf16.msra.mxu1 %v6530_v6  ;;  %3913 = vmatprep.subr.bf16.mxu0 %v6532_v49  ;;  %v628_v6 = vld [vmem:[#allocation2 + $0x178] sm:$0xff]  ;;  %8488 = vst [vmem:[#allocation85_spill] sm:$0xff] %v6556_v26  ;;  %v6558_v16 = vpack.c.bf16 %v626_v0, %v618_v24  ;;  %v627_v49 = vld [vmem:[#allocation2 + $0x170] sm:$0xff]  ;;  %v6566_v0 = vpack.c.bf16 %v625_v47, %v617_v31 }
  0x6b   :  { %3977 = vmatprep.subr.bf16.mxu1 %v6535_v33  ;;  %v6561_v33 = vpack.c.bf16 %v628_v6, %v620_v11  ;;  %v6570_v24 = vpack.c.bf16 %v627_v49, %v619_v34  ;;  %v633_v6 = vld [vmem:[#allocation2 + $0x1a0] sm:$0xff]  ;;  %v635_v11 = vld [vmem:[#allocation2 + $0x1b0] sm:$0xff]  ;;  %v652_v31 = vld [vmem:[#allocation2 + $0x238] sm:$0xff] }
  0x6c   :  { %902 = vmatmul.mubr.f32.vlgmr.msra.gmra.mrb[0].mxu0 %v8486_v61  ;;  %8489 = vst [vmem:[#allocation86_spill] sm:$0xff] %v6558_v16  ;;  %8491 = vst [vmem:[#allocation88_spill] sm:$0xff] %v6566_v0  ;;  %v660_v47 = vld [vmem:[#allocation2 + $0x278] sm:$0xff]  ;;  %v649_v49 = vld [vmem:[#allocation2 + $0x220] sm:$0xff] }
  0x6d   :  { %973 = vmatmul.mubr.f32.vlgmr.msra.gmra.mrb[0].mxu1 %v8486_v61  ;;  %3915 = vmatpush1.bf16.msra.mxu0 %v6538_v7  ;;  %8490 = vst [vmem:[#allocation87_spill] sm:$0xff] %v6561_v33  ;;  %v642_v7 = vld [vmem:[#allocation2 + $0x1e8] sm:$0xff]  ;;  %8492 = vst [vmem:[#allocation89_spill] sm:$0xff] %v6570_v24  ;;  %v657_v34 = vld [vmem:[#allocation2 + $0x260] sm:$0xff] }
  0x6e   :  { %3979 = vmatpush1.bf16.msra.mxu1 %v6542_v48  ;;  %3917 = vmatprep.subr.bf16.mxu0 %v6544_v30  ;;  %v6572_v59 = vpack.c.bf16 %v642_v7, %v634_v5  ;;  %v643_v30 = vld [vmem:[#allocation2 + $0x1f0] sm:$0xff]  ;;  %v650_v48 = vld [vmem:[#allocation2 + $0x228] sm:$0xff] }
  0x6f   :  { %3981 = vmatprep.subr.bf16.mxu1 %v6547_v63  ;;  %1043 = vmatprep.mubr.f32.mxu0 %v8486_v61  ;;  %v6575_v63 = vpack.c.bf16 %v644_v51, %v636_v35  ;;  %v6582_v5 = vpack.c.bf16 %v643_v30, %v635_v11  ;;  %v651_v35 = vld [vmem:[#allocation2 + $0x230] sm:$0xff]  ;;  %v6587_v51 = vpack.c.bf16 %v660_v47, %v652_v31  ;;  %v673_v11 = vld [vmem:[#allocation2 + $0x2e0] sm:$0xff] }
  0x70   :  { %1114 = vmatprep.mubr.f32.mxu1 %v8486_v61  ;;  %8493 = vst [vmem:[#allocation90_spill] sm:$0xff] %v6572_v59  ;;  %v667_v31 = vld [vmem:[#allocation2 + $0x2b0] sm:$0xff] }
  0x71   :  { %3919 = vmatpush1.bf16.msra.mxu0 %v6552_v23  ;;  %8494 = vst [vmem:[#allocation91_spill] sm:$0xff] %v6575_v63  ;;  %v658_v23 = vld [vmem:[#allocation2 + $0x268] sm:$0xff]  ;;  %8496 = vst [vmem:[#allocation93_spill] sm:$0xff] %v6582_v5 }
  0x72   :  { %3983 = vmatpush1.bf16.msra.mxu1 %v6556_v26  ;;  %3921 = vmatprep.subr.bf16.mxu0 %v6558_v16  ;;  %v6578_v26 = vpack.c.bf16 %v641_v60, %v633_v6  ;;  %v6584_v7 = vpack.c.bf16 %v658_v23, %v650_v48  ;;  %8498 = vst [vmem:[#allocation95_spill] sm:$0xff] %v6587_v51  ;;  %v666_v16 = vld [vmem:[#allocation2 + $0x2a8] sm:$0xff]  ;;  %v668_v6 = vld [vmem:[#allocation2 + $0x2b8] sm:$0xff]  ;;  %v665_v23 = vld [vmem:[#allocation2 + $0x2a0] sm:$0xff] }
  0x73   :  { %3985 = vmatprep.subr.bf16.mxu1 %v6561_v33  ;;  %v659_v33 = vld [vmem:[#allocation2 + $0x270] sm:$0xff]  ;;  %v676_v60 = vld [vmem:[#allocation2 + $0x2f8] sm:$0xff] }
  0x74   :  { %8495 = vst [vmem:[#allocation92_spill] sm:$0xff] %v6578_v26  ;;  %8497 = vst [vmem:[#allocation94_spill] sm:$0xff] %v6584_v7  ;;  %v6594_v48 = vpack.c.bf16 %v659_v33, %v651_v35  ;;  %v6599_v47 = vpack.c.bf16 %v676_v60, %v668_v6  ;;  %v681_v33 = vld [vmem:[#allocation2 + $0x320] sm:$0xff]  ;;  %v683_v6 = vld [vmem:[#allocation2 + $0x330] sm:$0xff] }
  0x75   :  { %3923 = vmatpush1.bf16.msra.mxu0 %v6566_v0  ;;  %v674_v0 = vld [vmem:[#allocation2 + $0x2e8] sm:$0xff]  ;;  %v689_v35 = vld [vmem:[#allocation2 + $0x360] sm:$0xff] }
  0x76   :  { %3987 = vmatpush1.bf16.msra.mxu1 %v6570_v24  ;;  %3925 = vmatprep.subr.bf16.mxu0 %v6572_v59  ;;  %v6590_v24 = vpack.c.bf16 %v657_v34, %v649_v49  ;;  %8500 = vst [vmem:[#allocation97_spill] sm:$0xff] %v6594_v48  ;;  %v6596_v30 = vpack.c.bf16 %v674_v0, %v666_v16  ;;  %8502 = vst [vmem:[#allocation99_spill] sm:$0xff] %v6599_v47  ;;  %v682_v59 = vld [vmem:[#allocation2 + $0x328] sm:$0xff]  ;;  %v684_v49 = vld [vmem:[#allocation2 + $0x338] sm:$0xff] }
  0x77   :  { %3989 = vmatprep.subr.bf16.mxu1 %v6575_v63  ;;  %v675_v63 = vld [vmem:[#allocation2 + $0x2f0] sm:$0xff]  ;;  %v692_v34 = vld [vmem:[#allocation2 + $0x378] sm:$0xff]  ;;  %v55_v60 = vld [vmem:[%s8116_s0] sm:$0x3] }
  0x78   :  { %8499 = vst [vmem:[#allocation96_spill] sm:$0xff] %v6590_v24  ;;  %8501 = vst [vmem:[#allocation98_spill] sm:$0xff] %v6596_v30  ;;  %v6606_v16 = vpack.c.bf16 %v675_v63, %v667_v31  ;;  %67 = vperm.xlu0 %5907, %v55_v60   ;;  %v700_v63 = vld [vmem:[#allocation2 + $0x3b8] sm:$0xff] }
  0x79   :  { %3927 = vmatpush1.bf16.msra.mxu0 %v6578_v26  ;;  %v690_v26 = vld [vmem:[#allocation2 + $0x368] sm:$0xff] }
  0x7a   :  { %3991 = vmatpush1.bf16.msra.mxu1 %v6582_v5  ;;  %3929 = vmatprep.subr.bf16.mxu0 %v6584_v7  ;;  %v6602_v5 = vpack.c.bf16 %v673_v11, %v665_v23  ;;  %8504 = vst [vmem:[#allocation101_spill] sm:$0xff] %v6606_v16  ;;  %v6608_v0 = vpack.c.bf16 %v690_v26, %v682_v59  ;;  %v56_v23 = vld [vmem:[%s8116_s0 + $0x2] sm:$0x3]  ;;  %v708_v26 = vld [vmem:[#allocation2 + $0x3f8] sm:$0xff] }
  0x7b   :  { %3993 = vmatprep.subr.bf16.mxu1 %v6587_v51  ;;  %v6617_v11 = vpack.c.bf16 %v692_v34, %v684_v49  ;;  %72 = vperm.xlu1 %5909, %v56_v23   ;;  %v6620_v59 = vpack.c.bf16 %v689_v35, %v681_v33  ;;  %v697_v49 = vld [vmem:[#allocation2 + $0x3a0] sm:$0xff]  ;;  %v699_v51 = vld [vmem:[#allocation2 + $0x3b0] sm:$0xff]  ;;  %v6629_v7 = vpack.c.bf16 %v708_v26, %v700_v63  ;;  %v6272_v33 = vmov 1   ;;  %v716_v35 = vld [vmem:[#allocation2 + $0x438] sm:$0xff] }
  0x7c   :  { %8503 = vst [vmem:[#allocation100_spill] sm:$0xff] %v6602_v5  ;;  %8505 = vst [vmem:[#allocation102_spill] sm:$0xff] %v6608_v0  ;;  %v705_v34 = vld [vmem:[#allocation2 + $0x3e0] sm:$0xff]  ;;  %5908 = vset.pattern.permute.xlu0 %v6272_v33  ;;  %v715_v26 = vld [vmem:[#allocation2 + $0x430] sm:$0xff] }
  0x7d   :  { %3931 = vmatpush1.bf16.msra.mxu0 %v6590_v24  ;;  %8506 = vst [vmem:[#allocation103_spill] sm:$0xff] %v6617_v11  ;;  %v698_v24 = vld [vmem:[#allocation2 + $0x3a8] sm:$0xff]  ;;  %8507 = vst [vmem:[#allocation104_spill] sm:$0xff] %v6620_v59  ;;  %244 = vperm.xlu0 %5908, %v55_v60   ;;  %v713_v63 = vld [vmem:[#allocation2 + $0x420] sm:$0xff] }
  0x7e   :  { %3995 = vmatpush1.bf16.msra.mxu1 %v6594_v48  ;;  %3933 = vmatprep.subr.bf16.mxu0 %v6596_v30  ;;  %v691_v48 = vld [vmem:[#allocation2 + $0x370] sm:$0xff]  ;;  %v706_v30 = vld [vmem:[#allocation2 + $0x3e8] sm:$0xff]  ;;  %8510 = vst [vmem:[#allocation107_spill] sm:$0xff] %v6629_v7  ;;  %v721_v60 = vld [vmem:[#allocation2 + $0x460] sm:$0xff] }
  0x7f   :  { %3997 = vmatprep.subr.bf16.mxu1 %v6599_v47  ;;  %v6624_v31 = vpack.c.bf16 %v691_v48, %v683_v6  ;;  %v6626_v47 = vpack.c.bf16 %v706_v30, %v698_v24  ;;  %5910 = vset.pattern.permute.xlu1 %v6272_v33  ;;  %v6632_v24 = vpack.c.bf16 %v705_v34, %v697_v49  ;;  %v57_v48 = vld [vmem:[%s8116_s0 + $0x4] sm:$0x3] }
  0x80   :  { %248 = vperm.xlu1 %5910, %v56_v23   ;;  %v6639_v30 = vpack.c.bf16 %v707_v50, %v699_v51  ;;  %v723_v23 = vld [vmem:[#allocation2 + $0x470] sm:$0xff]  ;;  %v730_v34 = vld [vmem:[#allocation2 + $0x4a8] sm:$0xff]  ;;  %v8516_v50 = vmov 0  }
  0x81   :  { %3935 = vmatpush1.bf16.msra.mxu0 %v6602_v5  ;;  %8508 = vst [vmem:[#allocation105_spill] sm:$0xff] %v6624_v31  ;;  %8509 = vst [vmem:[#allocation106_spill] sm:$0xff] %v6626_v47  ;;  %v722_v5 = vld [vmem:[#allocation2 + $0x468] sm:$0xff]  ;;  %252 = vperm.xlu0 %5908, %v57_v48  }
  0x82   :  { %3999 = vmatpush1.bf16.msra.mxu1 %v6606_v16  ;;  %3937 = vmatprep.subr.bf16.mxu0 %v6608_v0  ;;  %v724_v16 = vld [vmem:[#allocation2 + $0x478] sm:$0xff]  ;;  %8511 = vst [vmem:[#allocation108_spill] sm:$0xff] %v6632_v24  ;;  %8512 = vst [vmem:[#allocation109_spill] sm:$0xff] %v6639_v30  ;;  %v6641_v6 = vpack.c.bf16 %v722_v5, %v714_v44  ;;  %v738_v33 = vld [vmem:[#allocation2 + $0x4e8] sm:$0xff]  ;;  %v6655_v5 = vpack.c.bf16 %v723_v23, %v715_v26 }
  0x83   :  { %4001 = vmatprep.subr.bf16.mxu1 %v6617_v11  ;;  %v6644_v49 = vpack.c.bf16 %v724_v16, %v716_v35  ;;  %v740_v11 = vld [vmem:[#allocation2 + $0x4f8] sm:$0xff]  ;;  %v58_v44 = vld [vmem:[%s8116_s0 + $0x6] sm:$0x3]  ;;  %v6657_v51 = vpack.c.bf16 %v738_v33, %v730_v34  ;;  %v729_v16 = vld [vmem:[#allocation2 + $0x4a0] sm:$0xff] }
  0x84   :  { %8513 = vst [vmem:[#allocation110_spill] sm:$0xff] %v6641_v6  ;;  %5911 = vset.pattern.permute.xlu1 %v8516_v50  ;;  %8517 = vst [vmem:[#allocation113_spill] sm:$0xff] %v6655_v5  ;;  %v737_v35 = vld [vmem:[#allocation2 + $0x4e0] sm:$0xff]  ;;  %v746_v50 = vld [vmem:[#allocation2 + $0x528] sm:$0xff] }
  0x85   :  { %3939 = vmatpush1.bf16.msra.mxu0 %v6620_v59  ;;  %8514 = vst [vmem:[#allocation111_spill] sm:$0xff] %v6644_v49  ;;  %v732_v59 = vld [vmem:[#allocation2 + $0x4b8] sm:$0xff]  ;;  %8518 = vst [vmem:[#allocation114_spill] sm:$0xff] %v6657_v51  ;;  %77 = vperm.xlu1 %5911, %v57_v48   ;;  %v6663_v26 = vpack.c.bf16 %v737_v35, %v729_v16  ;;  %v59_v23 = vld [vmem:[%s8116_s0 + $0x8] sm:$0x3] }
  0x86   :  { %4003 = vmatpush1.bf16.msra.mxu1 %v6624_v31  ;;  %3941 = vmatprep.subr.bf16.mxu0 %v6626_v47  ;;  %v6647_v47 = vpack.c.bf16 %v721_v60, %v713_v63  ;;  %v6660_v63 = vpack.c.bf16 %v740_v11, %v732_v59  ;;  %v739_v60 = vld [vmem:[#allocation2 + $0x4f0] sm:$0xff]  ;;  %v748_v31 = vld [vmem:[#allocation2 + $0x538] sm:$0xff]  ;;  %v745_v48 = vld [vmem:[#allocation2 + $0x520] sm:$0xff] }
  0x87   :  { %4005 = vmatprep.subr.bf16.mxu1 %v6629_v7  ;;  %v731_v7 = vld [vmem:[#allocation2 + $0x4b0] sm:$0xff]  ;;  %v756_v0 = vld [vmem:[#allocation2 + $0x578] sm:$0xff]  ;;  %256 = vperm.xlu0 %5908, %v58_v44   ;;  %8520 = vst [vmem:[#allocation116_spill] sm:$0xff] %v6663_v26  ;;  %v753_v34 = vld [vmem:[#allocation2 + $0x560] sm:$0xff] }
  0x88   :  { %8515 = vst [vmem:[#allocation112_spill] sm:$0xff] %v6647_v47  ;;  %8519 = vst [vmem:[#allocation115_spill] sm:$0xff] %v6660_v63  ;;  %v6670_v11 = vpack.c.bf16 %v739_v60, %v731_v7  ;;  %v747_v33 = vld [vmem:[#allocation2 + $0x530] sm:$0xff]  ;;  %v762_v35 = vld [vmem:[#allocation2 + $0x5a8] sm:$0xff]  ;;  %v6678_v7 = vpack.c.bf16 %v753_v34, %v745_v48 }
  0x89   :  { %3943 = vmatpush1.bf16.msra.mxu0 %v6632_v24  ;;  %v754_v24 = vld [vmem:[#allocation2 + $0x568] sm:$0xff]  ;;  %v755_v16 = vld [vmem:[#allocation2 + $0x570] sm:$0xff]  ;;  %82 = vperm.xlu1 %5911, %v58_v44   ;;  %v761_v44 = vld [vmem:[#allocation2 + $0x5a0] sm:$0xff] }
  0x8a   :  { %4007 = vmatpush1.bf16.msra.mxu1 %v6639_v30  ;;  %3945 = vmatprep.subr.bf16.mxu0 %v6641_v6  ;;  %8521 = vst [vmem:[#allocation117_spill] sm:$0xff] %v6670_v11  ;;  %v6672_v59 = vpack.c.bf16 %v754_v24, %v746_v50  ;;  %v764_v6 = vld [vmem:[#allocation2 + $0x5b8] sm:$0xff]  ;;  %8524 = vst [vmem:[#allocation120_spill] sm:$0xff] %v6678_v7  ;;  %v60_v24 = vld [vmem:[%s8116_s0 + $0xa] sm:$0x3] }
  0x8b   :  { %4009 = vmatprep.subr.bf16.mxu1 %v6644_v49  ;;  %v770_v49 = vld [vmem:[#allocation2 + $0x5e8] sm:$0xff]  ;;  %v772_v30 = vld [vmem:[#allocation2 + $0x5f8] sm:$0xff]  ;;  %260 = vperm.xlu0 %5908, %v59_v23   ;;  %v769_v60 = vld [vmem:[#allocation2 + $0x5e0] sm:$0xff] }
  0x8c   :  { %8522 = vst [vmem:[#allocation118_spill] sm:$0xff] %v6672_v59  ;;  %v763_v50 = vld [vmem:[#allocation2 + $0x5b0] sm:$0xff]  ;;  %v778_v34 = vld [vmem:[#allocation2 + $0x628] sm:$0xff] }
  0x8d   :  { %3947 = vmatpush1.bf16.msra.mxu0 %v6647_v47  ;;  %v6675_v47 = vpack.c.bf16 %v756_v0, %v748_v31  ;;  %v6685_v0 = vpack.c.bf16 %v755_v16, %v747_v33  ;;  %v6687_v31 = vpack.c.bf16 %v770_v49, %v762_v35  ;;  %v771_v48 = vld [vmem:[#allocation2 + $0x5f0] sm:$0xff]  ;;  %87 = vperm.xlu1 %5911, %v59_v23   ;;  %v777_v23 = vld [vmem:[#allocation2 + $0x620] sm:$0xff] }
  0x8e   :  { %4011 = vmatpush1.bf16.msra.mxu1 %v6655_v5  ;;  %3949 = vmatprep.subr.bf16.mxu0 %v6657_v51  ;;  %v780_v51 = vld [vmem:[#allocation2 + $0x638] sm:$0xff]  ;;  %v6693_v33 = vpack.c.bf16 %v769_v60, %v761_v44  ;;  %v61_v49 = vld [vmem:[%s8116_s0 + $0xc] sm:$0x3]  ;;  %v785_v16 = vld [vmem:[#allocation2 + $0x660] sm:$0xff] }
  0x8f   :  { %4013 = vmatprep.subr.bf16.mxu1 %v6660_v63  ;;  %8523 = vst [vmem:[#allocation119_spill] sm:$0xff] %v6675_v47  ;;  %8525 = vst [vmem:[#allocation121_spill] sm:$0xff] %v6685_v0  ;;  %v786_v63 = vld [vmem:[#allocation2 + $0x668] sm:$0xff]  ;;  %v788_v5 = vld [vmem:[#allocation2 + $0x678] sm:$0xff]  ;;  %264 = vperm.xlu0 %5908, %v60_v24  }
  0x90   :  { %8526 = vst [vmem:[#allocation122_spill] sm:$0xff] %v6687_v31  ;;  %8528 = vst [vmem:[#allocation124_spill] sm:$0xff] %v6693_v33  ;;  %v779_v35 = vld [vmem:[#allocation2 + $0x630] sm:$0xff]  ;;  %v794_v60 = vld [vmem:[#allocation2 + $0x6a8] sm:$0xff] }
  0x91   :  { %3951 = vmatpush1.bf16.msra.mxu0 %v6663_v26  ;;  %v6690_v26 = vpack.c.bf16 %v772_v30, %v764_v6  ;;  %v6700_v30 = vpack.c.bf16 %v771_v48, %v763_v50  ;;  %v6702_v6 = vpack.c.bf16 %v786_v63, %v778_v34  ;;  %v787_v44 = vld [vmem:[#allocation2 + $0x670] sm:$0xff]  ;;  %92 = vperm.xlu1 %5911, %v60_v24   ;;  %v793_v24 = vld [vmem:[#allocation2 + $0x6a0] sm:$0xff] }
  0x92   :  { %4015 = vmatpush1.bf16.msra.mxu1 %v6670_v11  ;;  %3953 = vmatprep.subr.bf16.mxu0 %v6672_v59  ;;  %v796_v59 = vld [vmem:[#allocation2 + $0x6b8] sm:$0xff]  ;;  %v6708_v50 = vpack.c.bf16 %v785_v16, %v777_v23  ;;  %v62_v63 = vld [vmem:[%s8116_s0 + $0xe] sm:$0x3]  ;;  %v801_v48 = vld [vmem:[#allocation2 + $0x6e0] sm:$0xff] }
  0x93   :  { %4017 = vmatprep.subr.bf16.mxu1 %v6675_v47  ;;  %8527 = vst [vmem:[#allocation123_spill] sm:$0xff] %v6690_v26  ;;  %8529 = vst [vmem:[#allocation125_spill] sm:$0xff] %v6700_v30  ;;  %v802_v47 = vld [vmem:[#allocation2 + $0x6e8] sm:$0xff]  ;;  %v804_v11 = vld [vmem:[#allocation2 + $0x6f8] sm:$0xff]  ;;  %268 = vperm.xlu0 %5908, %v61_v49  }
  0x94   :  { %8530 = vst [vmem:[#allocation126_spill] sm:$0xff] %v6702_v6  ;;  %8532 = vst [vmem:[#allocation128_spill] sm:$0xff] %v6708_v50  ;;  %v795_v34 = vld [vmem:[#allocation2 + $0x6b0] sm:$0xff]  ;;  %v810_v16 = vld [vmem:[#allocation2 + $0x728] sm:$0xff] }
  0x95   :  { %3955 = vmatpush1.bf16.msra.mxu0 %v6678_v7  ;;  %v6705_v7 = vpack.c.bf16 %v788_v5, %v780_v51  ;;  %v6715_v5 = vpack.c.bf16 %v787_v44, %v779_v35  ;;  %v6717_v51 = vpack.c.bf16 %v802_v47, %v794_v60  ;;  %v803_v23 = vld [vmem:[#allocation2 + $0x6f0] sm:$0xff]  ;;  %97 = vperm.xlu1 %5911, %v61_v49  }
  0x96   :  { %4019 = vmatpush1.bf16.msra.mxu1 %v6685_v0  ;;  %3957 = vmatprep.subr.bf16.mxu0 %v6687_v31  ;;  %v812_v31 = vld [vmem:[#allocation2 + $0x738] sm:$0xff]  ;;  %v6723_v35 = vpack.c.bf16 %v801_v48, %v793_v24  ;;  %v6727_v47 = vpack.c.bf16 %v803_v23, %v795_v34  ;;  %v811_v60 = vld [vmem:[#allocation2 + $0x730] sm:$0xff] }
  0x97   :  { %4021 = vmatprep.subr.bf16.mxu1 %v6690_v26  ;;  %8531 = vst [vmem:[#allocation127_spill] sm:$0xff] %v6705_v7  ;;  %8533 = vst [vmem:[#allocation129_spill] sm:$0xff] %v6715_v5  ;;  %v818_v26 = vld [vmem:[#allocation2 + $0x768] sm:$0xff]  ;;  %v820_v0 = vld [vmem:[#allocation2 + $0x778] sm:$0xff]  ;;  %272 = vperm.xlu0 %5908, %v62_v63  }
  0x98   :  { %8534 = vst [vmem:[#allocation130_spill] sm:$0xff] %v6717_v51  ;;  %8536 = vst [vmem:[#allocation132_spill] sm:$0xff] %v6723_v35  ;;  %v6729_v44 = vpack.c.bf16 %v818_v26, %v810_v16  ;;  %v6732_v49 = vpack.c.bf16 %v820_v0, %v812_v31  ;;  %v828_v24 = vld [vmem:[#allocation2 + $0x7b8] sm:$0xff]  ;;  %v825_v0 = vld [vmem:[#allocation2 + $0x7a0] sm:$0xff] }
  0x99   :  { %3959 = vmatpush1.bf16.msra.mxu0 %v6693_v33  ;;  %v6720_v33 = vpack.c.bf16 %v804_v11, %v796_v59  ;;  %8537 = vst [vmem:[#allocation133_spill] sm:$0xff] %v6727_v47  ;;  %v809_v11 = vld [vmem:[#allocation2 + $0x720] sm:$0xff]  ;;  %102 = vperm.xlu1 %5911, %v62_v63   ;;  %v836_v48 = vld [vmem:[#allocation2 + $0x7f8] sm:$0xff]  ;;  %v827_v63 = vld [vmem:[#allocation2 + $0x7b0] sm:$0xff] }
  0x9a   :  { %4023 = vmatpush1.bf16.msra.mxu1 %v6700_v30  ;;  %3961 = vmatprep.subr.bf16.mxu0 %v6702_v6  ;;  %8538 = vst [vmem:[#allocation134_spill] sm:$0xff] %v6729_v44  ;;  %v817_v59 = vld [vmem:[#allocation2 + $0x760] sm:$0xff]  ;;  %8539 = vst [vmem:[#allocation135_spill] sm:$0xff] %v6732_v49  ;;  %v826_v6 = vld [vmem:[#allocation2 + $0x7a8] sm:$0xff]  ;;  %v6744_v23 = vpack.c.bf16 %v836_v48, %v828_v24 }
  0x9b   :  { %4025 = vmatprep.subr.bf16.mxu1 %v6705_v7  ;;  %8535 = vst [vmem:[#allocation131_spill] sm:$0xff] %v6720_v33  ;;  %v819_v7 = vld [vmem:[#allocation2 + $0x770] sm:$0xff]  ;;  %v833_v31 = vld [vmem:[#allocation2 + $0x7e0] sm:$0xff] }
  0x9c   :  { %v6739_v26 = vpack.c.bf16 %v819_v7, %v811_v60  ;;  %8543 = vst [vmem:[#allocation139_spill] sm:$0xff] %v6744_v23  ;;  %v835_v16 = vld [vmem:[#allocation2 + $0x7f0] sm:$0xff]  ;;  %v8550_v60 = vld [vmem:[#allocation58_spill] sm:$0xff] }
  0x9d   :  { %3963 = vmatpush1.bf16.msra.mxu0 %v6708_v50  ;;  %v834_v50 = vld [vmem:[#allocation2 + $0x7e8] sm:$0xff]  ;;  %v6751_v7 = vpack.c.bf16 %v835_v16, %v827_v63  ;;  %v8552_v48 = vld [vmem:[#allocation60_spill] sm:$0xff] }
  0x9e   :  { %4027 = vmatpush1.bf16.msra.mxu1 %v6715_v5  ;;  %3965 = vmatprep.subr.bf16.mxu0 %v6717_v51  ;;  %v6735_v51 = vpack.c.bf16 %v817_v59, %v809_v11  ;;  %8541 = vst [vmem:[#allocation137_spill] sm:$0xff] %v6739_v26  ;;  %v6741_v34 = vpack.c.bf16 %v834_v50, %v826_v6  ;;  %v8547_v6 = vld [vmem:[#allocation55_spill] sm:$0xff]  ;;  %v8548_v50 = vld [vmem:[#allocation56_spill] sm:$0xff]  ;;  %v8549_v59 = vld [vmem:[#allocation57_spill] sm:$0xff] }
  0x9f   :  { %4029 = vmatprep.subr.bf16.mxu1 %v6720_v33  ;;  %v6747_v11 = vpack.c.bf16 %v833_v31, %v825_v0  ;;  %8545 = vst [vmem:[#allocation141_spill] sm:$0xff] %v6751_v7  ;;  %v8551_v24 = vld [vmem:[#allocation59_spill] sm:$0xff]  ;;  %v8553_v0 = vld [vmem:[#allocation61_spill] sm:$0xff]  ;;  %v8554_v31 = vld [vmem:[#allocation62_spill] sm:$0xff] }
  0xa0   :  { %8540 = vst [vmem:[#allocation136_spill] sm:$0xff] %v6735_v51  ;;  %8542 = vst [vmem:[#allocation138_spill] sm:$0xff] %v6741_v34  ;;  %v8555_v63 = vld [vmem:[#allocation63_spill] sm:$0xff]  ;;  %v8556_v16 = vld [vmem:[#allocation64_spill] sm:$0xff] }
  0xa1   :  { %3967 = vmatpush1.bf16.msra.mxu0 %v6723_v35  ;;  %8544 = vst [vmem:[#allocation140_spill] sm:$0xff] %v6747_v11 }
  0xa2   :  { %4031 = vmatpush1.bf16.msra.mxu1 %v6727_v47  ;;  %3969 = vmatprep.subr.bf16.mxu0 %v6729_v44 }
  0xa3   :  { %4033 = vmatprep.subr.bf16.mxu1 %v6732_v49 }
  0xa5   :  { %3971 = vmatpush1.bf16.msra.mxu0 %v6735_v51 }
  0xa6   :  { %4035 = vmatpush1.bf16.msra.mxu1 %v6739_v26  ;;  %3973 = vmatprep.subr.bf16.mxu0 %v6741_v34 }
  0xa7   :  { %4037 = vmatprep.subr.bf16.mxu1 %v6744_v23 }
  0xa9   :  { %3975 = vmatpush1.bf16.msra.mxu0 %v6747_v11 }
  0xaa   :  { %4039 = vmatpush1.bf16.msra.mxu1 %v6751_v7  ;;  %4041 = vmatprep.subr.bf16.mxu0 %v6341_v4 }
  0xab   :  { %4105 = vmatprep.subr.bf16.mxu1 %v6343_v8 }
  0xac   :  { %1044 = vmatmul.mubr.f32.vlgmr.msra.gmra.mrb[2].mxu0 %v8486_v61 }
  0xad   :  { %1115 = vmatmul.mubr.f32.vlgmr.msra.gmra.mrb[2].mxu1 %v8486_v61  ;;  %4043 = vmatpush1.bf16.msra.mxu0 %v6345_v9  ;;  %v8546_v61 = vld [vmem:[#allocation54_spill] sm:$0xff] }
  0xae   :  { %4107 = vmatpush1.bf16.msra.mxu1 %v6348_v13  ;;  %4045 = vmatprep.subr.bf16.mxu0 %v6352_v17 }
  0xaf   :  { %4109 = vmatprep.subr.bf16.mxu1 %v6354_v18 }
  0xb1   :  { %4047 = vmatpush1.bf16.msra.mxu0 %v6357_v22 }
  0xb2   :  { %4111 = vmatpush1.bf16.msra.mxu1 %v6362_v27  ;;  %4049 = vmatprep.subr.bf16.mxu0 %v6364_v28 }
  0xb3   :  { %4113 = vmatprep.subr.bf16.mxu1 %v6366_v32 }
  0xb5   :  { %4051 = vmatpush1.bf16.msra.mxu0 %v6370_v36 }
  0xb6   :  { %4115 = vmatpush1.bf16.msra.mxu1 %v6374_v40  ;;  %4053 = vmatprep.subr.bf16.mxu0 %v6376_v41 }
  0xb7   :  { %4117 = vmatprep.subr.bf16.mxu1 %v6379_v45 }
  0xb9   :  { %4055 = vmatpush1.bf16.msra.mxu0 %v6382_v52 }
  0xba   :  { %4119 = vmatpush1.bf16.msra.mxu1 %v6386_v53  ;;  %4057 = vmatprep.subr.bf16.mxu0 %v6388_v54 }
  0xbb   :  { %4121 = vmatprep.subr.bf16.mxu1 %v6391_v58 }
  0xbd   :  { %4059 = vmatpush1.bf16.msra.mxu0 %v6394_v1 }
  0xbe   :  { %4123 = vmatpush1.bf16.msra.mxu1 %v6398_v2  ;;  %4061 = vmatprep.subr.bf16.mxu0 %v6400_v3 }
  0xbf   :  { %4125 = vmatprep.subr.bf16.mxu1 %v6403_v10 }
  0xc1   :  { %4063 = vmatpush1.bf16.msra.mxu0 %v6406_v19 }
  0xc2   :  { %4127 = vmatpush1.bf16.msra.mxu1 %v6410_v20  ;;  %4065 = vmatprep.subr.bf16.mxu0 %v6412_v21 }
  0xc3   :  { %4129 = vmatprep.subr.bf16.mxu1 %v6415_v29 }
  0xc5   :  { %4067 = vmatpush1.bf16.msra.mxu0 %v6418_v37 }
  0xc6   :  { %4131 = vmatpush1.bf16.msra.mxu1 %v6422_v38  ;;  %4069 = vmatprep.subr.bf16.mxu0 %v6424_v39 }
  0xc7   :  { %4133 = vmatprep.subr.bf16.mxu1 %v6427_v46 }
  0xc9   :  { %4071 = vmatpush1.bf16.msra.mxu0 %v6430_v55 }
  0xca   :  { %4135 = vmatpush1.bf16.msra.mxu1 %v6434_v56  ;;  %4073 = vmatprep.subr.bf16.mxu0 %v6436_v57 }
  0xcb   :  { %4137 = vmatprep.subr.bf16.mxu1 %v6439_v62 }
  0xcd   :  { %4075 = vmatpush1.bf16.msra.mxu0 %v6442_v12 }
  0xce   :  { %4139 = vmatpush1.bf16.msra.mxu1 %v6446_v14  ;;  %4077 = vmatprep.subr.bf16.mxu0 %v6448_v15 }
  0xcf   :  { %4141 = vmatprep.subr.bf16.mxu1 %v6451_v25 }
  0xd1   :  { %4079 = vmatpush1.bf16.msra.mxu0 %v6454_v42  ;;  %v107_v42 = vlaneseq }
  0xd2   :  { %4143 = vmatpush1.bf16.msra.mxu1 %v6458_v43  ;;  %4081 = vmatprep.subr.bf16.mxu0 %v8546_v61  ;;  %v8557_v61 = vld [vmem:[#allocation65_spill] sm:$0xff] }
  0xd3   :  { %4145 = vmatprep.subr.bf16.mxu1 %v8547_v6  ;;  %v8558_v6 = vld [vmem:[#allocation66_spill] sm:$0xff] }
  0xd5   :  { %4083 = vmatpush1.bf16.msra.mxu0 %v8548_v50  ;;  %v8559_v50 = vld [vmem:[#allocation67_spill] sm:$0xff] }
  0xd6   :  { %4147 = vmatpush1.bf16.msra.mxu1 %v8549_v59  ;;  %4085 = vmatprep.subr.bf16.mxu0 %v8550_v60  ;;  %v8560_v59 = vld [vmem:[#allocation68_spill] sm:$0xff]  ;;  %v8561_v60 = vld [vmem:[#allocation69_spill] sm:$0xff] }
  0xd7   :  { %4149 = vmatprep.subr.bf16.mxu1 %v8551_v24  ;;  %v8562_v24 = vld [vmem:[#allocation70_spill] sm:$0xff] }
  0xd9   :  { %4087 = vmatpush1.bf16.msra.mxu0 %v8552_v48  ;;  %v8563_v48 = vld [vmem:[#allocation71_spill] sm:$0xff] }
  0xda   :  { %4151 = vmatpush1.bf16.msra.mxu1 %v8553_v0  ;;  %4089 = vmatprep.subr.bf16.mxu0 %v8554_v31  ;;  %v8564_v0 = vld [vmem:[#allocation72_spill] sm:$0xff]  ;;  %v8565_v31 = vld [vmem:[#allocation73_spill] sm:$0xff] }
  0xdb   :  { %4153 = vmatprep.subr.bf16.mxu1 %v8555_v63  ;;  %v8566_v63 = vld [vmem:[#allocation74_spill] sm:$0xff] }
  0xdd   :  { %4091 = vmatpush1.bf16.msra.mxu0 %v8556_v16  ;;  %v8567_v16 = vld [vmem:[#allocation75_spill] sm:$0xff] }
  0xde   :  { %4155 = vmatpush1.bf16.msra.mxu1 %v8557_v61  ;;  %4093 = vmatprep.subr.bf16.mxu0 %v8558_v6  ;;  %v8568_v61 = vld [vmem:[#allocation76_spill] sm:$0xff]  ;;  %v8569_v6 = vld [vmem:[#allocation77_spill] sm:$0xff] }
  0xdf   :  { %4157 = vmatprep.subr.bf16.mxu1 %v8559_v50  ;;  %v8570_v50 = vld [vmem:[#allocation78_spill] sm:$0xff] }
  0xe1   :  { %4095 = vmatpush1.bf16.msra.mxu0 %v8560_v59  ;;  %v8571_v59 = vld [vmem:[#allocation79_spill] sm:$0xff] }
  0xe2   :  { %4159 = vmatpush1.bf16.msra.mxu1 %v8561_v60  ;;  %4097 = vmatprep.subr.bf16.mxu0 %v8562_v24 }
  0xe3   :  { %4161 = vmatprep.subr.bf16.mxu1 %v8563_v48 }
  0xe5   :  { %4099 = vmatpush1.bf16.msra.mxu0 %v8564_v0  ;;  %v108_v0 = vshrl.u32 %v107_v42, 7 }
  0xe6   :  { %4163 = vmatpush1.bf16.msra.mxu1 %v8565_v31  ;;  %4101 = vmatprep.subr.bf16.mxu0 %v8566_v63 }
  0xe7   :  { %4165 = vmatprep.subr.bf16.mxu1 %v8567_v16  ;;  %v6824_v25 = vsub.s32 0, %v108_v0  ;;  %v6826_v31 = vsub.s32 1, %v108_v0  ;;  %v6831_v16 = vsub.s32 4, %v108_v0  ;;  %v6841_v15 = vsub.s32 6, %v108_v0 }
  0xe8   :  { %v6843_v42 = vsub.s32 7, %v108_v0 }
  0xe9   :  { %4103 = vmatpush1.bf16.msra.mxu0 %v8568_v61  ;;  %8572 = vst [vmem:[#allocation142_spill] sm:$0xff] %v6824_v25  ;;  %8573 = vst [vmem:[#allocation143_spill] sm:$0xff] %v6826_v31  ;;  %v63_v61 = vld [vmem:[%s8117_s1] sm:$0xff] }
  0xea   :  { %4167 = vmatpush1.bf16.msra.mxu1 %v8569_v6  ;;  %4169 = vmatprep.subr.bf16.mxu0 %v8570_v50  ;;  %v6833_v6 = vsub.s32 5, %v108_v0  ;;  %v6835_v50 = vsub.s32 2, %v108_v0  ;;  %v110_v14 = vrot.slane %v63_v61, %v6824_v25  ;;  %v278_v12 = vrot.slane %v63_v61, %v6826_v31 }
  0xeb   :  { %4233 = vmatprep.subr.bf16.mxu1 %v8571_v59  ;;  %v6837_v59 = vsub.s32 3, %v108_v0  ;;  %v118_v62 = vrot.slane %v63_v61, %v6831_v16  ;;  %v122_v46 = vrot.slane %v63_v61, %v6841_v15  ;;  %v290_v39 = vrot.slane %v63_v61, %v6843_v42 }
  0xec   :  { %v286_v57 = vrot.slane %v63_v61, %v6833_v6  ;;  %v114_v56 = vrot.slane %v63_v61, %v6835_v50  ;;  %v6854_v38 = vrot.slane %v110_v14, %v6824_v25  ;;  %v6857_v0 = vrot.slane %v278_v12, %v6826_v31 }
  0xed   :  { %v282_v55 = vrot.slane %v63_v61, %v6837_v59  ;;  %v6862_v29 = vrot.slane %v118_v62, %v6824_v25  ;;  %v6874_v14 = vrot.slane %v122_v46, %v6824_v25  ;;  %v6877_v12 = vrot.slane %v290_v39, %v6826_v31 }
  0xee   :  { %8574 = vst [vmem:[#allocation144_spill] sm:$0xff] %v6854_v38  ;;  %8575 = vst [vmem:[#allocation145_spill] sm:$0xff] %v6857_v0  ;;  %v6865_v21 = vrot.slane %v286_v57, %v6826_v31  ;;  %v6868_v20 = vrot.slane %v114_v56, %v6824_v25  ;;  %v6886_v56 = vld [vmem:[%s8119_s3] sm:$0xff] }
  0xef   :  { %8576 = vst [vmem:[#allocation146_spill] sm:$0xff] %v6862_v29  ;;  %v6871_v19 = vrot.slane %v282_v55, %v6826_v31  ;;  %8580 = vst [vmem:[#allocation150_spill] sm:$0xff] %v6874_v14  ;;  %v6902_v3 = vrot.slane %v6886_v56, %v6824_v25 }
  0xf0   :  { %8577 = vst [vmem:[#allocation147_spill] sm:$0xff] %v6865_v21  ;;  %8578 = vst [vmem:[#allocation148_spill] sm:$0xff] %v6868_v20 }
  0xf1   :  { %8579 = vst [vmem:[#allocation149_spill] sm:$0xff] %v6871_v19  ;;  %8581 = vst [vmem:[#allocation151_spill] sm:$0xff] %v6877_v12 }
  0xf7   :  { %v6839_v63 = vpop.permute.xlu0 %67 }
  0xf8   :  { %v179_v61 = vmul.f32 %v6854_v38, %v6839_v63  ;;  %v181_v55 = vmul.f32 %v6862_v29, %v6839_v63  ;;  %v180_v39 = vmul.f32 %v6868_v20, %v6839_v63 }
  0xfc   :  { %v6859_v37 = vpop.permute.xlu0 %244 }
  0xfd   :  { %v347_v62 = vmul.f32 %v6857_v0, %v6859_v37  ;;  %v349_v46 = vmul.f32 %v6865_v21, %v6859_v37  ;;  %v348_v57 = vmul.f32 %v6871_v19, %v6859_v37  ;;  %v182_v0 = vmul.f32 %v6874_v14, %v6839_v63 }
  0xfe   :  { %v350_v38 = vmul.f32 %v6877_v12, %v6859_v37  ;;  %v6906_v21 = vrot.slane %v6886_v56, %v6835_v50  ;;  %v6910_v19 = vrot.slane %v6886_v56, %v6826_v31  ;;  %v6914_v14 = vrot.slane %v6886_v56, %v6837_v59 }
  0xff   :  { %v411_v10 = vadd.f32 %v347_v62, %v179_v61  ;;  %v413_v29 = vadd.f32 %v349_v46, %v181_v55  ;;  %v412_v20 = vadd.f32 %v348_v57, %v180_v39 }
 0x100   :  { %v414_v2 = vadd.f32 %v350_v38, %v182_v0  ;;  %v64_v38 = vld [vmem:[%s8117_s1 + $0x8] sm:$0xff] }
 0x101   :  { %v517_v61 = vadd.f32 %v6902_v3, %v411_v10  ;;  %v519_v62 = vadd.f32 %v6906_v21, %v413_v29  ;;  %v518_v55 = vadd.f32 %v6910_v19, %v412_v20  ;;  %v126_v10 = vrot.slane %v64_v38, %v6824_v25 }
 0x102   :  { %v520_v46 = vadd.f32 %v6914_v14, %v414_v2  ;;  %v294_v20 = vrot.slane %v64_v38, %v6826_v31  ;;  %v134_v2 = vrot.slane %v64_v38, %v6831_v16  ;;  %v302_v29 = vrot.slane %v64_v38, %v6833_v6 }
 0x13f   :  { %v903_v60 = vpop.f32.mrb[0].mxu0 }
 0x140   :  { %v974_v24 = vpop.f32.mrb[0].mxu1  ;;  %v905_v43 = vpop.f32.mrb[1].mxu0  ;;  %v1121_v12 = vadd.f32 %v903_v60, %v517_v61  ;;  %v138_v60 = vrot.slane %v64_v38, %v6841_v15 }
 0x141   :  { %v976_v48 = vpop.f32.mrb[1].mxu1  ;;  %v1123_v1 = vadd.f32 %v974_v24, %v519_v62  ;;  %v1122_v39 = vadd.f32 %v905_v43, %v518_v55  ;;  %v130_v43 = vrot.slane %v64_v38, %v6835_v50  ;;  %v306_v24 = vrot.slane %v64_v38, %v6843_v42 }
 0x142   :  { %v1124_v57 = vadd.f32 %v976_v48, %v520_v46  ;;  %v3736_v58 = vmul.f32 -1.442695, %v1121_v12  ;;  %v6938_v48 = vrot.slane %v134_v2, %v6824_v25  ;;  %v6950_v12 = vrot.slane %v138_v60, %v6824_v25 }
 0x143   :  { %v3738_v54 = vmul.f32 -1.442695, %v1123_v1  ;;  %v3737_v53 = vmul.f32 -1.442695, %v1122_v39  ;;  %v298_v1 = vrot.slane %v64_v38, %v6837_v59  ;;  %v6944_v50 = vrot.slane %v130_v43, %v6824_v25 }
 0x144   :  { %v3739_v0 = vmul.f32 -1.442695, %v1124_v57  ;;  %5912 = vpow2.f32 %v3736_v58  ;;  %v6935_v58 = vrot.slane %v294_v20, %v6826_v31  ;;  %v6953_v61 = vrot.slane %v306_v24, %v6826_v31 }
 0x145   :  { %5914 = vpow2.f32 %v3738_v54  ;;  %v6932_v54 = vrot.slane %v126_v10, %v6824_v25  ;;  %8582 = vst [vmem:[#allocation152_spill] sm:$0xff] %v6944_v50  ;;  %v6947_v59 = vrot.slane %v298_v1, %v6826_v31  ;;  %v185_v39 = vmul.f32 %v6938_v48, %v6839_v63 }
 0x146   :  { %5916 = vpow2.f32 %v3737_v53  ;;  %v6941_v53 = vrot.slane %v302_v29, %v6826_v31  ;;  %8584 = vst [vmem:[#allocation154_spill] sm:$0xff] %v6953_v61  ;;  %v351_v55 = vmul.f32 %v6935_v58, %v6859_v37  ;;  %v184_v38 = vmul.f32 %v6944_v50, %v6839_v63 }
 0x147   :  { %5918 = vpow2.f32 %v3739_v0  ;;  %8583 = vst [vmem:[#allocation153_spill] sm:$0xff] %v6947_v59  ;;  %v183_v62 = vmul.f32 %v6932_v54, %v6839_v63  ;;  %v352_v0 = vmul.f32 %v6947_v59, %v6859_v37  ;;  %v186_v20 = vmul.f32 %v6950_v12, %v6839_v63 }
 0x148   :  { %v353_v57 = vmul.f32 %v6941_v53, %v6859_v37  ;;  %v354_v2 = vmul.f32 %v6953_v61, %v6859_v37  ;;  %v6973_v24 = vrot.slane %v6886_v56, %v6831_v16  ;;  %v6977_v31 = vrot.slane %v6886_v56, %v6841_v15 }
 0x149   :  { %v415_v60 = vadd.f32 %v351_v55, %v183_v62  ;;  %v416_v50 = vadd.f32 %v352_v0, %v184_v38  ;;  %v6981_v63 = vrot.slane %v6886_v56, %v6833_v6  ;;  %v6985_v62 = vrot.slane %v6886_v56, %v6843_v42 }
 0x14a   :  { %v417_v59 = vadd.f32 %v353_v57, %v185_v39  ;;  %v418_v61 = vadd.f32 %v354_v2, %v186_v20 }
 0x14b   :  { %v521_v16 = vadd.f32 %v6973_v24, %v415_v60  ;;  %v522_v39 = vadd.f32 %v6981_v63, %v416_v50 }
 0x14c   :  { %v524_v0 = vadd.f32 %v6985_v62, %v418_v61 }
 0x14e   :  { %v5913_v46 = vpop.eup %5912 }
 0x14f   :  { %v5915_v10 = vpop.eup %5914  ;;  %v1135_v1 = vadd.f32 1.0, %v5913_v46  ;;  %v523_v46 = vadd.f32 %v6977_v31, %v417_v59 }
 0x150   :  { %v5917_v29 = vpop.eup %5916  ;;  %v1147_v25 = vadd.f32 1.0, %v5915_v10 }
 0x151   :  { %v5919_v43 = vpop.eup %5918  ;;  %v1136_v37 = vadd.f32 1.0, %v5917_v29  ;;  %5920 = vrcp.f32 %v1135_v1 }
 0x152   :  { %v1148_v55 = vadd.f32 1.0, %v5919_v43  ;;  %5922 = vrcp.f32 %v1147_v25 }
 0x153   :  { %5924 = vrcp.f32 %v1136_v37 }
 0x154   :  { %5926 = vrcp.f32 %v1148_v55 }
 0x15b   :  { %v5921_v59 = vpop.eup %5920 }
 0x15c   :  { %v5923_v29 = vpop.eup %5922 }
 0x15d   :  { %v5925_v50 = vpop.eup %5924  ;;  %v1167_v37 = vmul.f32 0.0, %v5923_v29  ;;  %v8587_v29 = vld [vmem:[#allocation82_spill] sm:$0xff] }
 0x15e   :  { %v5927_v43 = vpop.eup %5926 }
 0x15f   :  { %v1168_v61 = vmul.f32 0.0, %v5927_v43  ;;  %v8589_v43 = vld [vmem:[#allocation84_spill] sm:$0xff] }
 0x17f   :  { %v1045_v15 = vpop.f32.mrb[2].mxu0 }
 0x180   :  { %v1125_v57 = vadd.f32 %v1045_v15, %v521_v16  ;;  %v1116_v6 = vpop.f32.mrb[2].mxu1  ;;  %v1047_v38 = vpop.f32.mrb[3].mxu0 }
 0x181   :  { %v1127_v10 = vadd.f32 %v1116_v6, %v523_v46  ;;  %v1126_v42 = vadd.f32 %v1047_v38, %v522_v39  ;;  %v1118_v56 = vpop.f32.mrb[3].mxu1 }
 0x182   :  { %5928 = vtanh.f32 %v1125_v57  ;;  %v1128_v20 = vadd.f32 %v1118_v56, %v524_v0 }
 0x183   :  { %v3740_v2 = vmul.f32 -1.442695, %v1127_v10  ;;  %5930 = vtanh.f32 %v1126_v42 }
 0x184   :  { %v3741_v25 = vmul.f32 -1.442695, %v1128_v20 }
 0x185   :  { %5932 = vpow2.f32 %v3740_v2 }
 0x186   :  { %5934 = vpow2.f32 %v3741_v25  ;;  %v8585_v25 = vld [vmem:[#allocation80_spill] sm:$0xff] }
 0x18c   :  { %v5929_v1 = vpop.eup %5928 }
 0x18d   :  { %v5931_v60 = vpop.eup %5930  ;;  %v1169_v16 = vmul.f32 %v5929_v1, %v5921_v59  ;;  %v8586_v59 = vld [vmem:[#allocation81_spill] sm:$0xff] }
 0x18e   :  { %v1170_v55 = vmul.f32 %v5931_v60, %v5925_v50  ;;  %v8588_v50 = vld [vmem:[#allocation83_spill] sm:$0xff]  ;;  %v8590_v1 = vld [vmem:[#allocation85_spill] sm:$0xff]  ;;  %v8591_v60 = vld [vmem:[#allocation86_spill] sm:$0xff] }
 0x18f   :  { %v5933_v15 = vpop.eup %5932  ;;  %v6991_v46 = vadd.f32 %v1169_v16, %v1167_v37  ;;  %v8592_v37 = vld [vmem:[#allocation87_spill] sm:$0xff]  ;;  %v8593_v16 = vld [vmem:[#allocation88_spill] sm:$0xff] }
 0x190   :  { %v5935_v39 = vpop.eup %5934  ;;  %v1161_v57 = vadd.f32 1.0, %v5933_v15  ;;  %v6993_v6 = vadd.f32 %v1170_v55, %v1168_v61  ;;  %v8594_v61 = vld [vmem:[#allocation89_spill] sm:$0xff]  ;;  %v8595_v55 = vld [vmem:[#allocation90_spill] sm:$0xff]  ;;  %v8596_v15 = vld [vmem:[#allocation91_spill] sm:$0xff] }
 0x191   :  { %5936 = vtanh.f32 %v6991_v46  ;;  %v1162_v38 = vadd.f32 1.0, %v5935_v39  ;;  %v8597_v39 = vld [vmem:[#allocation92_spill] sm:$0xff] }
 0x192   :  { %5938 = vrcp.f32 %v1161_v57  ;;  %v8598_v57 = vld [vmem:[#allocation93_spill] sm:$0xff] }
 0x193   :  { %5940 = vtanh.f32 %v6993_v6 }
 0x194   :  { %5942 = vrcp.f32 %v1162_v38  ;;  %v8599_v38 = vld [vmem:[#allocation94_spill] sm:$0xff] }
 0x19b   :  { %v5937_v0 = vpop.eup %5936 }
 0x19c   :  { %v5939_v10 = vpop.eup %5938 }
 0x19d   :  { %v5941_v42 = vpop.eup %5940  ;;  %v6997_v2 = vmul.f32 %v5939_v10, %v5937_v0  ;;  %v8600_v0 = vld [vmem:[#allocation95_spill] sm:$0xff]  ;;  %v8601_v10 = vld [vmem:[#allocation96_spill] sm:$0xff] }
 0x19e   :  { %v5943_v56 = vpop.eup %5942 }
 0x19f   :  { %v1176_v20 = vmul.f32 %v5943_v56, %v5941_v42  ;;  %v8602_v42 = vld [vmem:[#allocation97_spill] sm:$0xff]  ;;  %v8603_v56 = vld [vmem:[#allocation98_spill] sm:$0xff] }
 0x1a1   :  { %1241 = vmatprep.mubr.f32.mxu0 %v1176_v20  ;;  %1312 = vmatprep.mubr.f32.mxu1 %v1176_v20 }
 0x1a2   :  { %1242 = vmatmul.mubr.f32.vlgmr.msra.gmra.mrb[4].mxu0 %v6997_v2  ;;  %1313 = vmatmul.mubr.f32.vlgmr.msra.gmra.mrb[4].mxu1 %v6997_v2 }
 0x1a3   :  { %4171 = vmatpush1.bf16.msra.mxu0 %v8585_v25  ;;  %4235 = vmatpush1.bf16.msra.mxu1 %v8586_v59 }
 0x1a4   :  { %1383 = vmatprep.mubr.f32.mxu0 %v1176_v20  ;;  %1454 = vmatprep.mubr.f32.mxu1 %v1176_v20  ;;  %v8604_v20 = vld [vmem:[#allocation99_spill] sm:$0xff] }
 0x1a5   :  { %4173 = vmatprep.subr.bf16.mxu0 %v8587_v29  ;;  %4237 = vmatprep.subr.bf16.mxu1 %v8588_v50 }
 0x1a7   :  { %4175 = vmatpush1.bf16.msra.mxu0 %v8589_v43  ;;  %4239 = vmatpush1.bf16.msra.mxu1 %v8590_v1 }
 0x1a8   :  { %4177 = vmatprep.subr.bf16.mxu0 %v8591_v60  ;;  %4241 = vmatprep.subr.bf16.mxu1 %v8592_v37 }
 0x1ab   :  { %4179 = vmatpush1.bf16.msra.mxu0 %v8593_v16  ;;  %4243 = vmatpush1.bf16.msra.mxu1 %v8594_v61  ;;  %v8605_v61 = vld [vmem:[#allocation100_spill] sm:$0xff] }
 0x1ac   :  { %4181 = vmatprep.subr.bf16.mxu0 %v8595_v55  ;;  %4245 = vmatprep.subr.bf16.mxu1 %v8596_v15  ;;  %v8606_v55 = vld [vmem:[#allocation101_spill] sm:$0xff]  ;;  %v8607_v15 = vld [vmem:[#allocation102_spill] sm:$0xff] }
 0x1af   :  { %4183 = vmatpush1.bf16.msra.mxu0 %v8597_v39  ;;  %4247 = vmatpush1.bf16.msra.mxu1 %v8598_v57  ;;  %v8608_v39 = vld [vmem:[#allocation103_spill] sm:$0xff]  ;;  %v8609_v57 = vld [vmem:[#allocation104_spill] sm:$0xff] }
 0x1b0   :  { %4185 = vmatprep.subr.bf16.mxu0 %v8599_v38  ;;  %4249 = vmatprep.subr.bf16.mxu1 %v8600_v0  ;;  %v8610_v38 = vld [vmem:[#allocation105_spill] sm:$0xff]  ;;  %v8611_v0 = vld [vmem:[#allocation106_spill] sm:$0xff] }
 0x1b3   :  { %4187 = vmatpush1.bf16.msra.mxu0 %v8601_v10  ;;  %4251 = vmatpush1.bf16.msra.mxu1 %v8602_v42  ;;  %v8612_v10 = vld [vmem:[#allocation107_spill] sm:$0xff]  ;;  %v8613_v42 = vld [vmem:[#allocation108_spill] sm:$0xff] }
 0x1b4   :  { %4189 = vmatprep.subr.bf16.mxu0 %v8603_v56  ;;  %4253 = vmatprep.subr.bf16.mxu1 %v8604_v20  ;;  %v8614_v56 = vld [vmem:[#allocation109_spill] sm:$0xff]  ;;  %v8615_v20 = vld [vmem:[#allocation110_spill] sm:$0xff] }
 0x1b7   :  { %4191 = vmatpush1.bf16.msra.mxu0 %v8605_v61  ;;  %4255 = vmatpush1.bf16.msra.mxu1 %v8606_v55  ;;  %v8616_v61 = vld [vmem:[#allocation111_spill] sm:$0xff]  ;;  %v8617_v55 = vld [vmem:[#allocation112_spill] sm:$0xff] }
 0x1b8   :  { %4193 = vmatprep.subr.bf16.mxu0 %v8607_v15  ;;  %4257 = vmatprep.subr.bf16.mxu1 %v8608_v39  ;;  %v8618_v15 = vld [vmem:[#allocation113_spill] sm:$0xff]  ;;  %v8619_v39 = vld [vmem:[#allocation114_spill] sm:$0xff] }
 0x1bb   :  { %4195 = vmatpush1.bf16.msra.mxu0 %v8609_v57  ;;  %4259 = vmatpush1.bf16.msra.mxu1 %v8610_v38  ;;  %v8620_v57 = vld [vmem:[#allocation115_spill] sm:$0xff]  ;;  %v8621_v38 = vld [vmem:[#allocation116_spill] sm:$0xff] }
 0x1bc   :  { %4197 = vmatprep.subr.bf16.mxu0 %v8611_v0  ;;  %4261 = vmatprep.subr.bf16.mxu1 %v8612_v10  ;;  %v8622_v0 = vld [vmem:[#allocation117_spill] sm:$0xff]  ;;  %v8623_v10 = vld [vmem:[#allocation118_spill] sm:$0xff] }
 0x1bf   :  { %4199 = vmatpush1.bf16.msra.mxu0 %v8613_v42  ;;  %4263 = vmatpush1.bf16.msra.mxu1 %v8614_v56  ;;  %v8624_v42 = vld [vmem:[#allocation119_spill] sm:$0xff]  ;;  %v8625_v56 = vld [vmem:[#allocation120_spill] sm:$0xff] }
 0x1c0   :  { %4201 = vmatprep.subr.bf16.mxu0 %v8615_v20  ;;  %4265 = vmatprep.subr.bf16.mxu1 %v8616_v61  ;;  %v8626_v20 = vld [vmem:[#allocation121_spill] sm:$0xff]  ;;  %v8627_v61 = vld [vmem:[#allocation122_spill] sm:$0xff] }
 0x1c3   :  { %4203 = vmatpush1.bf16.msra.mxu0 %v8617_v55  ;;  %4267 = vmatpush1.bf16.msra.mxu1 %v8618_v15  ;;  %v8628_v55 = vld [vmem:[#allocation123_spill] sm:$0xff]  ;;  %v8629_v15 = vld [vmem:[#allocation124_spill] sm:$0xff] }
 0x1c4   :  { %4205 = vmatprep.subr.bf16.mxu0 %v8619_v39  ;;  %4269 = vmatprep.subr.bf16.mxu1 %v8620_v57  ;;  %v8630_v57 = vld [vmem:[#allocation126_spill] sm:$0xff] }
 0x1c7   :  { %4207 = vmatpush1.bf16.msra.mxu0 %v8621_v38  ;;  %4271 = vmatpush1.bf16.msra.mxu1 %v8622_v0  ;;  %v8631_v38 = vld [vmem:[#allocation127_spill] sm:$0xff]  ;;  %v8632_v0 = vld [vmem:[#allocation128_spill] sm:$0xff] }
 0x1c8   :  { %4209 = vmatprep.subr.bf16.mxu0 %v8623_v10  ;;  %4273 = vmatprep.subr.bf16.mxu1 %v8624_v42  ;;  %v8633_v42 = vld [vmem:[#allocation130_spill] sm:$0xff] }
 0x1cb   :  { %4211 = vmatpush1.bf16.msra.mxu0 %v8625_v56  ;;  %4275 = vmatpush1.bf16.msra.mxu1 %v8626_v20 }
 0x1cc   :  { %4213 = vmatprep.subr.bf16.mxu0 %v8627_v61  ;;  %4277 = vmatprep.subr.bf16.mxu1 %v8628_v55 }
 0x1cf   :  { %4215 = vmatpush1.bf16.msra.mxu0 %v8629_v15  ;;  %4279 = vmatpush1.bf16.msra.mxu1 %v6700_v30 }
 0x1d0   :  { %4217 = vmatprep.subr.bf16.mxu0 %v8630_v57  ;;  %4281 = vmatprep.subr.bf16.mxu1 %v8631_v38 }
 0x1d3   :  { %4219 = vmatpush1.bf16.msra.mxu0 %v8632_v0  ;;  %4283 = vmatpush1.bf16.msra.mxu1 %v6715_v5 }
 0x1d4   :  { %4221 = vmatprep.subr.bf16.mxu0 %v8633_v42  ;;  %4285 = vmatprep.subr.bf16.mxu1 %v6720_v33 }
 0x1d7   :  { %4223 = vmatpush1.bf16.msra.mxu0 %v6723_v35  ;;  %4287 = vmatpush1.bf16.msra.mxu1 %v6727_v47 }
 0x1d8   :  { %4225 = vmatprep.subr.bf16.mxu0 %v6729_v44  ;;  %4289 = vmatprep.subr.bf16.mxu1 %v6732_v49 }
 0x1db   :  { %4227 = vmatpush1.bf16.msra.mxu0 %v6735_v51  ;;  %4291 = vmatpush1.bf16.msra.mxu1 %v6739_v26  ;;  %v8692_v26 = vld [vmem:[#allocation151_spill] sm:$0xff] }
 0x1dc   :  { %4229 = vmatprep.subr.bf16.mxu0 %v6741_v34  ;;  %4293 = vmatprep.subr.bf16.mxu1 %v6744_v23  ;;  %v8690_v23 = vld [vmem:[#allocation149_spill] sm:$0xff]  ;;  %v8691_v34 = vld [vmem:[#allocation150_spill] sm:$0xff] }
 0x1df   :  { %4231 = vmatpush1.bf16.msra.mxu0 %v6747_v11  ;;  %4295 = vmatpush1.bf16.msra.mxu1 %v6751_v7  ;;  %v8688_v7 = vld [vmem:[#allocation147_spill] sm:$0xff]  ;;  %v8689_v11 = vld [vmem:[#allocation148_spill] sm:$0xff] }
 0x1e0   :  { %4297 = vmatprep.subr.bf16.mxu0 %v6341_v4  ;;  %4361 = vmatprep.subr.bf16.mxu1 %v6343_v8  ;;  %v8686_v8 = vld [vmem:[#allocation145_spill] sm:$0xff]  ;;  %v8687_v4 = vld [vmem:[#allocation146_spill] sm:$0xff] }
 0x1e2   :  { %1384 = vmatmul.mubr.f32.vlgmr.msra.gmra.mrb[6].mxu0 %v6997_v2  ;;  %1455 = vmatmul.mubr.f32.vlgmr.msra.gmra.mrb[6].mxu1 %v6997_v2  ;;  %v8634_v2 = vld [vmem:[#allocation29_spill] sm:$0xff] }
 0x1e3   :  { %4299 = vmatpush1.bf16.msra.mxu0 %v6345_v9  ;;  %4363 = vmatpush1.bf16.msra.mxu1 %v6348_v13  ;;  %v73_v13 = vpop.permute.xlu1 %72  ;;  %v8685_v9 = vld [vmem:[#allocation144_spill] sm:$0xff] }
 0x1e4   :  { %4301 = vmatprep.subr.bf16.mxu0 %v6352_v17  ;;  %4365 = vmatprep.subr.bf16.mxu1 %v6354_v18  ;;  %v8635_v18 = vld [vmem:[#allocation30_spill] sm:$0xff] }
 0x1e7   :  { %4303 = vmatpush1.bf16.msra.mxu0 %v6357_v22  ;;  %4367 = vmatpush1.bf16.msra.mxu1 %v6362_v27  ;;  %v8636_v22 = vld [vmem:[#allocation31_spill] sm:$0xff]  ;;  %v8637_v27 = vld [vmem:[#allocation32_spill] sm:$0xff] }
 0x1e8   :  { %4305 = vmatprep.subr.bf16.mxu0 %v6364_v28  ;;  %4369 = vmatprep.subr.bf16.mxu1 %v6366_v32  ;;  %v8638_v28 = vld [vmem:[#allocation33_spill] sm:$0xff]  ;;  %v8639_v32 = vld [vmem:[#allocation34_spill] sm:$0xff] }
 0x1eb   :  { %4307 = vmatpush1.bf16.msra.mxu0 %v6370_v36  ;;  %4371 = vmatpush1.bf16.msra.mxu1 %v6374_v40  ;;  %v8640_v36 = vld [vmem:[#allocation35_spill] sm:$0xff]  ;;  %v8641_v40 = vld [vmem:[#allocation36_spill] sm:$0xff] }
 0x1ec   :  { %4309 = vmatprep.subr.bf16.mxu0 %v6376_v41  ;;  %4373 = vmatprep.subr.bf16.mxu1 %v6379_v45  ;;  %v8642_v41 = vld [vmem:[#allocation37_spill] sm:$0xff]  ;;  %v8643_v45 = vld [vmem:[#allocation38_spill] sm:$0xff] }
 0x1ef   :  { %4311 = vmatpush1.bf16.msra.mxu0 %v6382_v52  ;;  %4375 = vmatpush1.bf16.msra.mxu1 %v8634_v2  ;;  %v8644_v52 = vld [vmem:[#allocation39_spill] sm:$0xff]  ;;  %v8645_v2 = vld [vmem:[#allocation40_spill] sm:$0xff] }
 0x1f0   :  { %4313 = vmatprep.subr.bf16.mxu0 %v8635_v18  ;;  %4377 = vmatprep.subr.bf16.mxu1 %v8636_v22  ;;  %v8646_v18 = vld [vmem:[#allocation41_spill] sm:$0xff]  ;;  %v8647_v22 = vld [vmem:[#allocation42_spill] sm:$0xff] }
 0x1f3   :  { %4315 = vmatpush1.bf16.msra.mxu0 %v8637_v27  ;;  %4379 = vmatpush1.bf16.msra.mxu1 %v8638_v28  ;;  %v8648_v27 = vld [vmem:[#allocation43_spill] sm:$0xff]  ;;  %v8649_v28 = vld [vmem:[#allocation44_spill] sm:$0xff] }
 0x1f4   :  { %4317 = vmatprep.subr.bf16.mxu0 %v8639_v32  ;;  %4381 = vmatprep.subr.bf16.mxu1 %v8640_v36  ;;  %v8650_v32 = vld [vmem:[#allocation45_spill] sm:$0xff]  ;;  %v8651_v36 = vld [vmem:[#allocation46_spill] sm:$0xff] }
 0x1f7   :  { %4319 = vmatpush1.bf16.msra.mxu0 %v8641_v40  ;;  %4383 = vmatpush1.bf16.msra.mxu1 %v8642_v41  ;;  %v8652_v40 = vld [vmem:[#allocation47_spill] sm:$0xff]  ;;  %v8653_v41 = vld [vmem:[#allocation48_spill] sm:$0xff] }
 0x1f8   :  { %4321 = vmatprep.subr.bf16.mxu0 %v8643_v45  ;;  %4385 = vmatprep.subr.bf16.mxu1 %v8644_v52  ;;  %v8654_v45 = vld [vmem:[#allocation49_spill] sm:$0xff]  ;;  %v8655_v52 = vld [vmem:[#allocation50_spill] sm:$0xff] }
 0x1fb   :  { %4323 = vmatpush1.bf16.msra.mxu0 %v8645_v2  ;;  %4387 = vmatpush1.bf16.msra.mxu1 %v8646_v18  ;;  %v8656_v2 = vld [vmem:[#allocation51_spill] sm:$0xff]  ;;  %v8657_v18 = vld [vmem:[#allocation52_spill] sm:$0xff] }
 0x1fc   :  { %4325 = vmatprep.subr.bf16.mxu0 %v8647_v22  ;;  %4389 = vmatprep.subr.bf16.mxu1 %v8648_v27  ;;  %v8658_v22 = vld [vmem:[#allocation53_spill] sm:$0xff]  ;;  %v8659_v27 = vld [vmem:[#allocation54_spill] sm:$0xff] }
 0x1ff   :  { %4327 = vmatpush1.bf16.msra.mxu0 %v8649_v28  ;;  %4391 = vmatpush1.bf16.msra.mxu1 %v8650_v32  ;;  %v8660_v28 = vld [vmem:[#allocation55_spill] sm:$0xff]  ;;  %v8661_v32 = vld [vmem:[#allocation56_spill] sm:$0xff] }
 0x200   :  { %4329 = vmatprep.subr.bf16.mxu0 %v8651_v36  ;;  %4393 = vmatprep.subr.bf16.mxu1 %v8652_v40  ;;  %v8662_v36 = vld [vmem:[#allocation57_spill] sm:$0xff]  ;;  %v8663_v40 = vld [vmem:[#allocation58_spill] sm:$0xff] }
 0x203   :  { %4331 = vmatpush1.bf16.msra.mxu0 %v8653_v41  ;;  %4395 = vmatpush1.bf16.msra.mxu1 %v8654_v45  ;;  %v8664_v41 = vld [vmem:[#allocation59_spill] sm:$0xff]  ;;  %v8665_v45 = vld [vmem:[#allocation60_spill] sm:$0xff] }
 0x204   :  { %4333 = vmatprep.subr.bf16.mxu0 %v8655_v52  ;;  %4397 = vmatprep.subr.bf16.mxu1 %v8656_v2  ;;  %v8666_v52 = vld [vmem:[#allocation61_spill] sm:$0xff]  ;;  %v8667_v2 = vld [vmem:[#allocation62_spill] sm:$0xff] }
 0x207   :  { %4335 = vmatpush1.bf16.msra.mxu0 %v8657_v18  ;;  %4399 = vmatpush1.bf16.msra.mxu1 %v8658_v22  ;;  %v8668_v18 = vld [vmem:[#allocation63_spill] sm:$0xff]  ;;  %v8669_v22 = vld [vmem:[#allocation64_spill] sm:$0xff] }
 0x208   :  { %4337 = vmatprep.subr.bf16.mxu0 %v8659_v27  ;;  %4401 = vmatprep.subr.bf16.mxu1 %v8660_v28  ;;  %v8670_v27 = vld [vmem:[#allocation65_spill] sm:$0xff]  ;;  %v8671_v28 = vld [vmem:[#allocation66_spill] sm:$0xff] }
 0x20b   :  { %4339 = vmatpush1.bf16.msra.mxu0 %v8661_v32  ;;  %4403 = vmatpush1.bf16.msra.mxu1 %v8662_v36  ;;  %v8672_v32 = vld [vmem:[#allocation67_spill] sm:$0xff]  ;;  %v8673_v36 = vld [vmem:[#allocation68_spill] sm:$0xff] }
 0x20c   :  { %4341 = vmatprep.subr.bf16.mxu0 %v8663_v40  ;;  %4405 = vmatprep.subr.bf16.mxu1 %v8664_v41  ;;  %v8674_v40 = vld [vmem:[#allocation69_spill] sm:$0xff]  ;;  %v8675_v41 = vld [vmem:[#allocation70_spill] sm:$0xff] }
 0x20f   :  { %4343 = vmatpush1.bf16.msra.mxu0 %v8665_v45  ;;  %4407 = vmatpush1.bf16.msra.mxu1 %v8666_v52  ;;  %v8676_v45 = vld [vmem:[#allocation71_spill] sm:$0xff]  ;;  %v8677_v52 = vld [vmem:[#allocation72_spill] sm:$0xff] }
 0x210   :  { %4345 = vmatprep.subr.bf16.mxu0 %v8667_v2  ;;  %4409 = vmatprep.subr.bf16.mxu1 %v8668_v18  ;;  %v8678_v2 = vld [vmem:[#allocation73_spill] sm:$0xff]  ;;  %v8679_v18 = vld [vmem:[#allocation74_spill] sm:$0xff] }
 0x213   :  { %4347 = vmatpush1.bf16.msra.mxu0 %v8669_v22  ;;  %4411 = vmatpush1.bf16.msra.mxu1 %v8670_v27  ;;  %v8680_v22 = vld [vmem:[#allocation75_spill] sm:$0xff]  ;;  %v8681_v27 = vld [vmem:[#allocation76_spill] sm:$0xff] }
 0x214   :  { %4349 = vmatprep.subr.bf16.mxu0 %v8671_v28  ;;  %4413 = vmatprep.subr.bf16.mxu1 %v8672_v32  ;;  %v8682_v28 = vld [vmem:[#allocation77_spill] sm:$0xff]  ;;  %v8683_v32 = vld [vmem:[#allocation78_spill] sm:$0xff] }
 0x217   :  { %4351 = vmatpush1.bf16.msra.mxu0 %v8673_v36  ;;  %4415 = vmatpush1.bf16.msra.mxu1 %v8674_v40  ;;  %v8684_v36 = vld [vmem:[#allocation79_spill] sm:$0xff] }
 0x218   :  { %4353 = vmatprep.subr.bf16.mxu0 %v8675_v41  ;;  %4417 = vmatprep.subr.bf16.mxu1 %v8676_v45 }
 0x21b   :  { %4355 = vmatpush1.bf16.msra.mxu0 %v8677_v52  ;;  %4419 = vmatpush1.bf16.msra.mxu1 %v8678_v2  ;;  %v249_v52 = vpop.permute.xlu1 %248  ;;  %v187_v2 = vmul.f32 %v8685_v9, %v73_v13 }
 0x21c   :  { %4357 = vmatprep.subr.bf16.mxu0 %v8679_v18  ;;  %4421 = vmatprep.subr.bf16.mxu1 %v8680_v22  ;;  %v355_v18 = vmul.f32 %v8686_v8, %v249_v52  ;;  %v189_v22 = vmul.f32 %v8687_v4, %v73_v13  ;;  %v358_v51 = vmul.f32 %v8692_v26, %v249_v52 }
 0x21e   :  { %v419_v49 = vadd.f32 %v355_v18, %v187_v2  ;;  %v191_v18 = vmul.f32 %v6932_v54, %v73_v13 }
 0x21f   :  { %4359 = vmatpush1.bf16.msra.mxu0 %v8681_v27  ;;  %4423 = vmatpush1.bf16.msra.mxu1 %v8682_v28  ;;  %v357_v27 = vmul.f32 %v8688_v7, %v249_v52  ;;  %v188_v28 = vmul.f32 %v8689_v11, %v73_v13 }
 0x220   :  { %4425 = vmatprep.subr.bf16.mxu0 %v8683_v32  ;;  %4489 = vmatprep.subr.bf16.mxu1 %v8684_v36  ;;  %v356_v32 = vmul.f32 %v8690_v23, %v249_v52  ;;  %v190_v36 = vmul.f32 %v8691_v34, %v73_v13  ;;  %v525_v9 = vadd.f32 %v6902_v3, %v419_v49 }
 0x221   :  { %v421_v44 = vadd.f32 %v357_v27, %v189_v22  ;;  %v359_v22 = vmul.f32 %v6935_v58, %v249_v52  ;;  %v193_v27 = vmul.f32 %v6938_v48, %v73_v13 }
 0x222   :  { %v420_v47 = vadd.f32 %v356_v32, %v188_v28  ;;  %v422_v35 = vadd.f32 %v358_v51, %v190_v36  ;;  %v361_v28 = vmul.f32 %v6941_v53, %v249_v52  ;;  %v194_v36 = vmul.f32 %v6950_v12, %v73_v13 }
 0x223   :  { %v527_v8 = vadd.f32 %v6906_v21, %v421_v44 }
 0x224   :  { %v526_v4 = vadd.f32 %v6910_v19, %v420_v47  ;;  %v528_v7 = vadd.f32 %v6914_v14, %v422_v35  ;;  %v423_v35 = vadd.f32 %v359_v22, %v191_v18  ;;  %v425_v47 = vadd.f32 %v361_v28, %v193_v27 }
 0x275   :  { %v1243_v40 = vpop.f32.mrb[4].mxu0  ;;  %v1314_v41 = vpop.f32.mrb[4].mxu1 }
 0x276   :  { %v1245_v17 = vpop.f32.mrb[5].mxu0  ;;  %v1316_v45 = vpop.f32.mrb[5].mxu1  ;;  %v1461_v33 = vadd.f32 %v1243_v40, %v525_v9  ;;  %v1463_v11 = vadd.f32 %v1314_v41, %v527_v8  ;;  %v8693_v8 = vld [vmem:[#allocation152_spill] sm:$0xff]  ;;  %v8695_v40 = vld [vmem:[#allocation154_spill] sm:$0xff] }
 0x277   :  { %v1462_v42 = vadd.f32 %v1245_v17, %v526_v4  ;;  %v1464_v23 = vadd.f32 %v1316_v45, %v528_v7  ;;  %v192_v4 = vmul.f32 %v8693_v8, %v73_v13  ;;  %v8694_v17 = vld [vmem:[#allocation153_spill] sm:$0xff]  ;;  %v362_v41 = vmul.f32 %v8695_v40, %v249_v52 }
 0x278   :  { %v3742_v5 = vmul.f32 -1.442695, %v1461_v33  ;;  %v3744_v34 = vmul.f32 -1.442695, %v1463_v11  ;;  %v360_v32 = vmul.f32 %v8694_v17, %v249_v52  ;;  %v529_v11 = vadd.f32 %v6973_v24, %v423_v35 }
 0x279   :  { %v3743_v0 = vmul.f32 -1.442695, %v1462_v42  ;;  %v3745_v26 = vmul.f32 -1.442695, %v1464_v23  ;;  %v531_v7 = vadd.f32 %v6977_v31, %v425_v47 }
 0x27a   :  { %5944 = vpow2.f32 %v3742_v5  ;;  %v424_v49 = vadd.f32 %v360_v32, %v192_v4 }
 0x27b   :  { %5946 = vpow2.f32 %v3744_v34 }
 0x27c   :  { %5948 = vpow2.f32 %v3743_v0  ;;  %v530_v52 = vadd.f32 %v6981_v63, %v424_v49 }
 0x27d   :  { %5950 = vpow2.f32 %v3745_v26  ;;  %v426_v26 = vadd.f32 %v362_v41, %v194_v36 }
 0x27f   :  { %v532_v42 = vadd.f32 %v6985_v62, %v426_v26 }
 0x284   :  { %v5945_v9 = vpop.eup %5944 }
 0x285   :  { %v5947_v45 = vpop.eup %5946  ;;  %v1475_v51 = vadd.f32 1.0, %v5945_v9 }
 0x286   :  { %v5949_v33 = vpop.eup %5948  ;;  %v1487_v44 = vadd.f32 1.0, %v5947_v45 }
 0x287   :  { %v5951_v5 = vpop.eup %5950  ;;  %v1476_v34 = vadd.f32 1.0, %v5949_v33  ;;  %5952 = vrcp.f32 %v1475_v51 }
 0x288   :  { %v1488_v23 = vadd.f32 1.0, %v5951_v5  ;;  %5954 = vrcp.f32 %v1487_v44 }
 0x289   :  { %5956 = vrcp.f32 %v1476_v34 }
 0x28a   :  { %5958 = vrcp.f32 %v1488_v23 }
 0x291   :  { %v5953_v36 = vpop.eup %5952 }
 0x292   :  { %v5955_v41 = vpop.eup %5954 }
 0x293   :  { %v5957_v45 = vpop.eup %5956  ;;  %v1507_v35 = vmul.f32 %v5955_v41, %v6991_v46  ;;  %v8704_v41 = vld [vmem:[#allocation97_spill] sm:$0xff] }
 0x294   :  { %v5959_v33 = vpop.eup %5958 }
 0x295   :  { %v1508_v49 = vmul.f32 %v5959_v33, %v6993_v6  ;;  %v8706_v33 = vld [vmem:[#allocation99_spill] sm:$0xff] }
 0x2b5   :  { %v1385_v13 = vpop.f32.mrb[6].mxu0  ;;  %v1456_v0 = vpop.f32.mrb[6].mxu1 }
 0x2b6   :  { %v1465_v2 = vadd.f32 %v1385_v13, %v529_v11  ;;  %v1467_v18 = vadd.f32 %v1456_v0, %v531_v7  ;;  %v1387_v22 = vpop.f32.mrb[7].mxu0  ;;  %v1458_v27 = vpop.f32.mrb[7].mxu1 }
 0x2b7   :  { %v1466_v28 = vadd.f32 %v1387_v22, %v530_v52  ;;  %v1468_v9 = vadd.f32 %v1458_v27, %v532_v42  ;;  %v8697_v22 = vld [vmem:[#allocation90_spill] sm:$0xff]  ;;  %v8698_v27 = vld [vmem:[#allocation91_spill] sm:$0xff] }
 0x2b8   :  { %5960 = vtanh.f32 %v1465_v2  ;;  %v3746_v4 = vmul.f32 -1.442695, %v1467_v18  ;;  %v8696_v18 = vld [vmem:[#allocation89_spill] sm:$0xff] }
 0x2b9   :  { %5962 = vtanh.f32 %v1466_v28  ;;  %v3747_v32 = vmul.f32 -1.442695, %v1468_v9  ;;  %v8699_v28 = vld [vmem:[#allocation92_spill] sm:$0xff]  ;;  %v8700_v9 = vld [vmem:[#allocation93_spill] sm:$0xff] }
 0x2ba   :  { %5964 = vpow2.f32 %v3746_v4  ;;  %v8701_v4 = vld [vmem:[#allocation94_spill] sm:$0xff] }
 0x2bb   :  { %5966 = vpow2.f32 %v3747_v32  ;;  %v8702_v32 = vld [vmem:[#allocation95_spill] sm:$0xff] }
 0x2c2   :  { %v5961_v5 = vpop.eup %5960 }
 0x2c3   :  { %v5963_v51 = vpop.eup %5962  ;;  %v1509_v47 = vmul.f32 %v5961_v5, %v5953_v36  ;;  %v8703_v36 = vld [vmem:[#allocation96_spill] sm:$0xff] }
 0x2c4   :  { %v5965_v44 = vpop.eup %5964  ;;  %v1510_v26 = vmul.f32 %v5963_v51, %v5957_v45  ;;  %v8705_v45 = vld [vmem:[#allocation98_spill] sm:$0xff]  ;;  %v8707_v5 = vld [vmem:[#allocation100_spill] sm:$0xff]  ;;  %v8708_v51 = vld [vmem:[#allocation101_spill] sm:$0xff] }
 0x2c5   :  { %v5967_v34 = vpop.eup %5966  ;;  %v7157_v23 = vadd.f32 %v1509_v47, %v1507_v35  ;;  %v1501_v11 = vadd.f32 1.0, %v5965_v44  ;;  %v8709_v35 = vld [vmem:[#allocation102_spill] sm:$0xff]  ;;  %v8710_v47 = vld [vmem:[#allocation103_spill] sm:$0xff]  ;;  %v8711_v44 = vld [vmem:[#allocation104_spill] sm:$0xff] }
 0x2c6   :  { %v7159_v7 = vadd.f32 %v1510_v26, %v1508_v49  ;;  %v1502_v13 = vadd.f32 1.0, %v5967_v34  ;;  %v8712_v49 = vld [vmem:[#allocation105_spill] sm:$0xff]  ;;  %v8713_v26 = vld [vmem:[#allocation106_spill] sm:$0xff]  ;;  %v8714_v34 = vld [vmem:[#allocation107_spill] sm:$0xff] }
 0x2c7   :  { %5968 = vtanh.f32 %v7157_v23 }
 0x2c8   :  { %5970 = vrcp.f32 %v1501_v11  ;;  %v8715_v11 = vld [vmem:[#allocation108_spill] sm:$0xff] }
 0x2c9   :  { %5972 = vtanh.f32 %v7159_v7 }
 0x2ca   :  { %5974 = vrcp.f32 %v1502_v13  ;;  %v8716_v13 = vld [vmem:[#allocation109_spill] sm:$0xff] }
 0x2d1   :  { %v5969_v0 = vpop.eup %5968 }
 0x2d2   :  { %v5971_v46 = vpop.eup %5970 }
 0x2d3   :  { %v5973_v52 = vpop.eup %5972  ;;  %v7163_v6 = vmul.f32 %v5971_v46, %v5969_v0  ;;  %v8717_v0 = vld [vmem:[#allocation110_spill] sm:$0xff]  ;;  %v8718_v46 = vld [vmem:[#allocation111_spill] sm:$0xff] }
 0x2d4   :  { %v5975_v42 = vpop.eup %5974 }
 0x2d5   :  { %v1516_v2 = vmul.f32 %v5975_v42, %v5973_v52  ;;  %v8719_v52 = vld [vmem:[#allocation112_spill] sm:$0xff]  ;;  %v8720_v42 = vld [vmem:[#allocation113_spill] sm:$0xff] }
 0x2d7   :  { %1581 = vmatprep.mubr.f32.mxu0 %v1516_v2  ;;  %1652 = vmatprep.mubr.f32.mxu1 %v1516_v2 }
 0x2d8   :  { %1582 = vmatmul.mubr.f32.vlgmr.msra.gmra.mrb[8].mxu0 %v7163_v6  ;;  %1653 = vmatmul.mubr.f32.vlgmr.msra.gmra.mrb[8].mxu1 %v7163_v6 }
 0x2d9   :  { %4427 = vmatpush1.bf16.msra.mxu0 %v8585_v25  ;;  %4491 = vmatpush1.bf16.msra.mxu1 %v8586_v59 }
 0x2da   :  { %1723 = vmatprep.mubr.f32.mxu0 %v1516_v2  ;;  %1794 = vmatprep.mubr.f32.mxu1 %v1516_v2  ;;  %v8721_v2 = vld [vmem:[#allocation115_spill] sm:$0xff] }
 0x2db   :  { %4429 = vmatprep.subr.bf16.mxu0 %v8587_v29  ;;  %4493 = vmatprep.subr.bf16.mxu1 %v8588_v50 }
 0x2dd   :  { %4431 = vmatpush1.bf16.msra.mxu0 %v8589_v43  ;;  %4495 = vmatpush1.bf16.msra.mxu1 %v8590_v1 }
 0x2de   :  { %4433 = vmatprep.subr.bf16.mxu0 %v8591_v60  ;;  %4497 = vmatprep.subr.bf16.mxu1 %v8592_v37 }
 0x2e1   :  { %4435 = vmatpush1.bf16.msra.mxu0 %v8593_v16  ;;  %4499 = vmatpush1.bf16.msra.mxu1 %v8696_v18 }
 0x2e2   :  { %4437 = vmatprep.subr.bf16.mxu0 %v8697_v22  ;;  %4501 = vmatprep.subr.bf16.mxu1 %v8698_v27 }
 0x2e5   :  { %4439 = vmatpush1.bf16.msra.mxu0 %v8699_v28  ;;  %4503 = vmatpush1.bf16.msra.mxu1 %v8700_v9 }
 0x2e6   :  { %4441 = vmatprep.subr.bf16.mxu0 %v8701_v4  ;;  %4505 = vmatprep.subr.bf16.mxu1 %v8702_v32 }
 0x2e9   :  { %4443 = vmatpush1.bf16.msra.mxu0 %v8703_v36  ;;  %4507 = vmatpush1.bf16.msra.mxu1 %v8704_v41 }
 0x2ea   :  { %4445 = vmatprep.subr.bf16.mxu0 %v8705_v45  ;;  %4509 = vmatprep.subr.bf16.mxu1 %v8706_v33 }
 0x2ed   :  { %4447 = vmatpush1.bf16.msra.mxu0 %v8707_v5  ;;  %4511 = vmatpush1.bf16.msra.mxu1 %v8708_v51 }
 0x2ee   :  { %4449 = vmatprep.subr.bf16.mxu0 %v8709_v35  ;;  %4513 = vmatprep.subr.bf16.mxu1 %v8710_v47 }
 0x2f1   :  { %4451 = vmatpush1.bf16.msra.mxu0 %v8711_v44  ;;  %4515 = vmatpush1.bf16.msra.mxu1 %v8712_v49  ;;  %v8722_v49 = vld [vmem:[#allocation116_spill] sm:$0xff] }
 0x2f2   :  { %4453 = vmatprep.subr.bf16.mxu0 %v8713_v26  ;;  %4517 = vmatprep.subr.bf16.mxu1 %v8714_v34  ;;  %v8723_v26 = vld [vmem:[#allocation117_spill] sm:$0xff]  ;;  %v8812_v34 = vld [vmem:[#allocation151_spill] sm:$0xff] }
 0x2f5   :  { %4455 = vmatpush1.bf16.msra.mxu0 %v8715_v11  ;;  %4519 = vmatpush1.bf16.msra.mxu1 %v8716_v13  ;;  %v8724_v11 = vld [vmem:[#allocation119_spill] sm:$0xff]  ;;  %v8811_v13 = vld [vmem:[#allocation150_spill] sm:$0xff] }
 0x2f6   :  { %4457 = vmatprep.subr.bf16.mxu0 %v8717_v0  ;;  %4521 = vmatprep.subr.bf16.mxu1 %v8718_v46  ;;  %v8809_v46 = vld [vmem:[#allocation148_spill] sm:$0xff]  ;;  %v8810_v0 = vld [vmem:[#allocation149_spill] sm:$0xff] }
 0x2f9   :  { %4459 = vmatpush1.bf16.msra.mxu0 %v8719_v52  ;;  %4523 = vmatpush1.bf16.msra.mxu1 %v8720_v42  ;;  %v8807_v42 = vld [vmem:[#allocation146_spill] sm:$0xff]  ;;  %v8808_v52 = vld [vmem:[#allocation147_spill] sm:$0xff] }
 0x2fa   :  { %4461 = vmatprep.subr.bf16.mxu0 %v8619_v39  ;;  %4525 = vmatprep.subr.bf16.mxu1 %v8721_v2  ;;  %v8805_v2 = vld [vmem:[#allocation144_spill] sm:$0xff]  ;;  %v8806_v39 = vld [vmem:[#allocation145_spill] sm:$0xff] }
 0x2fd   :  { %4463 = vmatpush1.bf16.msra.mxu0 %v8722_v49  ;;  %4527 = vmatpush1.bf16.msra.mxu1 %v8723_v26  ;;  %v8725_v26 = vld [vmem:[#allocation128_spill] sm:$0xff]  ;;  %v78_v49 = vpop.permute.xlu1 %77 }
 0x2fe   :  { %4465 = vmatprep.subr.bf16.mxu0 %v8623_v10  ;;  %4529 = vmatprep.subr.bf16.mxu1 %v8724_v11  ;;  %v8726_v10 = vld [vmem:[#allocation129_spill] sm:$0xff]  ;;  %v8727_v11 = vld [vmem:[#allocation130_spill] sm:$0xff] }
 0x301   :  { %4467 = vmatpush1.bf16.msra.mxu0 %v8625_v56  ;;  %4531 = vmatpush1.bf16.msra.mxu1 %v8626_v20  ;;  %v8728_v56 = vld [vmem:[#allocation131_spill] sm:$0xff]  ;;  %v8729_v20 = vld [vmem:[#allocation132_spill] sm:$0xff] }
 0x302   :  { %4469 = vmatprep.subr.bf16.mxu0 %v8627_v61  ;;  %4533 = vmatprep.subr.bf16.mxu1 %v8628_v55  ;;  %v8730_v61 = vld [vmem:[#allocation133_spill] sm:$0xff]  ;;  %v8731_v55 = vld [vmem:[#allocation134_spill] sm:$0xff] }
 0x305   :  { %4471 = vmatpush1.bf16.msra.mxu0 %v8629_v15  ;;  %4535 = vmatpush1.bf16.msra.mxu1 %v6700_v30  ;;  %v8732_v15 = vld [vmem:[#allocation135_spill] sm:$0xff]  ;;  %v8733_v30 = vld [vmem:[#allocation136_spill] sm:$0xff] }
 0x306   :  { %4473 = vmatprep.subr.bf16.mxu0 %v8630_v57  ;;  %4537 = vmatprep.subr.bf16.mxu1 %v8631_v38  ;;  %v8734_v57 = vld [vmem:[#allocation137_spill] sm:$0xff]  ;;  %v8735_v38 = vld [vmem:[#allocation138_spill] sm:$0xff] }
 0x309   :  { %4475 = vmatpush1.bf16.msra.mxu0 %v8725_v26  ;;  %4539 = vmatpush1.bf16.msra.mxu1 %v8726_v10  ;;  %v8736_v26 = vld [vmem:[#allocation139_spill] sm:$0xff]  ;;  %v8737_v10 = vld [vmem:[#allocation140_spill] sm:$0xff] }
 0x30a   :  { %4477 = vmatprep.subr.bf16.mxu0 %v8727_v11  ;;  %4541 = vmatprep.subr.bf16.mxu1 %v8728_v56  ;;  %v8738_v11 = vld [vmem:[#allocation141_spill] sm:$0xff]  ;;  %v8739_v56 = vld [vmem:[#allocation14_spill] sm:$0xff] }
 0x30d   :  { %4479 = vmatpush1.bf16.msra.mxu0 %v8729_v20  ;;  %4543 = vmatpush1.bf16.msra.mxu1 %v8730_v61  ;;  %v8740_v20 = vld [vmem:[#allocation15_spill] sm:$0xff] }
 0x30e   :  { %4481 = vmatprep.subr.bf16.mxu0 %v8731_v55  ;;  %4545 = vmatprep.subr.bf16.mxu1 %v8732_v15  ;;  %v8741_v15 = vld [vmem:[#allocation16_spill] sm:$0xff]  ;;  %v8750_v55 = vld [vmem:[#allocation25_spill] sm:$0xff] }
 0x311   :  { %4483 = vmatpush1.bf16.msra.mxu0 %v8733_v30  ;;  %4547 = vmatpush1.bf16.msra.mxu1 %v8734_v57  ;;  %v8742_v30 = vld [vmem:[#allocation17_spill] sm:$0xff]  ;;  %v8743_v57 = vld [vmem:[#allocation18_spill] sm:$0xff] }
 0x312   :  { %4485 = vmatprep.subr.bf16.mxu0 %v8735_v38  ;;  %4549 = vmatprep.subr.bf16.mxu1 %v8736_v26  ;;  %v8744_v38 = vld [vmem:[#allocation19_spill] sm:$0xff]  ;;  %v8745_v26 = vld [vmem:[#allocation20_spill] sm:$0xff] }
 0x315   :  { %4487 = vmatpush1.bf16.msra.mxu0 %v8737_v10  ;;  %4551 = vmatpush1.bf16.msra.mxu1 %v8738_v11  ;;  %v8746_v10 = vld [vmem:[#allocation21_spill] sm:$0xff]  ;;  %v8747_v11 = vld [vmem:[#allocation22_spill] sm:$0xff] }
 0x316   :  { %4553 = vmatprep.subr.bf16.mxu0 %v8739_v56  ;;  %4617 = vmatprep.subr.bf16.mxu1 %v8740_v20  ;;  %v8748_v56 = vld [vmem:[#allocation23_spill] sm:$0xff]  ;;  %v8749_v20 = vld [vmem:[#allocation24_spill] sm:$0xff] }
 0x318   :  { %1724 = vmatmul.mubr.f32.vlgmr.msra.gmra.mrb[10].mxu0 %v7163_v6  ;;  %1795 = vmatmul.mubr.f32.vlgmr.msra.gmra.mrb[10].mxu1 %v7163_v6  ;;  %v8751_v6 = vld [vmem:[#allocation26_spill] sm:$0xff] }
 0x319   :  { %4555 = vmatpush1.bf16.msra.mxu0 %v8741_v15  ;;  %4619 = vmatpush1.bf16.msra.mxu1 %v8742_v30  ;;  %v8752_v15 = vld [vmem:[#allocation27_spill] sm:$0xff]  ;;  %v8753_v30 = vld [vmem:[#allocation28_spill] sm:$0xff] }
 0x31a   :  { %4557 = vmatprep.subr.bf16.mxu0 %v8743_v57  ;;  %4621 = vmatprep.subr.bf16.mxu1 %v8744_v38  ;;  %v8754_v57 = vld [vmem:[#allocation29_spill] sm:$0xff]  ;;  %v8755_v38 = vld [vmem:[#allocation30_spill] sm:$0xff] }
 0x31d   :  { %4559 = vmatpush1.bf16.msra.mxu0 %v8745_v26  ;;  %4623 = vmatpush1.bf16.msra.mxu1 %v8746_v10  ;;  %v8756_v26 = vld [vmem:[#allocation31_spill] sm:$0xff]  ;;  %v8757_v10 = vld [vmem:[#allocation32_spill] sm:$0xff] }
 0x31e   :  { %4561 = vmatprep.subr.bf16.mxu0 %v8747_v11  ;;  %4625 = vmatprep.subr.bf16.mxu1 %v8748_v56  ;;  %v8758_v11 = vld [vmem:[#allocation33_spill] sm:$0xff]  ;;  %v8759_v56 = vld [vmem:[#allocation34_spill] sm:$0xff] }
 0x321   :  { %4563 = vmatpush1.bf16.msra.mxu0 %v8749_v20  ;;  %4627 = vmatpush1.bf16.msra.mxu1 %v8750_v55  ;;  %v8760_v20 = vld [vmem:[#allocation35_spill] sm:$0xff]  ;;  %v8761_v55 = vld [vmem:[#allocation36_spill] sm:$0xff] }
 0x322   :  { %4565 = vmatprep.subr.bf16.mxu0 %v8751_v6  ;;  %4629 = vmatprep.subr.bf16.mxu1 %v8752_v15  ;;  %v8762_v6 = vld [vmem:[#allocation37_spill] sm:$0xff]  ;;  %v8763_v15 = vld [vmem:[#allocation38_spill] sm:$0xff] }
 0x325   :  { %4567 = vmatpush1.bf16.msra.mxu0 %v8753_v30  ;;  %4631 = vmatpush1.bf16.msra.mxu1 %v8754_v57  ;;  %v8764_v30 = vld [vmem:[#allocation39_spill] sm:$0xff]  ;;  %v8765_v57 = vld [vmem:[#allocation40_spill] sm:$0xff] }
 0x326   :  { %4569 = vmatprep.subr.bf16.mxu0 %v8755_v38  ;;  %4633 = vmatprep.subr.bf16.mxu1 %v8756_v26  ;;  %v8766_v38 = vld [vmem:[#allocation41_spill] sm:$0xff]  ;;  %v8767_v26 = vld [vmem:[#allocation42_spill] sm:$0xff] }
 0x329   :  { %4571 = vmatpush1.bf16.msra.mxu0 %v8757_v10  ;;  %4635 = vmatpush1.bf16.msra.mxu1 %v8758_v11  ;;  %v8768_v10 = vld [vmem:[#allocation43_spill] sm:$0xff]  ;;  %v8769_v11 = vld [vmem:[#allocation44_spill] sm:$0xff] }
 0x32a   :  { %4573 = vmatprep.subr.bf16.mxu0 %v8759_v56  ;;  %4637 = vmatprep.subr.bf16.mxu1 %v8760_v20  ;;  %v8770_v56 = vld [vmem:[#allocation45_spill] sm:$0xff]  ;;  %v8771_v20 = vld [vmem:[#allocation46_spill] sm:$0xff] }
 0x32d   :  { %4575 = vmatpush1.bf16.msra.mxu0 %v8761_v55  ;;  %4639 = vmatpush1.bf16.msra.mxu1 %v8762_v6  ;;  %v8772_v55 = vld [vmem:[#allocation47_spill] sm:$0xff]  ;;  %v8773_v6 = vld [vmem:[#allocation48_spill] sm:$0xff] }
 0x32e   :  { %4577 = vmatprep.subr.bf16.mxu0 %v8763_v15  ;;  %4641 = vmatprep.subr.bf16.mxu1 %v8764_v30  ;;  %v8774_v15 = vld [vmem:[#allocation49_spill] sm:$0xff]  ;;  %v8775_v30 = vld [vmem:[#allocation50_spill] sm:$0xff] }
 0x331   :  { %4579 = vmatpush1.bf16.msra.mxu0 %v8765_v57  ;;  %4643 = vmatpush1.bf16.msra.mxu1 %v8766_v38  ;;  %v8776_v57 = vld [vmem:[#allocation51_spill] sm:$0xff]  ;;  %v8777_v38 = vld [vmem:[#allocation52_spill] sm:$0xff] }
 0x332   :  { %4581 = vmatprep.subr.bf16.mxu0 %v8767_v26  ;;  %4645 = vmatprep.subr.bf16.mxu1 %v8768_v10  ;;  %v8778_v26 = vld [vmem:[#allocation53_spill] sm:$0xff]  ;;  %v8779_v10 = vld [vmem:[#allocation54_spill] sm:$0xff] }
 0x335   :  { %4583 = vmatpush1.bf16.msra.mxu0 %v8769_v11  ;;  %4647 = vmatpush1.bf16.msra.mxu1 %v8770_v56  ;;  %v8780_v11 = vld [vmem:[#allocation55_spill] sm:$0xff]  ;;  %v8781_v56 = vld [vmem:[#allocation56_spill] sm:$0xff] }
 0x336   :  { %4585 = vmatprep.subr.bf16.mxu0 %v8771_v20  ;;  %4649 = vmatprep.subr.bf16.mxu1 %v8772_v55  ;;  %v8782_v20 = vld [vmem:[#allocation57_spill] sm:$0xff]  ;;  %v8783_v55 = vld [vmem:[#allocation58_spill] sm:$0xff] }
 0x339   :  { %4587 = vmatpush1.bf16.msra.mxu0 %v8773_v6  ;;  %4651 = vmatpush1.bf16.msra.mxu1 %v8774_v15  ;;  %v8784_v6 = vld [vmem:[#allocation59_spill] sm:$0xff]  ;;  %v8785_v15 = vld [vmem:[#allocation60_spill] sm:$0xff] }
 0x33a   :  { %4589 = vmatprep.subr.bf16.mxu0 %v8775_v30  ;;  %4653 = vmatprep.subr.bf16.mxu1 %v8776_v57  ;;  %v8786_v30 = vld [vmem:[#allocation61_spill] sm:$0xff]  ;;  %v8787_v57 = vld [vmem:[#allocation62_spill] sm:$0xff] }
 0x33d   :  { %4591 = vmatpush1.bf16.msra.mxu0 %v8777_v38  ;;  %4655 = vmatpush1.bf16.msra.mxu1 %v8778_v26  ;;  %v8788_v38 = vld [vmem:[#allocation63_spill] sm:$0xff]  ;;  %v8789_v26 = vld [vmem:[#allocation64_spill] sm:$0xff] }
 0x33e   :  { %4593 = vmatprep.subr.bf16.mxu0 %v8779_v10  ;;  %4657 = vmatprep.subr.bf16.mxu1 %v8780_v11  ;;  %v8790_v10 = vld [vmem:[#allocation65_spill] sm:$0xff]  ;;  %v8791_v11 = vld [vmem:[#allocation66_spill] sm:$0xff] }
 0x341   :  { %4595 = vmatpush1.bf16.msra.mxu0 %v8781_v56  ;;  %4659 = vmatpush1.bf16.msra.mxu1 %v8782_v20  ;;  %v8792_v56 = vld [vmem:[#allocation67_spill] sm:$0xff]  ;;  %v8793_v20 = vld [vmem:[#allocation68_spill] sm:$0xff] }
 0x342   :  { %4597 = vmatprep.subr.bf16.mxu0 %v8783_v55  ;;  %4661 = vmatprep.subr.bf16.mxu1 %v8784_v6  ;;  %v8794_v55 = vld [vmem:[#allocation69_spill] sm:$0xff]  ;;  %v8795_v6 = vld [vmem:[#allocation70_spill] sm:$0xff] }
 0x345   :  { %4599 = vmatpush1.bf16.msra.mxu0 %v8785_v15  ;;  %4663 = vmatpush1.bf16.msra.mxu1 %v8786_v30  ;;  %v8796_v15 = vld [vmem:[#allocation71_spill] sm:$0xff]  ;;  %v8797_v30 = vld [vmem:[#allocation72_spill] sm:$0xff] }
 0x346   :  { %4601 = vmatprep.subr.bf16.mxu0 %v8787_v57  ;;  %4665 = vmatprep.subr.bf16.mxu1 %v8788_v38  ;;  %v8798_v57 = vld [vmem:[#allocation73_spill] sm:$0xff]  ;;  %v8799_v38 = vld [vmem:[#allocation74_spill] sm:$0xff] }
 0x349   :  { %4603 = vmatpush1.bf16.msra.mxu0 %v8789_v26  ;;  %4667 = vmatpush1.bf16.msra.mxu1 %v8790_v10  ;;  %v8800_v26 = vld [vmem:[#allocation75_spill] sm:$0xff]  ;;  %v8801_v10 = vld [vmem:[#allocation76_spill] sm:$0xff] }
 0x34a   :  { %4605 = vmatprep.subr.bf16.mxu0 %v8791_v11  ;;  %4669 = vmatprep.subr.bf16.mxu1 %v8792_v56  ;;  %v8802_v11 = vld [vmem:[#allocation77_spill] sm:$0xff]  ;;  %v8803_v56 = vld [vmem:[#allocation78_spill] sm:$0xff] }
 0x34d   :  { %4607 = vmatpush1.bf16.msra.mxu0 %v8793_v20  ;;  %4671 = vmatpush1.bf16.msra.mxu1 %v8794_v55  ;;  %v8804_v20 = vld [vmem:[#allocation79_spill] sm:$0xff] }
 0x34e   :  { %4609 = vmatprep.subr.bf16.mxu0 %v8795_v6  ;;  %4673 = vmatprep.subr.bf16.mxu1 %v8796_v15 }
 0x351   :  { %4611 = vmatpush1.bf16.msra.mxu0 %v8797_v30  ;;  %4675 = vmatpush1.bf16.msra.mxu1 %v8798_v57  ;;  %v253_v30 = vpop.permute.xlu0 %252  ;;  %v195_v57 = vmul.f32 %v8805_v2, %v78_v49 }
 0x352   :  { %4613 = vmatprep.subr.bf16.mxu0 %v8799_v38  ;;  %4677 = vmatprep.subr.bf16.mxu1 %v8800_v26  ;;  %v363_v38 = vmul.f32 %v8806_v39, %v253_v30  ;;  %v197_v26 = vmul.f32 %v8807_v42, %v78_v49  ;;  %v366_v44 = vmul.f32 %v8812_v34, %v253_v30 }
 0x354   :  { %v427_v47 = vadd.f32 %v363_v38, %v195_v57  ;;  %v199_v57 = vmul.f32 %v6932_v54, %v78_v49  ;;  %v367_v38 = vmul.f32 %v6935_v58, %v253_v30 }
 0x355   :  { %4615 = vmatpush1.bf16.msra.mxu0 %v8801_v10  ;;  %4679 = vmatpush1.bf16.msra.mxu1 %v8802_v11  ;;  %v365_v10 = vmul.f32 %v8808_v52, %v253_v30  ;;  %v196_v11 = vmul.f32 %v8809_v46, %v78_v49 }
 0x356   :  { %4681 = vmatprep.subr.bf16.mxu0 %v8803_v56  ;;  %4745 = vmatprep.subr.bf16.mxu1 %v8804_v20  ;;  %v364_v56 = vmul.f32 %v8810_v0, %v253_v30  ;;  %v198_v20 = vmul.f32 %v8811_v13, %v78_v49  ;;  %v533_v2 = vadd.f32 %v6902_v3, %v427_v47 }
 0x357   :  { %v429_v35 = vadd.f32 %v365_v10, %v197_v26 }
 0x358   :  { %v428_v51 = vadd.f32 %v364_v56, %v196_v11  ;;  %v430_v5 = vadd.f32 %v366_v44, %v198_v20  ;;  %v202_v56 = vmul.f32 %v6950_v12, %v78_v49  ;;  %v370_v20 = vmul.f32 %v8695_v40, %v253_v30 }
 0x359   :  { %v535_v39 = vadd.f32 %v6906_v21, %v429_v35 }
 0x35a   :  { %v534_v42 = vadd.f32 %v6910_v19, %v428_v51  ;;  %v536_v46 = vadd.f32 %v6914_v14, %v430_v5  ;;  %v431_v5 = vadd.f32 %v367_v38, %v199_v57  ;;  %v434_v44 = vadd.f32 %v370_v20, %v202_v56 }
 0x35c   :  { %v537_v11 = vadd.f32 %v6973_v24, %v431_v5 }
 0x3ab   :  { %v1583_v55 = vpop.f32.mrb[8].mxu0  ;;  %v1654_v6 = vpop.f32.mrb[8].mxu1 }
 0x3ac   :  { %v1585_v61 = vpop.f32.mrb[9].mxu0  ;;  %v1656_v15 = vpop.f32.mrb[9].mxu1  ;;  %v1801_v33 = vadd.f32 %v1583_v55, %v533_v2  ;;  %v1803_v52 = vadd.f32 %v1654_v6, %v535_v39  ;;  %v201_v55 = vmul.f32 %v6938_v48, %v78_v49  ;;  %v369_v39 = vmul.f32 %v6941_v53, %v253_v30 }
 0x3ad   :  { %v1802_v45 = vadd.f32 %v1585_v61, %v534_v42  ;;  %v1804_v0 = vadd.f32 %v1656_v15, %v536_v46  ;;  %v200_v61 = vmul.f32 %v8693_v8, %v78_v49  ;;  %v368_v15 = vmul.f32 %v8694_v17, %v253_v30 }
 0x3ae   :  { %v3748_v41 = vmul.f32 -1.442695, %v1801_v33  ;;  %v3750_v13 = vmul.f32 -1.442695, %v1803_v52  ;;  %v433_v51 = vadd.f32 %v369_v39, %v201_v55  ;;  %v540_v46 = vadd.f32 %v6985_v62, %v434_v44 }
 0x3af   :  { %v3749_v36 = vmul.f32 -1.442695, %v1802_v45  ;;  %v3751_v34 = vmul.f32 -1.442695, %v1804_v0  ;;  %v432_v47 = vadd.f32 %v368_v15, %v200_v61 }
 0x3b0   :  { %5976 = vpow2.f32 %v3748_v41 }
 0x3b1   :  { %5978 = vpow2.f32 %v3750_v13  ;;  %v539_v13 = vadd.f32 %v6977_v31, %v433_v51  ;;  %v538_v30 = vadd.f32 %v6981_v63, %v432_v47 }
 0x3b2   :  { %5980 = vpow2.f32 %v3749_v36 }
 0x3b3   :  { %5982 = vpow2.f32 %v3751_v34 }
 0x3ba   :  { %v5977_v10 = vpop.eup %5976 }
 0x3bb   :  { %v5979_v41 = vpop.eup %5978  ;;  %v1815_v33 = vadd.f32 1.0, %v5977_v10 }
 0x3bc   :  { %v5981_v36 = vpop.eup %5980  ;;  %v1827_v35 = vadd.f32 1.0, %v5979_v41 }
 0x3bd   :  { %v5983_v45 = vpop.eup %5982  ;;  %v1816_v26 = vadd.f32 1.0, %v5981_v36  ;;  %5984 = vrcp.f32 %v1815_v33 }
 0x3be   :  { %v1828_v34 = vadd.f32 1.0, %v5983_v45  ;;  %5986 = vrcp.f32 %v1827_v35 }
 0x3bf   :  { %5988 = vrcp.f32 %v1816_v26 }
 0x3c0   :  { %5990 = vrcp.f32 %v1828_v34 }
 0x3c7   :  { %v5985_v10 = vpop.eup %5984 }
 0x3c8   :  { %v5987_v61 = vpop.eup %5986 }
 0x3c9   :  { %v5989_v15 = vpop.eup %5988  ;;  %v1847_v36 = vmul.f32 %v5987_v61, %v7157_v23  ;;  %v8824_v61 = vld [vmem:[#allocation107_spill] sm:$0xff] }
 0x3ca   :  { %v5991_v56 = vpop.eup %5990 }
 0x3cb   :  { %v1848_v5 = vmul.f32 %v5991_v56, %v7159_v7  ;;  %v8826_v56 = vld [vmem:[#allocation109_spill] sm:$0xff] }
 0x3eb   :  { %v1725_v49 = vpop.f32.mrb[10].mxu0  ;;  %v1796_v0 = vpop.f32.mrb[10].mxu1 }
 0x3ec   :  { %v1805_v52 = vadd.f32 %v1725_v49, %v537_v11  ;;  %v1807_v42 = vadd.f32 %v1796_v0, %v539_v13  ;;  %v1727_v2 = vpop.f32.mrb[11].mxu0  ;;  %v1798_v6 = vpop.f32.mrb[11].mxu1 }
 0x3ed   :  { %v1806_v57 = vadd.f32 %v1727_v2, %v538_v30  ;;  %v1808_v38 = vadd.f32 %v1798_v6, %v540_v46  ;;  %v8813_v30 = vld [vmem:[#allocation96_spill] sm:$0xff]  ;;  %v8814_v46 = vld [vmem:[#allocation97_spill] sm:$0xff] }
 0x3ee   :  { %5992 = vtanh.f32 %v1805_v52  ;;  %v3752_v55 = vmul.f32 -1.442695, %v1807_v42  ;;  %v8815_v52 = vld [vmem:[#allocation98_spill] sm:$0xff]  ;;  %v8816_v42 = vld [vmem:[#allocation99_spill] sm:$0xff]  ;;  %v8817_v2 = vld [vmem:[#allocation100_spill] sm:$0xff] }
 0x3ef   :  { %5994 = vtanh.f32 %v1806_v57  ;;  %v3753_v39 = vmul.f32 -1.442695, %v1808_v38  ;;  %v8818_v6 = vld [vmem:[#allocation101_spill] sm:$0xff]  ;;  %v8819_v57 = vld [vmem:[#allocation102_spill] sm:$0xff]  ;;  %v8820_v38 = vld [vmem:[#allocation103_spill] sm:$0xff] }
 0x3f0   :  { %5996 = vpow2.f32 %v3752_v55  ;;  %v8821_v55 = vld [vmem:[#allocation104_spill] sm:$0xff] }
 0x3f1   :  { %5998 = vpow2.f32 %v3753_v39  ;;  %v8822_v39 = vld [vmem:[#allocation105_spill] sm:$0xff] }
 0x3f8   :  { %v5993_v20 = vpop.eup %5992 }
 0x3f9   :  { %v5995_v41 = vpop.eup %5994  ;;  %v1849_v45 = vmul.f32 %v5993_v20, %v5985_v10  ;;  %v8823_v10 = vld [vmem:[#allocation106_spill] sm:$0xff] }
 0x3fa   :  { %v5997_v33 = vpop.eup %5996  ;;  %v1850_v51 = vmul.f32 %v5995_v41, %v5989_v15  ;;  %v8825_v15 = vld [vmem:[#allocation108_spill] sm:$0xff]  ;;  %v8827_v20 = vld [vmem:[#allocation110_spill] sm:$0xff]  ;;  %v8828_v41 = vld [vmem:[#allocation111_spill] sm:$0xff] }
 0x3fb   :  { %v5999_v35 = vpop.eup %5998  ;;  %v7323_v47 = vadd.f32 %v1849_v45, %v1847_v36  ;;  %v1841_v44 = vadd.f32 1.0, %v5997_v33  ;;  %v8829_v36 = vld [vmem:[#allocation112_spill] sm:$0xff]  ;;  %v8830_v45 = vld [vmem:[#allocation113_spill] sm:$0xff]  ;;  %v8831_v33 = vld [vmem:[#allocation114_spill] sm:$0xff] }
 0x3fc   :  { %v7325_v26 = vadd.f32 %v1850_v51, %v1848_v5  ;;  %v1842_v34 = vadd.f32 1.0, %v5999_v35  ;;  %v8832_v5 = vld [vmem:[#allocation115_spill] sm:$0xff]  ;;  %v8833_v51 = vld [vmem:[#allocation116_spill] sm:$0xff]  ;;  %v8834_v35 = vld [vmem:[#allocation117_spill] sm:$0xff] }
 0x3fd   :  { %6000 = vtanh.f32 %v7323_v47 }
 0x3fe   :  { %6002 = vrcp.f32 %v1841_v44  ;;  %v8835_v44 = vld [vmem:[#allocation118_spill] sm:$0xff] }
 0x3ff   :  { %6004 = vtanh.f32 %v7325_v26 }
 0x400   :  { %6006 = vrcp.f32 %v1842_v34  ;;  %v8836_v34 = vld [vmem:[#allocation119_spill] sm:$0xff] }
 0x407   :  { %v6001_v11 = vpop.eup %6000 }
 0x408   :  { %v6003_v23 = vpop.eup %6002 }
 0x409   :  { %v6005_v13 = vpop.eup %6004  ;;  %v7329_v7 = vmul.f32 %v6003_v23, %v6001_v11  ;;  %v8837_v11 = vld [vmem:[#allocation120_spill] sm:$0xff]  ;;  %v8838_v23 = vld [vmem:[#allocation121_spill] sm:$0xff] }
 0x40a   :  { %v6007_v49 = vpop.eup %6006 }
 0x40b   :  { %v1856_v0 = vmul.f32 %v6007_v49, %v6005_v13  ;;  %v8839_v13 = vld [vmem:[#allocation122_spill] sm:$0xff]  ;;  %v8840_v49 = vld [vmem:[#allocation123_spill] sm:$0xff] }
 0x40d   :  { %1921 = vmatprep.mubr.f32.mxu0 %v1856_v0  ;;  %1992 = vmatprep.mubr.f32.mxu1 %v1856_v0 }
 0x40e   :  { %1922 = vmatmul.mubr.f32.vlgmr.msra.gmra.mrb[12].mxu0 %v7329_v7  ;;  %1993 = vmatmul.mubr.f32.vlgmr.msra.gmra.mrb[12].mxu1 %v7329_v7 }
 0x40f   :  { %4683 = vmatpush1.bf16.msra.mxu0 %v8585_v25  ;;  %4747 = vmatpush1.bf16.msra.mxu1 %v8586_v59 }
 0x410   :  { %2063 = vmatprep.mubr.f32.mxu0 %v1856_v0  ;;  %2134 = vmatprep.mubr.f32.mxu1 %v1856_v0  ;;  %v8841_v0 = vld [vmem:[#allocation124_spill] sm:$0xff] }
 0x411   :  { %4685 = vmatprep.subr.bf16.mxu0 %v8587_v29  ;;  %4749 = vmatprep.subr.bf16.mxu1 %v8588_v50 }
 0x413   :  { %4687 = vmatpush1.bf16.msra.mxu0 %v8589_v43  ;;  %4751 = vmatpush1.bf16.msra.mxu1 %v8590_v1 }
 0x414   :  { %4689 = vmatprep.subr.bf16.mxu0 %v8591_v60  ;;  %4753 = vmatprep.subr.bf16.mxu1 %v8592_v37 }
 0x417   :  { %4691 = vmatpush1.bf16.msra.mxu0 %v8593_v16  ;;  %4755 = vmatpush1.bf16.msra.mxu1 %v8696_v18 }
 0x418   :  { %4693 = vmatprep.subr.bf16.mxu0 %v8697_v22  ;;  %4757 = vmatprep.subr.bf16.mxu1 %v8698_v27 }
 0x41b   :  { %4695 = vmatpush1.bf16.msra.mxu0 %v8699_v28  ;;  %4759 = vmatpush1.bf16.msra.mxu1 %v8700_v9 }
 0x41c   :  { %4697 = vmatprep.subr.bf16.mxu0 %v8701_v4  ;;  %4761 = vmatprep.subr.bf16.mxu1 %v8702_v32 }
 0x41f   :  { %4699 = vmatpush1.bf16.msra.mxu0 %v8813_v30  ;;  %4763 = vmatpush1.bf16.msra.mxu1 %v8814_v46 }
 0x420   :  { %4701 = vmatprep.subr.bf16.mxu0 %v8815_v52  ;;  %4765 = vmatprep.subr.bf16.mxu1 %v8816_v42 }
 0x423   :  { %4703 = vmatpush1.bf16.msra.mxu0 %v8817_v2  ;;  %4767 = vmatpush1.bf16.msra.mxu1 %v8818_v6 }
 0x424   :  { %4705 = vmatprep.subr.bf16.mxu0 %v8819_v57  ;;  %4769 = vmatprep.subr.bf16.mxu1 %v8820_v38 }
 0x427   :  { %4707 = vmatpush1.bf16.msra.mxu0 %v8821_v55  ;;  %4771 = vmatpush1.bf16.msra.mxu1 %v8822_v39  ;;  %v8932_v39 = vld [vmem:[#allocation151_spill] sm:$0xff] }
 0x428   :  { %4709 = vmatprep.subr.bf16.mxu0 %v8823_v10  ;;  %4773 = vmatprep.subr.bf16.mxu1 %v8824_v61  ;;  %v8930_v61 = vld [vmem:[#allocation149_spill] sm:$0xff]  ;;  %v8931_v10 = vld [vmem:[#allocation150_spill] sm:$0xff] }
 0x42b   :  { %4711 = vmatpush1.bf16.msra.mxu0 %v8825_v15  ;;  %4775 = vmatpush1.bf16.msra.mxu1 %v8826_v56  ;;  %v8928_v56 = vld [vmem:[#allocation147_spill] sm:$0xff]  ;;  %v8929_v15 = vld [vmem:[#allocation148_spill] sm:$0xff] }
 0x42c   :  { %4713 = vmatprep.subr.bf16.mxu0 %v8827_v20  ;;  %4777 = vmatprep.subr.bf16.mxu1 %v8828_v41  ;;  %v8926_v41 = vld [vmem:[#allocation145_spill] sm:$0xff]  ;;  %v8927_v20 = vld [vmem:[#allocation146_spill] sm:$0xff] }
 0x42f   :  { %4715 = vmatpush1.bf16.msra.mxu0 %v8829_v36  ;;  %4779 = vmatpush1.bf16.msra.mxu1 %v8830_v45  ;;  %v83_v45 = vpop.permute.xlu1 %82  ;;  %v8925_v36 = vld [vmem:[#allocation144_spill] sm:$0xff] }
 0x430   :  { %4717 = vmatprep.subr.bf16.mxu0 %v8831_v33  ;;  %4781 = vmatprep.subr.bf16.mxu1 %v8832_v5  ;;  %v8842_v33 = vld [vmem:[#allocation125_spill] sm:$0xff]  ;;  %v8843_v5 = vld [vmem:[#allocation126_spill] sm:$0xff] }
 0x433   :  { %4719 = vmatpush1.bf16.msra.mxu0 %v8833_v51  ;;  %4783 = vmatpush1.bf16.msra.mxu1 %v8834_v35  ;;  %v8844_v51 = vld [vmem:[#allocation127_spill] sm:$0xff]  ;;  %v8845_v35 = vld [vmem:[#allocation128_spill] sm:$0xff] }
 0x434   :  { %4721 = vmatprep.subr.bf16.mxu0 %v8835_v44  ;;  %4785 = vmatprep.subr.bf16.mxu1 %v8836_v34  ;;  %v8846_v44 = vld [vmem:[#allocation129_spill] sm:$0xff]  ;;  %v8847_v34 = vld [vmem:[#allocation130_spill] sm:$0xff] }
 0x437   :  { %4723 = vmatpush1.bf16.msra.mxu0 %v8837_v11  ;;  %4787 = vmatpush1.bf16.msra.mxu1 %v8838_v23  ;;  %v8848_v11 = vld [vmem:[#allocation131_spill] sm:$0xff]  ;;  %v8849_v23 = vld [vmem:[#allocation132_spill] sm:$0xff] }
 0x438   :  { %4725 = vmatprep.subr.bf16.mxu0 %v8839_v13  ;;  %4789 = vmatprep.subr.bf16.mxu1 %v8840_v49  ;;  %v8850_v13 = vld [vmem:[#allocation133_spill] sm:$0xff]  ;;  %v8851_v49 = vld [vmem:[#allocation134_spill] sm:$0xff] }
 0x43b   :  { %4727 = vmatpush1.bf16.msra.mxu0 %v8841_v0  ;;  %4791 = vmatpush1.bf16.msra.mxu1 %v8842_v33  ;;  %v8852_v0 = vld [vmem:[#allocation135_spill] sm:$0xff]  ;;  %v8853_v33 = vld [vmem:[#allocation136_spill] sm:$0xff] }
 0x43c   :  { %4729 = vmatprep.subr.bf16.mxu0 %v8843_v5  ;;  %4793 = vmatprep.subr.bf16.mxu1 %v8844_v51  ;;  %v8854_v5 = vld [vmem:[#allocation137_spill] sm:$0xff]  ;;  %v8855_v51 = vld [vmem:[#allocation138_spill] sm:$0xff] }
 0x43f   :  { %4731 = vmatpush1.bf16.msra.mxu0 %v8845_v35  ;;  %4795 = vmatpush1.bf16.msra.mxu1 %v8846_v44  ;;  %v8856_v35 = vld [vmem:[#allocation139_spill] sm:$0xff]  ;;  %v8857_v44 = vld [vmem:[#allocation140_spill] sm:$0xff] }
 0x440   :  { %4733 = vmatprep.subr.bf16.mxu0 %v8847_v34  ;;  %4797 = vmatprep.subr.bf16.mxu1 %v8848_v11  ;;  %v8858_v34 = vld [vmem:[#allocation141_spill] sm:$0xff]  ;;  %v8859_v11 = vld [vmem:[#allocation14_spill] sm:$0xff] }
 0x443   :  { %4735 = vmatpush1.bf16.msra.mxu0 %v8849_v23  ;;  %4799 = vmatpush1.bf16.msra.mxu1 %v8850_v13  ;;  %v8860_v23 = vld [vmem:[#allocation15_spill] sm:$0xff] }
 0x444   :  { %4737 = vmatprep.subr.bf16.mxu0 %v8851_v49  ;;  %4801 = vmatprep.subr.bf16.mxu1 %v8852_v0  ;;  %v8861_v0 = vld [vmem:[#allocation16_spill] sm:$0xff]  ;;  %v8870_v49 = vld [vmem:[#allocation25_spill] sm:$0xff] }
 0x447   :  { %4739 = vmatpush1.bf16.msra.mxu0 %v8853_v33  ;;  %4803 = vmatpush1.bf16.msra.mxu1 %v8854_v5  ;;  %v8862_v33 = vld [vmem:[#allocation17_spill] sm:$0xff]  ;;  %v8863_v5 = vld [vmem:[#allocation18_spill] sm:$0xff] }
 0x448   :  { %4741 = vmatprep.subr.bf16.mxu0 %v8855_v51  ;;  %4805 = vmatprep.subr.bf16.mxu1 %v8856_v35  ;;  %v8864_v51 = vld [vmem:[#allocation19_spill] sm:$0xff]  ;;  %v8865_v35 = vld [vmem:[#allocation20_spill] sm:$0xff] }
 0x44b   :  { %4743 = vmatpush1.bf16.msra.mxu0 %v8857_v44  ;;  %4807 = vmatpush1.bf16.msra.mxu1 %v8858_v34  ;;  %v8866_v44 = vld [vmem:[#allocation21_spill] sm:$0xff]  ;;  %v8867_v34 = vld [vmem:[#allocation22_spill] sm:$0xff] }
 0x44c   :  { %4809 = vmatprep.subr.bf16.mxu0 %v8859_v11  ;;  %4873 = vmatprep.subr.bf16.mxu1 %v8860_v23  ;;  %v8868_v11 = vld [vmem:[#allocation23_spill] sm:$0xff]  ;;  %v8869_v23 = vld [vmem:[#allocation24_spill] sm:$0xff] }
 0x44e   :  { %2064 = vmatmul.mubr.f32.vlgmr.msra.gmra.mrb[14].mxu0 %v7329_v7  ;;  %2135 = vmatmul.mubr.f32.vlgmr.msra.gmra.mrb[14].mxu1 %v7329_v7  ;;  %v8871_v7 = vld [vmem:[#allocation26_spill] sm:$0xff] }
 0x44f   :  { %4811 = vmatpush1.bf16.msra.mxu0 %v8861_v0  ;;  %4875 = vmatpush1.bf16.msra.mxu1 %v8862_v33  ;;  %v8872_v0 = vld [vmem:[#allocation27_spill] sm:$0xff]  ;;  %v8873_v33 = vld [vmem:[#allocation28_spill] sm:$0xff] }
 0x450   :  { %4813 = vmatprep.subr.bf16.mxu0 %v8863_v5  ;;  %4877 = vmatprep.subr.bf16.mxu1 %v8864_v51  ;;  %v8874_v5 = vld [vmem:[#allocation29_spill] sm:$0xff]  ;;  %v8875_v51 = vld [vmem:[#allocation30_spill] sm:$0xff] }
 0x453   :  { %4815 = vmatpush1.bf16.msra.mxu0 %v8865_v35  ;;  %4879 = vmatpush1.bf16.msra.mxu1 %v8866_v44  ;;  %v8876_v35 = vld [vmem:[#allocation31_spill] sm:$0xff]  ;;  %v8877_v44 = vld [vmem:[#allocation32_spill] sm:$0xff] }
 0x454   :  { %4817 = vmatprep.subr.bf16.mxu0 %v8867_v34  ;;  %4881 = vmatprep.subr.bf16.mxu1 %v8868_v11  ;;  %v8878_v34 = vld [vmem:[#allocation33_spill] sm:$0xff]  ;;  %v8879_v11 = vld [vmem:[#allocation34_spill] sm:$0xff] }
 0x457   :  { %4819 = vmatpush1.bf16.msra.mxu0 %v8869_v23  ;;  %4883 = vmatpush1.bf16.msra.mxu1 %v8870_v49  ;;  %v8880_v23 = vld [vmem:[#allocation35_spill] sm:$0xff]  ;;  %v8881_v49 = vld [vmem:[#allocation36_spill] sm:$0xff] }
 0x458   :  { %4821 = vmatprep.subr.bf16.mxu0 %v8871_v7  ;;  %4885 = vmatprep.subr.bf16.mxu1 %v8872_v0  ;;  %v8882_v7 = vld [vmem:[#allocation37_spill] sm:$0xff]  ;;  %v8883_v0 = vld [vmem:[#allocation38_spill] sm:$0xff] }
 0x45b   :  { %4823 = vmatpush1.bf16.msra.mxu0 %v8873_v33  ;;  %4887 = vmatpush1.bf16.msra.mxu1 %v8874_v5  ;;  %v8884_v33 = vld [vmem:[#allocation39_spill] sm:$0xff]  ;;  %v8885_v5 = vld [vmem:[#allocation40_spill] sm:$0xff] }
 0x45c   :  { %4825 = vmatprep.subr.bf16.mxu0 %v8875_v51  ;;  %4889 = vmatprep.subr.bf16.mxu1 %v8876_v35  ;;  %v8886_v51 = vld [vmem:[#allocation41_spill] sm:$0xff]  ;;  %v8887_v35 = vld [vmem:[#allocation42_spill] sm:$0xff] }
 0x45f   :  { %4827 = vmatpush1.bf16.msra.mxu0 %v8877_v44  ;;  %4891 = vmatpush1.bf16.msra.mxu1 %v8878_v34  ;;  %v8888_v44 = vld [vmem:[#allocation43_spill] sm:$0xff]  ;;  %v8889_v34 = vld [vmem:[#allocation44_spill] sm:$0xff] }
 0x460   :  { %4829 = vmatprep.subr.bf16.mxu0 %v8879_v11  ;;  %4893 = vmatprep.subr.bf16.mxu1 %v8880_v23  ;;  %v8890_v11 = vld [vmem:[#allocation45_spill] sm:$0xff]  ;;  %v8891_v23 = vld [vmem:[#allocation46_spill] sm:$0xff] }
 0x463   :  { %4831 = vmatpush1.bf16.msra.mxu0 %v8881_v49  ;;  %4895 = vmatpush1.bf16.msra.mxu1 %v8882_v7  ;;  %v8892_v49 = vld [vmem:[#allocation47_spill] sm:$0xff]  ;;  %v8893_v7 = vld [vmem:[#allocation48_spill] sm:$0xff] }
 0x464   :  { %4833 = vmatprep.subr.bf16.mxu0 %v8883_v0  ;;  %4897 = vmatprep.subr.bf16.mxu1 %v8884_v33  ;;  %v8894_v0 = vld [vmem:[#allocation49_spill] sm:$0xff]  ;;  %v8895_v33 = vld [vmem:[#allocation50_spill] sm:$0xff] }
 0x467   :  { %4835 = vmatpush1.bf16.msra.mxu0 %v8885_v5  ;;  %4899 = vmatpush1.bf16.msra.mxu1 %v8886_v51  ;;  %v8896_v5 = vld [vmem:[#allocation51_spill] sm:$0xff]  ;;  %v8897_v51 = vld [vmem:[#allocation52_spill] sm:$0xff] }
 0x468   :  { %4837 = vmatprep.subr.bf16.mxu0 %v8887_v35  ;;  %4901 = vmatprep.subr.bf16.mxu1 %v8888_v44  ;;  %v8898_v35 = vld [vmem:[#allocation53_spill] sm:$0xff]  ;;  %v8899_v44 = vld [vmem:[#allocation54_spill] sm:$0xff] }
 0x46b   :  { %4839 = vmatpush1.bf16.msra.mxu0 %v8889_v34  ;;  %4903 = vmatpush1.bf16.msra.mxu1 %v8890_v11  ;;  %v8900_v34 = vld [vmem:[#allocation55_spill] sm:$0xff]  ;;  %v8901_v11 = vld [vmem:[#allocation56_spill] sm:$0xff] }
 0x46c   :  { %4841 = vmatprep.subr.bf16.mxu0 %v8891_v23  ;;  %4905 = vmatprep.subr.bf16.mxu1 %v8892_v49  ;;  %v8902_v23 = vld [vmem:[#allocation57_spill] sm:$0xff]  ;;  %v8903_v49 = vld [vmem:[#allocation58_spill] sm:$0xff] }
 0x46f   :  { %4843 = vmatpush1.bf16.msra.mxu0 %v8893_v7  ;;  %4907 = vmatpush1.bf16.msra.mxu1 %v8894_v0  ;;  %v8904_v7 = vld [vmem:[#allocation59_spill] sm:$0xff]  ;;  %v8905_v0 = vld [vmem:[#allocation60_spill] sm:$0xff] }
 0x470   :  { %4845 = vmatprep.subr.bf16.mxu0 %v8895_v33  ;;  %4909 = vmatprep.subr.bf16.mxu1 %v8896_v5  ;;  %v8906_v33 = vld [vmem:[#allocation61_spill] sm:$0xff]  ;;  %v8907_v5 = vld [vmem:[#allocation62_spill] sm:$0xff] }
 0x473   :  { %4847 = vmatpush1.bf16.msra.mxu0 %v8897_v51  ;;  %4911 = vmatpush1.bf16.msra.mxu1 %v8898_v35  ;;  %v8908_v51 = vld [vmem:[#allocation63_spill] sm:$0xff]  ;;  %v8909_v35 = vld [vmem:[#allocation64_spill] sm:$0xff] }
 0x474   :  { %4849 = vmatprep.subr.bf16.mxu0 %v8899_v44  ;;  %4913 = vmatprep.subr.bf16.mxu1 %v8900_v34  ;;  %v8910_v44 = vld [vmem:[#allocation65_spill] sm:$0xff]  ;;  %v8911_v34 = vld [vmem:[#allocation66_spill] sm:$0xff] }
 0x477   :  { %4851 = vmatpush1.bf16.msra.mxu0 %v8901_v11  ;;  %4915 = vmatpush1.bf16.msra.mxu1 %v8902_v23  ;;  %v8912_v11 = vld [vmem:[#allocation67_spill] sm:$0xff]  ;;  %v8913_v23 = vld [vmem:[#allocation68_spill] sm:$0xff] }
 0x478   :  { %4853 = vmatprep.subr.bf16.mxu0 %v8903_v49  ;;  %4917 = vmatprep.subr.bf16.mxu1 %v8904_v7  ;;  %v8914_v49 = vld [vmem:[#allocation69_spill] sm:$0xff]  ;;  %v8915_v7 = vld [vmem:[#allocation70_spill] sm:$0xff] }
 0x47b   :  { %4855 = vmatpush1.bf16.msra.mxu0 %v8905_v0  ;;  %4919 = vmatpush1.bf16.msra.mxu1 %v8906_v33  ;;  %v8916_v0 = vld [vmem:[#allocation71_spill] sm:$0xff]  ;;  %v8917_v33 = vld [vmem:[#allocation72_spill] sm:$0xff] }
 0x47c   :  { %4857 = vmatprep.subr.bf16.mxu0 %v8907_v5  ;;  %4921 = vmatprep.subr.bf16.mxu1 %v8908_v51  ;;  %v8918_v5 = vld [vmem:[#allocation73_spill] sm:$0xff]  ;;  %v8919_v51 = vld [vmem:[#allocation74_spill] sm:$0xff] }
 0x47f   :  { %4859 = vmatpush1.bf16.msra.mxu0 %v8909_v35  ;;  %4923 = vmatpush1.bf16.msra.mxu1 %v8910_v44  ;;  %v8920_v35 = vld [vmem:[#allocation75_spill] sm:$0xff]  ;;  %v8921_v44 = vld [vmem:[#allocation76_spill] sm:$0xff] }
 0x480   :  { %4861 = vmatprep.subr.bf16.mxu0 %v8911_v34  ;;  %4925 = vmatprep.subr.bf16.mxu1 %v8912_v11  ;;  %v8922_v34 = vld [vmem:[#allocation77_spill] sm:$0xff]  ;;  %v8923_v11 = vld [vmem:[#allocation78_spill] sm:$0xff] }
 0x483   :  { %4863 = vmatpush1.bf16.msra.mxu0 %v8913_v23  ;;  %4927 = vmatpush1.bf16.msra.mxu1 %v8914_v49  ;;  %v8924_v23 = vld [vmem:[#allocation79_spill] sm:$0xff] }
 0x484   :  { %4865 = vmatprep.subr.bf16.mxu0 %v8915_v7  ;;  %4929 = vmatprep.subr.bf16.mxu1 %v8916_v0 }
 0x487   :  { %4867 = vmatpush1.bf16.msra.mxu0 %v8917_v33  ;;  %4931 = vmatpush1.bf16.msra.mxu1 %v8918_v5  ;;  %v257_v33 = vpop.permute.xlu0 %256  ;;  %v203_v5 = vmul.f32 %v8925_v36, %v83_v45 }
 0x488   :  { %4869 = vmatprep.subr.bf16.mxu0 %v8919_v51  ;;  %4933 = vmatprep.subr.bf16.mxu1 %v8920_v35  ;;  %v371_v51 = vmul.f32 %v8926_v41, %v257_v33  ;;  %v205_v35 = vmul.f32 %v8927_v20, %v83_v45  ;;  %v374_v55 = vmul.f32 %v8932_v39, %v257_v33 }
 0x48a   :  { %v435_v38 = vadd.f32 %v371_v51, %v203_v5 }
 0x48b   :  { %4871 = vmatpush1.bf16.msra.mxu0 %v8921_v44  ;;  %4935 = vmatpush1.bf16.msra.mxu1 %v8922_v34  ;;  %v373_v44 = vmul.f32 %v8928_v56, %v257_v33  ;;  %v204_v34 = vmul.f32 %v8929_v15, %v83_v45 }
 0x48c   :  { %4937 = vmatprep.subr.bf16.mxu0 %v8923_v11  ;;  %5001 = vmatprep.subr.bf16.mxu1 %v8924_v23  ;;  %v372_v11 = vmul.f32 %v8930_v61, %v257_v33  ;;  %v206_v23 = vmul.f32 %v8931_v10, %v83_v45  ;;  %v541_v36 = vadd.f32 %v6902_v3, %v435_v38 }
 0x48d   :  { %v437_v57 = vadd.f32 %v373_v44, %v205_v35  ;;  %v207_v38 = vmul.f32 %v6932_v54, %v83_v45 }
 0x48e   :  { %v436_v6 = vadd.f32 %v372_v11, %v204_v34  ;;  %v438_v2 = vadd.f32 %v374_v55, %v206_v23  ;;  %v209_v55 = vmul.f32 %v6938_v48, %v83_v45 }
 0x48f   :  { %v543_v41 = vadd.f32 %v6906_v21, %v437_v57  ;;  %v375_v57 = vmul.f32 %v6935_v58, %v257_v33 }
 0x490   :  { %v542_v20 = vadd.f32 %v6910_v19, %v436_v6  ;;  %v544_v15 = vadd.f32 %v6914_v14, %v438_v2  ;;  %v377_v6 = vmul.f32 %v6941_v53, %v257_v33  ;;  %v208_v2 = vmul.f32 %v8693_v8, %v83_v45 }
 0x4e1   :  { %v1923_v49 = vpop.f32.mrb[12].mxu0  ;;  %v1994_v7 = vpop.f32.mrb[12].mxu1 }
 0x4e2   :  { %v1925_v13 = vpop.f32.mrb[13].mxu0  ;;  %v1996_v0 = vpop.f32.mrb[13].mxu1  ;;  %v2141_v42 = vadd.f32 %v1923_v49, %v541_v36  ;;  %v2143_v56 = vadd.f32 %v1994_v7, %v543_v41 }
 0x4e3   :  { %v2142_v52 = vadd.f32 %v1925_v13, %v542_v20  ;;  %v2144_v61 = vadd.f32 %v1996_v0, %v544_v15  ;;  %v439_v15 = vadd.f32 %v375_v57, %v207_v38 }
 0x4e4   :  { %v3754_v46 = vmul.f32 -1.442695, %v2141_v42  ;;  %v3756_v10 = vmul.f32 -1.442695, %v2143_v56  ;;  %v376_v42 = vmul.f32 %v8694_v17, %v257_v33  ;;  %v441_v56 = vadd.f32 %v377_v6, %v209_v55 }
 0x4e5   :  { %v3755_v30 = vmul.f32 -1.442695, %v2142_v52  ;;  %v3757_v39 = vmul.f32 -1.442695, %v2144_v61  ;;  %v210_v52 = vmul.f32 %v6950_v12, %v83_v45  ;;  %v545_v44 = vadd.f32 %v6973_v24, %v439_v15 }
 0x4e6   :  { %6008 = vpow2.f32 %v3754_v46  ;;  %v378_v46 = vmul.f32 %v8695_v40, %v257_v33  ;;  %v440_v36 = vadd.f32 %v376_v42, %v208_v2  ;;  %v547_v34 = vadd.f32 %v6977_v31, %v441_v56 }
 0x4e7   :  { %6010 = vpow2.f32 %v3756_v10 }
 0x4e8   :  { %6012 = vpow2.f32 %v3755_v30  ;;  %v442_v5 = vadd.f32 %v378_v46, %v210_v52  ;;  %v546_v33 = vadd.f32 %v6981_v63, %v440_v36 }
 0x4e9   :  { %6014 = vpow2.f32 %v3757_v39 }
 0x4ea   :  { %v548_v23 = vadd.f32 %v6985_v62, %v442_v5 }
 0x4f0   :  { %v6009_v41 = vpop.eup %6008 }
 0x4f1   :  { %v6011_v10 = vpop.eup %6010  ;;  %v2155_v61 = vadd.f32 1.0, %v6009_v41 }
 0x4f2   :  { %v6013_v30 = vpop.eup %6012  ;;  %v2167_v20 = vadd.f32 1.0, %v6011_v10 }
 0x4f3   :  { %v6015_v39 = vpop.eup %6014  ;;  %v2156_v51 = vadd.f32 1.0, %v6013_v30  ;;  %6016 = vrcp.f32 %v2155_v61 }
 0x4f4   :  { %v2168_v35 = vadd.f32 1.0, %v6015_v39  ;;  %6018 = vrcp.f32 %v2167_v20 }
 0x4f5   :  { %6020 = vrcp.f32 %v2156_v51 }
 0x4f6   :  { %6022 = vrcp.f32 %v2168_v35 }
 0x4fd   :  { %v6017_v41 = vpop.eup %6016 }
 0x4fe   :  { %v6019_v2 = vpop.eup %6018 }
 0x4ff   :  { %v6021_v42 = vpop.eup %6020  ;;  %v2187_v30 = vmul.f32 %v6019_v2, %v7323_v47  ;;  %v8944_v2 = vld [vmem:[#allocation107_spill] sm:$0xff] }
 0x500   :  { %v6023_v52 = vpop.eup %6022 }
 0x501   :  { %v2188_v15 = vmul.f32 %v6023_v52, %v7325_v26  ;;  %v8946_v52 = vld [vmem:[#allocation109_spill] sm:$0xff] }
 0x521   :  { %v2065_v45 = vpop.f32.mrb[14].mxu0  ;;  %v2136_v11 = vpop.f32.mrb[14].mxu1 }
 0x522   :  { %v2145_v13 = vadd.f32 %v2065_v45, %v545_v44  ;;  %v2147_v49 = vadd.f32 %v2136_v11, %v547_v34  ;;  %v2067_v0 = vpop.f32.mrb[15].mxu0  ;;  %v2138_v7 = vpop.f32.mrb[15].mxu1 }
 0x523   :  { %v2146_v38 = vadd.f32 %v2067_v0, %v546_v33  ;;  %v2148_v57 = vadd.f32 %v2138_v7, %v548_v23  ;;  %v8933_v33 = vld [vmem:[#allocation96_spill] sm:$0xff]  ;;  %v8934_v23 = vld [vmem:[#allocation97_spill] sm:$0xff] }
 0x524   :  { %6024 = vtanh.f32 %v2145_v13  ;;  %v3758_v55 = vmul.f32 -1.442695, %v2147_v49  ;;  %v8935_v13 = vld [vmem:[#allocation98_spill] sm:$0xff]  ;;  %v8936_v49 = vld [vmem:[#allocation99_spill] sm:$0xff]  ;;  %v8937_v0 = vld [vmem:[#allocation100_spill] sm:$0xff] }
 0x525   :  { %6026 = vtanh.f32 %v2146_v38  ;;  %v3759_v6 = vmul.f32 -1.442695, %v2148_v57  ;;  %v8938_v7 = vld [vmem:[#allocation101_spill] sm:$0xff]  ;;  %v8939_v38 = vld [vmem:[#allocation102_spill] sm:$0xff]  ;;  %v8940_v57 = vld [vmem:[#allocation103_spill] sm:$0xff] }
 0x526   :  { %6028 = vpow2.f32 %v3758_v55  ;;  %v8941_v55 = vld [vmem:[#allocation104_spill] sm:$0xff] }
 0x527   :  { %6030 = vpow2.f32 %v3759_v6  ;;  %v8942_v6 = vld [vmem:[#allocation105_spill] sm:$0xff] }
 0x52e   :  { %v6025_v46 = vpop.eup %6024 }
 0x52f   :  { %v6027_v10 = vpop.eup %6026  ;;  %v2189_v39 = vmul.f32 %v6025_v46, %v6017_v41  ;;  %v8943_v41 = vld [vmem:[#allocation106_spill] sm:$0xff] }
 0x530   :  { %v6029_v61 = vpop.eup %6028  ;;  %v2190_v56 = vmul.f32 %v6027_v10, %v6021_v42  ;;  %v8945_v42 = vld [vmem:[#allocation108_spill] sm:$0xff]  ;;  %v8947_v46 = vld [vmem:[#allocation110_spill] sm:$0xff]  ;;  %v8948_v10 = vld [vmem:[#allocation111_spill] sm:$0xff] }
 0x531   :  { %v6031_v20 = vpop.eup %6030  ;;  %v7489_v36 = vadd.f32 %v2189_v39, %v2187_v30  ;;  %v2181_v5 = vadd.f32 1.0, %v6029_v61  ;;  %v8949_v30 = vld [vmem:[#allocation112_spill] sm:$0xff]  ;;  %v8950_v39 = vld [vmem:[#allocation113_spill] sm:$0xff]  ;;  %v8951_v61 = vld [vmem:[#allocation114_spill] sm:$0xff] }
 0x532   :  { %v7491_v51 = vadd.f32 %v2190_v56, %v2188_v15  ;;  %v2182_v35 = vadd.f32 1.0, %v6031_v20  ;;  %v8952_v15 = vld [vmem:[#allocation115_spill] sm:$0xff]  ;;  %v8953_v56 = vld [vmem:[#allocation116_spill] sm:$0xff]  ;;  %v8954_v20 = vld [vmem:[#allocation117_spill] sm:$0xff] }
 0x533   :  { %6032 = vtanh.f32 %v7489_v36 }
 0x534   :  { %6034 = vrcp.f32 %v2181_v5  ;;  %v8955_v5 = vld [vmem:[#allocation118_spill] sm:$0xff] }
 0x535   :  { %6036 = vtanh.f32 %v7491_v51 }
 0x536   :  { %6038 = vrcp.f32 %v2182_v35  ;;  %v8956_v35 = vld [vmem:[#allocation119_spill] sm:$0xff] }
 0x53d   :  { %v6033_v44 = vpop.eup %6032 }
 0x53e   :  { %v6035_v47 = vpop.eup %6034 }
 0x53f   :  { %v6037_v34 = vpop.eup %6036  ;;  %v7495_v26 = vmul.f32 %v6035_v47, %v6033_v44  ;;  %v8957_v44 = vld [vmem:[#allocation120_spill] sm:$0xff]  ;;  %v8958_v47 = vld [vmem:[#allocation121_spill] sm:$0xff] }
 0x540   :  { %v6039_v45 = vpop.eup %6038 }
 0x541   :  { %v2196_v11 = vmul.f32 %v6039_v45, %v6037_v34  ;;  %v8959_v34 = vld [vmem:[#allocation122_spill] sm:$0xff]  ;;  %v8960_v45 = vld [vmem:[#allocation123_spill] sm:$0xff] }
 0x543   :  { %2261 = vmatprep.mubr.f32.mxu0 %v2196_v11  ;;  %2332 = vmatprep.mubr.f32.mxu1 %v2196_v11 }
 0x544   :  { %2262 = vmatmul.mubr.f32.vlgmr.msra.gmra.mrb[16].mxu0 %v7495_v26  ;;  %2333 = vmatmul.mubr.f32.vlgmr.msra.gmra.mrb[16].mxu1 %v7495_v26 }
 0x545   :  { %4939 = vmatpush1.bf16.msra.mxu0 %v8585_v25  ;;  %5003 = vmatpush1.bf16.msra.mxu1 %v8586_v59 }
 0x546   :  { %2403 = vmatprep.mubr.f32.mxu0 %v2196_v11  ;;  %2474 = vmatprep.mubr.f32.mxu1 %v2196_v11  ;;  %v8961_v11 = vld [vmem:[#allocation124_spill] sm:$0xff] }
 0x547   :  { %4941 = vmatprep.subr.bf16.mxu0 %v8587_v29  ;;  %5005 = vmatprep.subr.bf16.mxu1 %v8588_v50 }
 0x549   :  { %4943 = vmatpush1.bf16.msra.mxu0 %v8589_v43  ;;  %5007 = vmatpush1.bf16.msra.mxu1 %v8590_v1 }
 0x54a   :  { %4945 = vmatprep.subr.bf16.mxu0 %v8591_v60  ;;  %5009 = vmatprep.subr.bf16.mxu1 %v8592_v37 }
 0x54d   :  { %4947 = vmatpush1.bf16.msra.mxu0 %v8593_v16  ;;  %5011 = vmatpush1.bf16.msra.mxu1 %v8696_v18 }
 0x54e   :  { %4949 = vmatprep.subr.bf16.mxu0 %v8697_v22  ;;  %5013 = vmatprep.subr.bf16.mxu1 %v8698_v27 }
 0x551   :  { %4951 = vmatpush1.bf16.msra.mxu0 %v8699_v28  ;;  %5015 = vmatpush1.bf16.msra.mxu1 %v8700_v9 }
 0x552   :  { %4953 = vmatprep.subr.bf16.mxu0 %v8701_v4  ;;  %5017 = vmatprep.subr.bf16.mxu1 %v8702_v32 }
 0x555   :  { %4955 = vmatpush1.bf16.msra.mxu0 %v8933_v33  ;;  %5019 = vmatpush1.bf16.msra.mxu1 %v8934_v23 }
 0x556   :  { %4957 = vmatprep.subr.bf16.mxu0 %v8935_v13  ;;  %5021 = vmatprep.subr.bf16.mxu1 %v8936_v49 }
 0x559   :  { %4959 = vmatpush1.bf16.msra.mxu0 %v8937_v0  ;;  %5023 = vmatpush1.bf16.msra.mxu1 %v8938_v7 }
 0x55a   :  { %4961 = vmatprep.subr.bf16.mxu0 %v8939_v38  ;;  %5025 = vmatprep.subr.bf16.mxu1 %v8940_v57 }
 0x55d   :  { %4963 = vmatpush1.bf16.msra.mxu0 %v8941_v55  ;;  %5027 = vmatpush1.bf16.msra.mxu1 %v8942_v6  ;;  %v9052_v6 = vld [vmem:[#allocation151_spill] sm:$0xff] }
 0x55e   :  { %4965 = vmatprep.subr.bf16.mxu0 %v8943_v41  ;;  %5029 = vmatprep.subr.bf16.mxu1 %v8944_v2  ;;  %v9050_v2 = vld [vmem:[#allocation149_spill] sm:$0xff]  ;;  %v9051_v41 = vld [vmem:[#allocation150_spill] sm:$0xff] }
 0x561   :  { %4967 = vmatpush1.bf16.msra.mxu0 %v8945_v42  ;;  %5031 = vmatpush1.bf16.msra.mxu1 %v8946_v52  ;;  %v9048_v52 = vld [vmem:[#allocation147_spill] sm:$0xff]  ;;  %v9049_v42 = vld [vmem:[#allocation148_spill] sm:$0xff] }
 0x562   :  { %4969 = vmatprep.subr.bf16.mxu0 %v8947_v46  ;;  %5033 = vmatprep.subr.bf16.mxu1 %v8948_v10  ;;  %v9046_v10 = vld [vmem:[#allocation145_spill] sm:$0xff]  ;;  %v9047_v46 = vld [vmem:[#allocation146_spill] sm:$0xff] }
 0x565   :  { %4971 = vmatpush1.bf16.msra.mxu0 %v8949_v30  ;;  %5035 = vmatpush1.bf16.msra.mxu1 %v8950_v39  ;;  %v88_v39 = vpop.permute.xlu1 %87  ;;  %v9045_v30 = vld [vmem:[#allocation144_spill] sm:$0xff] }
 0x566   :  { %4973 = vmatprep.subr.bf16.mxu0 %v8951_v61  ;;  %5037 = vmatprep.subr.bf16.mxu1 %v8952_v15  ;;  %v8962_v61 = vld [vmem:[#allocation125_spill] sm:$0xff]  ;;  %v8963_v15 = vld [vmem:[#allocation126_spill] sm:$0xff] }
 0x569   :  { %4975 = vmatpush1.bf16.msra.mxu0 %v8953_v56  ;;  %5039 = vmatpush1.bf16.msra.mxu1 %v8954_v20  ;;  %v8964_v56 = vld [vmem:[#allocation127_spill] sm:$0xff]  ;;  %v8965_v20 = vld [vmem:[#allocation128_spill] sm:$0xff] }
 0x56a   :  { %4977 = vmatprep.subr.bf16.mxu0 %v8955_v5  ;;  %5041 = vmatprep.subr.bf16.mxu1 %v8956_v35  ;;  %v8966_v5 = vld [vmem:[#allocation129_spill] sm:$0xff]  ;;  %v8967_v35 = vld [vmem:[#allocation130_spill] sm:$0xff] }
 0x56d   :  { %4979 = vmatpush1.bf16.msra.mxu0 %v8957_v44  ;;  %5043 = vmatpush1.bf16.msra.mxu1 %v8958_v47  ;;  %v8968_v44 = vld [vmem:[#allocation131_spill] sm:$0xff]  ;;  %v8969_v47 = vld [vmem:[#allocation132_spill] sm:$0xff] }
 0x56e   :  { %4981 = vmatprep.subr.bf16.mxu0 %v8959_v34  ;;  %5045 = vmatprep.subr.bf16.mxu1 %v8960_v45  ;;  %v8970_v34 = vld [vmem:[#allocation133_spill] sm:$0xff]  ;;  %v8971_v45 = vld [vmem:[#allocation134_spill] sm:$0xff] }
 0x571   :  { %4983 = vmatpush1.bf16.msra.mxu0 %v8961_v11  ;;  %5047 = vmatpush1.bf16.msra.mxu1 %v8962_v61  ;;  %v8972_v11 = vld [vmem:[#allocation135_spill] sm:$0xff]  ;;  %v8973_v61 = vld [vmem:[#allocation136_spill] sm:$0xff] }
 0x572   :  { %4985 = vmatprep.subr.bf16.mxu0 %v8963_v15  ;;  %5049 = vmatprep.subr.bf16.mxu1 %v8964_v56  ;;  %v8974_v15 = vld [vmem:[#allocation137_spill] sm:$0xff]  ;;  %v8975_v56 = vld [vmem:[#allocation138_spill] sm:$0xff] }
 0x575   :  { %4987 = vmatpush1.bf16.msra.mxu0 %v8965_v20  ;;  %5051 = vmatpush1.bf16.msra.mxu1 %v8966_v5  ;;  %v8976_v20 = vld [vmem:[#allocation139_spill] sm:$0xff]  ;;  %v8977_v5 = vld [vmem:[#allocation140_spill] sm:$0xff] }
 0x576   :  { %4989 = vmatprep.subr.bf16.mxu0 %v8967_v35  ;;  %5053 = vmatprep.subr.bf16.mxu1 %v8968_v44  ;;  %v8978_v35 = vld [vmem:[#allocation141_spill] sm:$0xff]  ;;  %v8979_v44 = vld [vmem:[#allocation14_spill] sm:$0xff] }
 0x579   :  { %4991 = vmatpush1.bf16.msra.mxu0 %v8969_v47  ;;  %5055 = vmatpush1.bf16.msra.mxu1 %v8970_v34  ;;  %v8980_v47 = vld [vmem:[#allocation15_spill] sm:$0xff] }
 0x57a   :  { %4993 = vmatprep.subr.bf16.mxu0 %v8971_v45  ;;  %5057 = vmatprep.subr.bf16.mxu1 %v8972_v11  ;;  %v8981_v11 = vld [vmem:[#allocation16_spill] sm:$0xff]  ;;  %v8990_v45 = vld [vmem:[#allocation25_spill] sm:$0xff] }
 0x57d   :  { %4995 = vmatpush1.bf16.msra.mxu0 %v8973_v61  ;;  %5059 = vmatpush1.bf16.msra.mxu1 %v8974_v15  ;;  %v8982_v61 = vld [vmem:[#allocation17_spill] sm:$0xff]  ;;  %v8983_v15 = vld [vmem:[#allocation18_spill] sm:$0xff] }
 0x57e   :  { %4997 = vmatprep.subr.bf16.mxu0 %v8975_v56  ;;  %5061 = vmatprep.subr.bf16.mxu1 %v8976_v20  ;;  %v8984_v56 = vld [vmem:[#allocation19_spill] sm:$0xff]  ;;  %v8985_v20 = vld [vmem:[#allocation20_spill] sm:$0xff] }
 0x581   :  { %4999 = vmatpush1.bf16.msra.mxu0 %v8977_v5  ;;  %5063 = vmatpush1.bf16.msra.mxu1 %v8978_v35  ;;  %v8986_v5 = vld [vmem:[#allocation21_spill] sm:$0xff]  ;;  %v8987_v35 = vld [vmem:[#allocation22_spill] sm:$0xff] }
 0x582   :  { %5065 = vmatprep.subr.bf16.mxu0 %v8979_v44  ;;  %5129 = vmatprep.subr.bf16.mxu1 %v8980_v47  ;;  %v8988_v44 = vld [vmem:[#allocation23_spill] sm:$0xff]  ;;  %v8989_v47 = vld [vmem:[#allocation24_spill] sm:$0xff] }
 0x584   :  { %2404 = vmatmul.mubr.f32.vlgmr.msra.gmra.mrb[18].mxu0 %v7495_v26  ;;  %2475 = vmatmul.mubr.f32.vlgmr.msra.gmra.mrb[18].mxu1 %v7495_v26  ;;  %v8991_v26 = vld [vmem:[#allocation26_spill] sm:$0xff] }
 0x585   :  { %5067 = vmatpush1.bf16.msra.mxu0 %v8981_v11  ;;  %5131 = vmatpush1.bf16.msra.mxu1 %v8982_v61  ;;  %v8992_v11 = vld [vmem:[#allocation27_spill] sm:$0xff]  ;;  %v8993_v61 = vld [vmem:[#allocation28_spill] sm:$0xff] }
 0x586   :  { %5069 = vmatprep.subr.bf16.mxu0 %v8983_v15  ;;  %5133 = vmatprep.subr.bf16.mxu1 %v8984_v56  ;;  %v8994_v15 = vld [vmem:[#allocation29_spill] sm:$0xff]  ;;  %v8995_v56 = vld [vmem:[#allocation30_spill] sm:$0xff] }
 0x589   :  { %5071 = vmatpush1.bf16.msra.mxu0 %v8985_v20  ;;  %5135 = vmatpush1.bf16.msra.mxu1 %v8986_v5  ;;  %v8996_v20 = vld [vmem:[#allocation31_spill] sm:$0xff]  ;;  %v8997_v5 = vld [vmem:[#allocation32_spill] sm:$0xff] }
 0x58a   :  { %5073 = vmatprep.subr.bf16.mxu0 %v8987_v35  ;;  %5137 = vmatprep.subr.bf16.mxu1 %v8988_v44  ;;  %v8998_v35 = vld [vmem:[#allocation33_spill] sm:$0xff]  ;;  %v8999_v44 = vld [vmem:[#allocation34_spill] sm:$0xff] }
 0x58d   :  { %5075 = vmatpush1.bf16.msra.mxu0 %v8989_v47  ;;  %5139 = vmatpush1.bf16.msra.mxu1 %v8990_v45  ;;  %v9000_v47 = vld [vmem:[#allocation35_spill] sm:$0xff]  ;;  %v9001_v45 = vld [vmem:[#allocation36_spill] sm:$0xff] }
 0x58e   :  { %5077 = vmatprep.subr.bf16.mxu0 %v8991_v26  ;;  %5141 = vmatprep.subr.bf16.mxu1 %v8992_v11  ;;  %v9002_v26 = vld [vmem:[#allocation37_spill] sm:$0xff]  ;;  %v9003_v11 = vld [vmem:[#allocation38_spill] sm:$0xff] }
 0x591   :  { %5079 = vmatpush1.bf16.msra.mxu0 %v8993_v61  ;;  %5143 = vmatpush1.bf16.msra.mxu1 %v8994_v15  ;;  %v9004_v61 = vld [vmem:[#allocation39_spill] sm:$0xff]  ;;  %v9005_v15 = vld [vmem:[#allocation40_spill] sm:$0xff] }
 0x592   :  { %5081 = vmatprep.subr.bf16.mxu0 %v8995_v56  ;;  %5145 = vmatprep.subr.bf16.mxu1 %v8996_v20  ;;  %v9006_v56 = vld [vmem:[#allocation41_spill] sm:$0xff]  ;;  %v9007_v20 = vld [vmem:[#allocation42_spill] sm:$0xff] }
 0x595   :  { %5083 = vmatpush1.bf16.msra.mxu0 %v8997_v5  ;;  %5147 = vmatpush1.bf16.msra.mxu1 %v8998_v35  ;;  %v9008_v5 = vld [vmem:[#allocation43_spill] sm:$0xff]  ;;  %v9009_v35 = vld [vmem:[#allocation44_spill] sm:$0xff] }
 0x596   :  { %5085 = vmatprep.subr.bf16.mxu0 %v8999_v44  ;;  %5149 = vmatprep.subr.bf16.mxu1 %v9000_v47  ;;  %v9010_v44 = vld [vmem:[#allocation45_spill] sm:$0xff]  ;;  %v9011_v47 = vld [vmem:[#allocation46_spill] sm:$0xff] }
 0x599   :  { %5087 = vmatpush1.bf16.msra.mxu0 %v9001_v45  ;;  %5151 = vmatpush1.bf16.msra.mxu1 %v9002_v26  ;;  %v9012_v45 = vld [vmem:[#allocation47_spill] sm:$0xff]  ;;  %v9013_v26 = vld [vmem:[#allocation48_spill] sm:$0xff] }
 0x59a   :  { %5089 = vmatprep.subr.bf16.mxu0 %v9003_v11  ;;  %5153 = vmatprep.subr.bf16.mxu1 %v9004_v61  ;;  %v9014_v11 = vld [vmem:[#allocation49_spill] sm:$0xff]  ;;  %v9015_v61 = vld [vmem:[#allocation50_spill] sm:$0xff] }
 0x59d   :  { %5091 = vmatpush1.bf16.msra.mxu0 %v9005_v15  ;;  %5155 = vmatpush1.bf16.msra.mxu1 %v9006_v56  ;;  %v9016_v15 = vld [vmem:[#allocation51_spill] sm:$0xff]  ;;  %v9017_v56 = vld [vmem:[#allocation52_spill] sm:$0xff] }
 0x59e   :  { %5093 = vmatprep.subr.bf16.mxu0 %v9007_v20  ;;  %5157 = vmatprep.subr.bf16.mxu1 %v9008_v5  ;;  %v9018_v20 = vld [vmem:[#allocation53_spill] sm:$0xff]  ;;  %v9019_v5 = vld [vmem:[#allocation54_spill] sm:$0xff] }
 0x5a1   :  { %5095 = vmatpush1.bf16.msra.mxu0 %v9009_v35  ;;  %5159 = vmatpush1.bf16.msra.mxu1 %v9010_v44  ;;  %v9020_v35 = vld [vmem:[#allocation55_spill] sm:$0xff]  ;;  %v9021_v44 = vld [vmem:[#allocation56_spill] sm:$0xff] }
 0x5a2   :  { %5097 = vmatprep.subr.bf16.mxu0 %v9011_v47  ;;  %5161 = vmatprep.subr.bf16.mxu1 %v9012_v45  ;;  %v9022_v47 = vld [vmem:[#allocation57_spill] sm:$0xff]  ;;  %v9023_v45 = vld [vmem:[#allocation58_spill] sm:$0xff] }
 0x5a5   :  { %5099 = vmatpush1.bf16.msra.mxu0 %v9013_v26  ;;  %5163 = vmatpush1.bf16.msra.mxu1 %v9014_v11  ;;  %v9024_v26 = vld [vmem:[#allocation59_spill] sm:$0xff]  ;;  %v9025_v11 = vld [vmem:[#allocation60_spill] sm:$0xff] }
 0x5a6   :  { %5101 = vmatprep.subr.bf16.mxu0 %v9015_v61  ;;  %5165 = vmatprep.subr.bf16.mxu1 %v9016_v15  ;;  %v9026_v61 = vld [vmem:[#allocation61_spill] sm:$0xff]  ;;  %v9027_v15 = vld [vmem:[#allocation62_spill] sm:$0xff] }
 0x5a9   :  { %5103 = vmatpush1.bf16.msra.mxu0 %v9017_v56  ;;  %5167 = vmatpush1.bf16.msra.mxu1 %v9018_v20  ;;  %v9028_v56 = vld [vmem:[#allocation63_spill] sm:$0xff]  ;;  %v9029_v20 = vld [vmem:[#allocation64_spill] sm:$0xff] }
 0x5aa   :  { %5105 = vmatprep.subr.bf16.mxu0 %v9019_v5  ;;  %5169 = vmatprep.subr.bf16.mxu1 %v9020_v35  ;;  %v9030_v5 = vld [vmem:[#allocation65_spill] sm:$0xff]  ;;  %v9031_v35 = vld [vmem:[#allocation66_spill] sm:$0xff] }
 0x5ad   :  { %5107 = vmatpush1.bf16.msra.mxu0 %v9021_v44  ;;  %5171 = vmatpush1.bf16.msra.mxu1 %v9022_v47  ;;  %v9032_v44 = vld [vmem:[#allocation67_spill] sm:$0xff]  ;;  %v9033_v47 = vld [vmem:[#allocation68_spill] sm:$0xff] }
 0x5ae   :  { %5109 = vmatprep.subr.bf16.mxu0 %v9023_v45  ;;  %5173 = vmatprep.subr.bf16.mxu1 %v9024_v26  ;;  %v9034_v45 = vld [vmem:[#allocation69_spill] sm:$0xff]  ;;  %v9035_v26 = vld [vmem:[#allocation70_spill] sm:$0xff] }
 0x5b1   :  { %5111 = vmatpush1.bf16.msra.mxu0 %v9025_v11  ;;  %5175 = vmatpush1.bf16.msra.mxu1 %v9026_v61  ;;  %v9036_v11 = vld [vmem:[#allocation71_spill] sm:$0xff]  ;;  %v9037_v61 = vld [vmem:[#allocation72_spill] sm:$0xff] }
 0x5b2   :  { %5113 = vmatprep.subr.bf16.mxu0 %v9027_v15  ;;  %5177 = vmatprep.subr.bf16.mxu1 %v9028_v56  ;;  %v9038_v15 = vld [vmem:[#allocation73_spill] sm:$0xff]  ;;  %v9039_v56 = vld [vmem:[#allocation74_spill] sm:$0xff] }
 0x5b5   :  { %5115 = vmatpush1.bf16.msra.mxu0 %v9029_v20  ;;  %5179 = vmatpush1.bf16.msra.mxu1 %v9030_v5  ;;  %v9040_v20 = vld [vmem:[#allocation75_spill] sm:$0xff]  ;;  %v9041_v5 = vld [vmem:[#allocation76_spill] sm:$0xff] }
 0x5b6   :  { %5117 = vmatprep.subr.bf16.mxu0 %v9031_v35  ;;  %5181 = vmatprep.subr.bf16.mxu1 %v9032_v44  ;;  %v9042_v35 = vld [vmem:[#allocation77_spill] sm:$0xff]  ;;  %v9043_v44 = vld [vmem:[#allocation78_spill] sm:$0xff] }
 0x5b9   :  { %5119 = vmatpush1.bf16.msra.mxu0 %v9033_v47  ;;  %5183 = vmatpush1.bf16.msra.mxu1 %v9034_v45  ;;  %v9044_v47 = vld [vmem:[#allocation79_spill] sm:$0xff] }
 0x5ba   :  { %5121 = vmatprep.subr.bf16.mxu0 %v9035_v26  ;;  %5185 = vmatprep.subr.bf16.mxu1 %v9036_v11 }
 0x5bd   :  { %5123 = vmatpush1.bf16.msra.mxu0 %v9037_v61  ;;  %5187 = vmatpush1.bf16.msra.mxu1 %v9038_v15  ;;  %v261_v61 = vpop.permute.xlu0 %260  ;;  %v211_v15 = vmul.f32 %v9045_v30, %v88_v39 }
 0x5be   :  { %5125 = vmatprep.subr.bf16.mxu0 %v9039_v56  ;;  %5189 = vmatprep.subr.bf16.mxu1 %v9040_v20  ;;  %v379_v56 = vmul.f32 %v9046_v10, %v261_v61  ;;  %v213_v20 = vmul.f32 %v9047_v46, %v88_v39  ;;  %v382_v55 = vmul.f32 %v9052_v6, %v261_v61 }
 0x5c0   :  { %v443_v57 = vadd.f32 %v379_v56, %v211_v15 }
 0x5c1   :  { %5127 = vmatpush1.bf16.msra.mxu0 %v9041_v5  ;;  %5191 = vmatpush1.bf16.msra.mxu1 %v9042_v35  ;;  %v381_v5 = vmul.f32 %v9048_v52, %v261_v61  ;;  %v212_v35 = vmul.f32 %v9049_v42, %v88_v39 }
 0x5c2   :  { %5193 = vmatprep.subr.bf16.mxu0 %v9043_v44  ;;  %5257 = vmatprep.subr.bf16.mxu1 %v9044_v47  ;;  %v380_v44 = vmul.f32 %v9050_v2, %v261_v61  ;;  %v214_v47 = vmul.f32 %v9051_v41, %v88_v39  ;;  %v549_v30 = vadd.f32 %v6902_v3, %v443_v57 }
 0x5c3   :  { %v445_v38 = vadd.f32 %v381_v5, %v213_v20  ;;  %v215_v57 = vmul.f32 %v6932_v54, %v88_v39 }
 0x5c4   :  { %v444_v7 = vadd.f32 %v380_v44, %v212_v35  ;;  %v446_v0 = vadd.f32 %v382_v55, %v214_v47  ;;  %v217_v55 = vmul.f32 %v6938_v48, %v88_v39 }
 0x5c5   :  { %v551_v10 = vadd.f32 %v6906_v21, %v445_v38  ;;  %v383_v38 = vmul.f32 %v6935_v58, %v261_v61 }
 0x5c6   :  { %v550_v46 = vadd.f32 %v6910_v19, %v444_v7  ;;  %v552_v42 = vadd.f32 %v6914_v14, %v446_v0  ;;  %v385_v7 = vmul.f32 %v6941_v53, %v261_v61  ;;  %v216_v0 = vmul.f32 %v8693_v8, %v88_v39 }
 0x617   :  { %v2263_v45 = vpop.f32.mrb[16].mxu0  ;;  %v2334_v26 = vpop.f32.mrb[16].mxu1 }
 0x618   :  { %v2265_v34 = vpop.f32.mrb[17].mxu0  ;;  %v2336_v11 = vpop.f32.mrb[17].mxu1  ;;  %v2481_v49 = vadd.f32 %v2263_v45, %v549_v30  ;;  %v2483_v52 = vadd.f32 %v2334_v26, %v551_v10 }
 0x619   :  { %v2482_v13 = vadd.f32 %v2265_v34, %v550_v46  ;;  %v2484_v2 = vadd.f32 %v2336_v11, %v552_v42  ;;  %v447_v42 = vadd.f32 %v383_v38, %v215_v57 }
 0x61a   :  { %v3760_v23 = vmul.f32 -1.442695, %v2481_v49  ;;  %v3762_v41 = vmul.f32 -1.442695, %v2483_v52  ;;  %v384_v49 = vmul.f32 %v8694_v17, %v261_v61  ;;  %v449_v52 = vadd.f32 %v385_v7, %v217_v55 }
 0x61b   :  { %v3761_v33 = vmul.f32 -1.442695, %v2482_v13  ;;  %v3763_v6 = vmul.f32 -1.442695, %v2484_v2  ;;  %v218_v13 = vmul.f32 %v6950_v12, %v88_v39  ;;  %v553_v5 = vadd.f32 %v6973_v24, %v447_v42 }
 0x61c   :  { %6040 = vpow2.f32 %v3760_v23  ;;  %v386_v23 = vmul.f32 %v8695_v40, %v261_v61  ;;  %v448_v30 = vadd.f32 %v384_v49, %v216_v0  ;;  %v555_v35 = vadd.f32 %v6977_v31, %v449_v52 }
 0x61d   :  { %6042 = vpow2.f32 %v3762_v41 }
 0x61e   :  { %6044 = vpow2.f32 %v3761_v33  ;;  %v450_v15 = vadd.f32 %v386_v23, %v218_v13  ;;  %v554_v61 = vadd.f32 %v6981_v63, %v448_v30 }
 0x61f   :  { %6046 = vpow2.f32 %v3763_v6 }
 0x620   :  { %v556_v47 = vadd.f32 %v6985_v62, %v450_v15 }
 0x626   :  { %v6041_v10 = vpop.eup %6040 }
 0x627   :  { %v6043_v41 = vpop.eup %6042  ;;  %v2495_v2 = vadd.f32 1.0, %v6041_v10 }
 0x628   :  { %v6045_v33 = vpop.eup %6044  ;;  %v2507_v46 = vadd.f32 1.0, %v6043_v41 }
 0x629   :  { %v6047_v6 = vpop.eup %6046  ;;  %v2496_v56 = vadd.f32 1.0, %v6045_v33  ;;  %6048 = vrcp.f32 %v2495_v2 }
 0x62a   :  { %v2508_v20 = vadd.f32 1.0, %v6047_v6  ;;  %6050 = vrcp.f32 %v2507_v46 }
 0x62b   :  { %6052 = vrcp.f32 %v2496_v56 }
 0x62c   :  { %6054 = vrcp.f32 %v2508_v20 }
 0x633   :  { %v6049_v10 = vpop.eup %6048 }
 0x634   :  { %v6051_v0 = vpop.eup %6050 }
 0x635   :  { %v6053_v49 = vpop.eup %6052  ;;  %v2527_v33 = vmul.f32 %v6051_v0, %v7489_v36  ;;  %v9064_v0 = vld [vmem:[#allocation107_spill] sm:$0xff] }
 0x636   :  { %v6055_v13 = vpop.eup %6054 }
 0x637   :  { %v2528_v42 = vmul.f32 %v6055_v13, %v7491_v51  ;;  %v9066_v13 = vld [vmem:[#allocation109_spill] sm:$0xff] }
 0x657   :  { %v2405_v39 = vpop.f32.mrb[18].mxu0  ;;  %v2476_v44 = vpop.f32.mrb[18].mxu1 }
 0x658   :  { %v2485_v34 = vadd.f32 %v2405_v39, %v553_v5  ;;  %v2487_v45 = vadd.f32 %v2476_v44, %v555_v35  ;;  %v2407_v11 = vpop.f32.mrb[19].mxu0  ;;  %v2478_v26 = vpop.f32.mrb[19].mxu1 }
 0x659   :  { %v2486_v57 = vadd.f32 %v2407_v11, %v554_v61  ;;  %v2488_v38 = vadd.f32 %v2478_v26, %v556_v47  ;;  %v9053_v61 = vld [vmem:[#allocation96_spill] sm:$0xff]  ;;  %v9054_v47 = vld [vmem:[#allocation97_spill] sm:$0xff] }
 0x65a   :  { %6056 = vtanh.f32 %v2485_v34  ;;  %v3764_v55 = vmul.f32 -1.442695, %v2487_v45  ;;  %v9055_v34 = vld [vmem:[#allocation98_spill] sm:$0xff]  ;;  %v9056_v45 = vld [vmem:[#allocation99_spill] sm:$0xff]  ;;  %v9057_v11 = vld [vmem:[#allocation100_spill] sm:$0xff] }
 0x65b   :  { %6058 = vtanh.f32 %v2486_v57  ;;  %v3765_v7 = vmul.f32 -1.442695, %v2488_v38  ;;  %v9058_v26 = vld [vmem:[#allocation101_spill] sm:$0xff]  ;;  %v9059_v57 = vld [vmem:[#allocation102_spill] sm:$0xff]  ;;  %v9060_v38 = vld [vmem:[#allocation103_spill] sm:$0xff] }
 0x65c   :  { %6060 = vpow2.f32 %v3764_v55  ;;  %v9061_v55 = vld [vmem:[#allocation104_spill] sm:$0xff] }
 0x65d   :  { %6062 = vpow2.f32 %v3765_v7  ;;  %v9062_v7 = vld [vmem:[#allocation105_spill] sm:$0xff] }
 0x664   :  { %v6057_v23 = vpop.eup %6056 }
 0x665   :  { %v6059_v41 = vpop.eup %6058  ;;  %v2529_v6 = vmul.f32 %v6057_v23, %v6049_v10  ;;  %v9063_v10 = vld [vmem:[#allocation106_spill] sm:$0xff] }
 0x666   :  { %v6061_v2 = vpop.eup %6060  ;;  %v2530_v52 = vmul.f32 %v6059_v41, %v6053_v49  ;;  %v9065_v49 = vld [vmem:[#allocation108_spill] sm:$0xff]  ;;  %v9067_v23 = vld [vmem:[#allocation110_spill] sm:$0xff]  ;;  %v9068_v41 = vld [vmem:[#allocation111_spill] sm:$0xff] }
 0x667   :  { %v6063_v46 = vpop.eup %6062  ;;  %v7655_v30 = vadd.f32 %v2529_v6, %v2527_v33  ;;  %v2521_v15 = vadd.f32 1.0, %v6061_v2  ;;  %v9069_v33 = vld [vmem:[#allocation112_spill] sm:$0xff]  ;;  %v9070_v6 = vld [vmem:[#allocation113_spill] sm:$0xff]  ;;  %v9071_v2 = vld [vmem:[#allocation114_spill] sm:$0xff] }
 0x668   :  { %v7657_v56 = vadd.f32 %v2530_v52, %v2528_v42  ;;  %v2522_v20 = vadd.f32 1.0, %v6063_v46  ;;  %v9072_v42 = vld [vmem:[#allocation115_spill] sm:$0xff]  ;;  %v9073_v52 = vld [vmem:[#allocation116_spill] sm:$0xff]  ;;  %v9074_v46 = vld [vmem:[#allocation117_spill] sm:$0xff] }
 0x669   :  { %6064 = vtanh.f32 %v7655_v30 }
 0x66a   :  { %6066 = vrcp.f32 %v2521_v15  ;;  %v9075_v15 = vld [vmem:[#allocation118_spill] sm:$0xff] }
 0x66b   :  { %6068 = vtanh.f32 %v7657_v56 }
 0x66c   :  { %6070 = vrcp.f32 %v2522_v20  ;;  %v9076_v20 = vld [vmem:[#allocation119_spill] sm:$0xff] }
 0x673   :  { %v6065_v5 = vpop.eup %6064 }
 0x674   :  { %v6067_v36 = vpop.eup %6066 }
 0x675   :  { %v6069_v35 = vpop.eup %6068  ;;  %v7661_v51 = vmul.f32 %v6067_v36, %v6065_v5  ;;  %v9077_v5 = vld [vmem:[#allocation120_spill] sm:$0xff]  ;;  %v9078_v36 = vld [vmem:[#allocation121_spill] sm:$0xff] }
 0x676   :  { %v6071_v39 = vpop.eup %6070 }
 0x677   :  { %v2536_v44 = vmul.f32 %v6071_v39, %v6069_v35  ;;  %v9079_v35 = vld [vmem:[#allocation122_spill] sm:$0xff]  ;;  %v9080_v39 = vld [vmem:[#allocation123_spill] sm:$0xff] }
 0x679   :  { %2601 = vmatprep.mubr.f32.mxu0 %v2536_v44  ;;  %2672 = vmatprep.mubr.f32.mxu1 %v2536_v44 }
 0x67a   :  { %2602 = vmatmul.mubr.f32.vlgmr.msra.gmra.mrb[20].mxu0 %v7661_v51  ;;  %2673 = vmatmul.mubr.f32.vlgmr.msra.gmra.mrb[20].mxu1 %v7661_v51 }
 0x67b   :  { %5195 = vmatpush1.bf16.msra.mxu0 %v8585_v25  ;;  %5259 = vmatpush1.bf16.msra.mxu1 %v8586_v59 }
 0x67c   :  { %2743 = vmatprep.mubr.f32.mxu0 %v2536_v44  ;;  %2814 = vmatprep.mubr.f32.mxu1 %v2536_v44  ;;  %v9081_v44 = vld [vmem:[#allocation124_spill] sm:$0xff] }
 0x67d   :  { %5197 = vmatprep.subr.bf16.mxu0 %v8587_v29  ;;  %5261 = vmatprep.subr.bf16.mxu1 %v8588_v50 }
 0x67f   :  { %5199 = vmatpush1.bf16.msra.mxu0 %v8589_v43  ;;  %5263 = vmatpush1.bf16.msra.mxu1 %v8590_v1 }
 0x680   :  { %5201 = vmatprep.subr.bf16.mxu0 %v8591_v60  ;;  %5265 = vmatprep.subr.bf16.mxu1 %v8592_v37 }
 0x683   :  { %5203 = vmatpush1.bf16.msra.mxu0 %v8593_v16  ;;  %5267 = vmatpush1.bf16.msra.mxu1 %v8696_v18 }
 0x684   :  { %5205 = vmatprep.subr.bf16.mxu0 %v8697_v22  ;;  %5269 = vmatprep.subr.bf16.mxu1 %v8698_v27 }
 0x687   :  { %5207 = vmatpush1.bf16.msra.mxu0 %v8699_v28  ;;  %5271 = vmatpush1.bf16.msra.mxu1 %v8700_v9 }
 0x688   :  { %5209 = vmatprep.subr.bf16.mxu0 %v8701_v4  ;;  %5273 = vmatprep.subr.bf16.mxu1 %v8702_v32 }
 0x68b   :  { %5211 = vmatpush1.bf16.msra.mxu0 %v9053_v61  ;;  %5275 = vmatpush1.bf16.msra.mxu1 %v9054_v47 }
 0x68c   :  { %5213 = vmatprep.subr.bf16.mxu0 %v9055_v34  ;;  %5277 = vmatprep.subr.bf16.mxu1 %v9056_v45 }
 0x68f   :  { %5215 = vmatpush1.bf16.msra.mxu0 %v9057_v11  ;;  %5279 = vmatpush1.bf16.msra.mxu1 %v9058_v26 }
 0x690   :  { %5217 = vmatprep.subr.bf16.mxu0 %v9059_v57  ;;  %5281 = vmatprep.subr.bf16.mxu1 %v9060_v38 }
 0x693   :  { %5219 = vmatpush1.bf16.msra.mxu0 %v9061_v55  ;;  %5283 = vmatpush1.bf16.msra.mxu1 %v9062_v7  ;;  %v9172_v7 = vld [vmem:[#allocation151_spill] sm:$0xff] }
 0x694   :  { %5221 = vmatprep.subr.bf16.mxu0 %v9063_v10  ;;  %5285 = vmatprep.subr.bf16.mxu1 %v9064_v0  ;;  %v9170_v0 = vld [vmem:[#allocation149_spill] sm:$0xff]  ;;  %v9171_v10 = vld [vmem:[#allocation150_spill] sm:$0xff] }
 0x697   :  { %5223 = vmatpush1.bf16.msra.mxu0 %v9065_v49  ;;  %5287 = vmatpush1.bf16.msra.mxu1 %v9066_v13  ;;  %v9168_v13 = vld [vmem:[#allocation147_spill] sm:$0xff]  ;;  %v9169_v49 = vld [vmem:[#allocation148_spill] sm:$0xff] }
 0x698   :  { %5225 = vmatprep.subr.bf16.mxu0 %v9067_v23  ;;  %5289 = vmatprep.subr.bf16.mxu1 %v9068_v41  ;;  %v9166_v41 = vld [vmem:[#allocation145_spill] sm:$0xff]  ;;  %v9167_v23 = vld [vmem:[#allocation146_spill] sm:$0xff] }
 0x69b   :  { %5227 = vmatpush1.bf16.msra.mxu0 %v9069_v33  ;;  %5291 = vmatpush1.bf16.msra.mxu1 %v9070_v6  ;;  %v93_v6 = vpop.permute.xlu1 %92  ;;  %v9165_v33 = vld [vmem:[#allocation144_spill] sm:$0xff] }
 0x69c   :  { %5229 = vmatprep.subr.bf16.mxu0 %v9071_v2  ;;  %5293 = vmatprep.subr.bf16.mxu1 %v9072_v42  ;;  %v9082_v2 = vld [vmem:[#allocation125_spill] sm:$0xff]  ;;  %v9083_v42 = vld [vmem:[#allocation126_spill] sm:$0xff] }
 0x69f   :  { %5231 = vmatpush1.bf16.msra.mxu0 %v9073_v52  ;;  %5295 = vmatpush1.bf16.msra.mxu1 %v9074_v46  ;;  %v9084_v52 = vld [vmem:[#allocation127_spill] sm:$0xff]  ;;  %v9085_v46 = vld [vmem:[#allocation128_spill] sm:$0xff] }
 0x6a0   :  { %5233 = vmatprep.subr.bf16.mxu0 %v9075_v15  ;;  %5297 = vmatprep.subr.bf16.mxu1 %v9076_v20  ;;  %v9086_v15 = vld [vmem:[#allocation129_spill] sm:$0xff]  ;;  %v9087_v20 = vld [vmem:[#allocation130_spill] sm:$0xff] }
 0x6a3   :  { %5235 = vmatpush1.bf16.msra.mxu0 %v9077_v5  ;;  %5299 = vmatpush1.bf16.msra.mxu1 %v9078_v36  ;;  %v9088_v5 = vld [vmem:[#allocation131_spill] sm:$0xff]  ;;  %v9089_v36 = vld [vmem:[#allocation132_spill] sm:$0xff] }
 0x6a4   :  { %5237 = vmatprep.subr.bf16.mxu0 %v9079_v35  ;;  %5301 = vmatprep.subr.bf16.mxu1 %v9080_v39  ;;  %v9090_v35 = vld [vmem:[#allocation133_spill] sm:$0xff]  ;;  %v9091_v39 = vld [vmem:[#allocation134_spill] sm:$0xff] }
 0x6a7   :  { %5239 = vmatpush1.bf16.msra.mxu0 %v9081_v44  ;;  %5303 = vmatpush1.bf16.msra.mxu1 %v9082_v2  ;;  %v9092_v44 = vld [vmem:[#allocation135_spill] sm:$0xff]  ;;  %v9093_v2 = vld [vmem:[#allocation136_spill] sm:$0xff] }
 0x6a8   :  { %5241 = vmatprep.subr.bf16.mxu0 %v9083_v42  ;;  %5305 = vmatprep.subr.bf16.mxu1 %v9084_v52  ;;  %v9094_v42 = vld [vmem:[#allocation137_spill] sm:$0xff]  ;;  %v9095_v52 = vld [vmem:[#allocation138_spill] sm:$0xff] }
 0x6ab   :  { %5243 = vmatpush1.bf16.msra.mxu0 %v9085_v46  ;;  %5307 = vmatpush1.bf16.msra.mxu1 %v9086_v15  ;;  %v9096_v46 = vld [vmem:[#allocation139_spill] sm:$0xff]  ;;  %v9097_v15 = vld [vmem:[#allocation140_spill] sm:$0xff] }
 0x6ac   :  { %5245 = vmatprep.subr.bf16.mxu0 %v9087_v20  ;;  %5309 = vmatprep.subr.bf16.mxu1 %v9088_v5  ;;  %v9098_v20 = vld [vmem:[#allocation141_spill] sm:$0xff]  ;;  %v9099_v5 = vld [vmem:[#allocation14_spill] sm:$0xff] }
 0x6af   :  { %5247 = vmatpush1.bf16.msra.mxu0 %v9089_v36  ;;  %5311 = vmatpush1.bf16.msra.mxu1 %v9090_v35  ;;  %v9100_v36 = vld [vmem:[#allocation15_spill] sm:$0xff] }
 0x6b0   :  { %5249 = vmatprep.subr.bf16.mxu0 %v9091_v39  ;;  %5313 = vmatprep.subr.bf16.mxu1 %v9092_v44  ;;  %v9101_v44 = vld [vmem:[#allocation16_spill] sm:$0xff]  ;;  %v9110_v39 = vld [vmem:[#allocation25_spill] sm:$0xff] }
 0x6b3   :  { %5251 = vmatpush1.bf16.msra.mxu0 %v9093_v2  ;;  %5315 = vmatpush1.bf16.msra.mxu1 %v9094_v42  ;;  %v9102_v2 = vld [vmem:[#allocation17_spill] sm:$0xff]  ;;  %v9103_v42 = vld [vmem:[#allocation18_spill] sm:$0xff] }
 0x6b4   :  { %5253 = vmatprep.subr.bf16.mxu0 %v9095_v52  ;;  %5317 = vmatprep.subr.bf16.mxu1 %v9096_v46  ;;  %v9104_v52 = vld [vmem:[#allocation19_spill] sm:$0xff]  ;;  %v9105_v46 = vld [vmem:[#allocation20_spill] sm:$0xff] }
 0x6b7   :  { %5255 = vmatpush1.bf16.msra.mxu0 %v9097_v15  ;;  %5319 = vmatpush1.bf16.msra.mxu1 %v9098_v20  ;;  %v9106_v15 = vld [vmem:[#allocation21_spill] sm:$0xff]  ;;  %v9107_v20 = vld [vmem:[#allocation22_spill] sm:$0xff] }
 0x6b8   :  { %5321 = vmatprep.subr.bf16.mxu0 %v9099_v5  ;;  %5385 = vmatprep.subr.bf16.mxu1 %v9100_v36  ;;  %v9108_v5 = vld [vmem:[#allocation23_spill] sm:$0xff]  ;;  %v9109_v36 = vld [vmem:[#allocation24_spill] sm:$0xff] }
 0x6ba   :  { %2744 = vmatmul.mubr.f32.vlgmr.msra.gmra.mrb[22].mxu0 %v7661_v51  ;;  %2815 = vmatmul.mubr.f32.vlgmr.msra.gmra.mrb[22].mxu1 %v7661_v51  ;;  %v9111_v51 = vld [vmem:[#allocation26_spill] sm:$0xff] }
 0x6bb   :  { %5323 = vmatpush1.bf16.msra.mxu0 %v9101_v44  ;;  %5387 = vmatpush1.bf16.msra.mxu1 %v9102_v2  ;;  %v9112_v44 = vld [vmem:[#allocation27_spill] sm:$0xff]  ;;  %v9113_v2 = vld [vmem:[#allocation28_spill] sm:$0xff] }
 0x6bc   :  { %5325 = vmatprep.subr.bf16.mxu0 %v9103_v42  ;;  %5389 = vmatprep.subr.bf16.mxu1 %v9104_v52  ;;  %v9114_v42 = vld [vmem:[#allocation29_spill] sm:$0xff]  ;;  %v9115_v52 = vld [vmem:[#allocation30_spill] sm:$0xff] }
 0x6bf   :  { %5327 = vmatpush1.bf16.msra.mxu0 %v9105_v46  ;;  %5391 = vmatpush1.bf16.msra.mxu1 %v9106_v15  ;;  %v9116_v46 = vld [vmem:[#allocation31_spill] sm:$0xff]  ;;  %v9117_v15 = vld [vmem:[#allocation32_spill] sm:$0xff] }
 0x6c0   :  { %5329 = vmatprep.subr.bf16.mxu0 %v9107_v20  ;;  %5393 = vmatprep.subr.bf16.mxu1 %v9108_v5  ;;  %v9118_v20 = vld [vmem:[#allocation33_spill] sm:$0xff]  ;;  %v9119_v5 = vld [vmem:[#allocation34_spill] sm:$0xff] }
 0x6c3   :  { %5331 = vmatpush1.bf16.msra.mxu0 %v9109_v36  ;;  %5395 = vmatpush1.bf16.msra.mxu1 %v9110_v39  ;;  %v9120_v36 = vld [vmem:[#allocation35_spill] sm:$0xff]  ;;  %v9121_v39 = vld [vmem:[#allocation36_spill] sm:$0xff] }
 0x6c4   :  { %5333 = vmatprep.subr.bf16.mxu0 %v9111_v51  ;;  %5397 = vmatprep.subr.bf16.mxu1 %v9112_v44  ;;  %v9122_v51 = vld [vmem:[#allocation37_spill] sm:$0xff]  ;;  %v9123_v44 = vld [vmem:[#allocation38_spill] sm:$0xff] }
 0x6c7   :  { %5335 = vmatpush1.bf16.msra.mxu0 %v9113_v2  ;;  %5399 = vmatpush1.bf16.msra.mxu1 %v9114_v42  ;;  %v9124_v2 = vld [vmem:[#allocation39_spill] sm:$0xff]  ;;  %v9125_v42 = vld [vmem:[#allocation40_spill] sm:$0xff] }
 0x6c8   :  { %5337 = vmatprep.subr.bf16.mxu0 %v9115_v52  ;;  %5401 = vmatprep.subr.bf16.mxu1 %v9116_v46  ;;  %v9126_v52 = vld [vmem:[#allocation41_spill] sm:$0xff]  ;;  %v9127_v46 = vld [vmem:[#allocation42_spill] sm:$0xff] }
 0x6cb   :  { %5339 = vmatpush1.bf16.msra.mxu0 %v9117_v15  ;;  %5403 = vmatpush1.bf16.msra.mxu1 %v9118_v20  ;;  %v9128_v15 = vld [vmem:[#allocation43_spill] sm:$0xff]  ;;  %v9129_v20 = vld [vmem:[#allocation44_spill] sm:$0xff] }
 0x6cc   :  { %5341 = vmatprep.subr.bf16.mxu0 %v9119_v5  ;;  %5405 = vmatprep.subr.bf16.mxu1 %v9120_v36  ;;  %v9130_v5 = vld [vmem:[#allocation45_spill] sm:$0xff]  ;;  %v9131_v36 = vld [vmem:[#allocation46_spill] sm:$0xff] }
 0x6cf   :  { %5343 = vmatpush1.bf16.msra.mxu0 %v9121_v39  ;;  %5407 = vmatpush1.bf16.msra.mxu1 %v9122_v51  ;;  %v9132_v39 = vld [vmem:[#allocation47_spill] sm:$0xff]  ;;  %v9133_v51 = vld [vmem:[#allocation48_spill] sm:$0xff] }
 0x6d0   :  { %5345 = vmatprep.subr.bf16.mxu0 %v9123_v44  ;;  %5409 = vmatprep.subr.bf16.mxu1 %v9124_v2  ;;  %v9134_v44 = vld [vmem:[#allocation49_spill] sm:$0xff]  ;;  %v9135_v2 = vld [vmem:[#allocation50_spill] sm:$0xff] }
 0x6d3   :  { %5347 = vmatpush1.bf16.msra.mxu0 %v9125_v42  ;;  %5411 = vmatpush1.bf16.msra.mxu1 %v9126_v52  ;;  %v9136_v42 = vld [vmem:[#allocation51_spill] sm:$0xff]  ;;  %v9137_v52 = vld [vmem:[#allocation52_spill] sm:$0xff] }
 0x6d4   :  { %5349 = vmatprep.subr.bf16.mxu0 %v9127_v46  ;;  %5413 = vmatprep.subr.bf16.mxu1 %v9128_v15  ;;  %v9138_v46 = vld [vmem:[#allocation53_spill] sm:$0xff]  ;;  %v9139_v15 = vld [vmem:[#allocation54_spill] sm:$0xff] }
 0x6d7   :  { %5351 = vmatpush1.bf16.msra.mxu0 %v9129_v20  ;;  %5415 = vmatpush1.bf16.msra.mxu1 %v9130_v5  ;;  %v9140_v20 = vld [vmem:[#allocation55_spill] sm:$0xff]  ;;  %v9141_v5 = vld [vmem:[#allocation56_spill] sm:$0xff] }
 0x6d8   :  { %5353 = vmatprep.subr.bf16.mxu0 %v9131_v36  ;;  %5417 = vmatprep.subr.bf16.mxu1 %v9132_v39  ;;  %v9142_v36 = vld [vmem:[#allocation57_spill] sm:$0xff]  ;;  %v9143_v39 = vld [vmem:[#allocation58_spill] sm:$0xff] }
 0x6db   :  { %5355 = vmatpush1.bf16.msra.mxu0 %v9133_v51  ;;  %5419 = vmatpush1.bf16.msra.mxu1 %v9134_v44  ;;  %v9144_v51 = vld [vmem:[#allocation59_spill] sm:$0xff]  ;;  %v9145_v44 = vld [vmem:[#allocation60_spill] sm:$0xff] }
 0x6dc   :  { %5357 = vmatprep.subr.bf16.mxu0 %v9135_v2  ;;  %5421 = vmatprep.subr.bf16.mxu1 %v9136_v42  ;;  %v9146_v2 = vld [vmem:[#allocation61_spill] sm:$0xff]  ;;  %v9147_v42 = vld [vmem:[#allocation62_spill] sm:$0xff] }
 0x6df   :  { %5359 = vmatpush1.bf16.msra.mxu0 %v9137_v52  ;;  %5423 = vmatpush1.bf16.msra.mxu1 %v9138_v46  ;;  %v9148_v52 = vld [vmem:[#allocation63_spill] sm:$0xff]  ;;  %v9149_v46 = vld [vmem:[#allocation64_spill] sm:$0xff] }
 0x6e0   :  { %5361 = vmatprep.subr.bf16.mxu0 %v9139_v15  ;;  %5425 = vmatprep.subr.bf16.mxu1 %v9140_v20  ;;  %v9150_v15 = vld [vmem:[#allocation65_spill] sm:$0xff]  ;;  %v9151_v20 = vld [vmem:[#allocation66_spill] sm:$0xff] }
 0x6e3   :  { %5363 = vmatpush1.bf16.msra.mxu0 %v9141_v5  ;;  %5427 = vmatpush1.bf16.msra.mxu1 %v9142_v36  ;;  %v9152_v5 = vld [vmem:[#allocation67_spill] sm:$0xff]  ;;  %v9153_v36 = vld [vmem:[#allocation68_spill] sm:$0xff] }
 0x6e4   :  { %5365 = vmatprep.subr.bf16.mxu0 %v9143_v39  ;;  %5429 = vmatprep.subr.bf16.mxu1 %v9144_v51  ;;  %v9154_v39 = vld [vmem:[#allocation69_spill] sm:$0xff]  ;;  %v9155_v51 = vld [vmem:[#allocation70_spill] sm:$0xff] }
 0x6e7   :  { %5367 = vmatpush1.bf16.msra.mxu0 %v9145_v44  ;;  %5431 = vmatpush1.bf16.msra.mxu1 %v9146_v2  ;;  %v9156_v44 = vld [vmem:[#allocation71_spill] sm:$0xff]  ;;  %v9157_v2 = vld [vmem:[#allocation72_spill] sm:$0xff] }
 0x6e8   :  { %5369 = vmatprep.subr.bf16.mxu0 %v9147_v42  ;;  %5433 = vmatprep.subr.bf16.mxu1 %v9148_v52  ;;  %v9158_v42 = vld [vmem:[#allocation73_spill] sm:$0xff]  ;;  %v9159_v52 = vld [vmem:[#allocation74_spill] sm:$0xff] }
 0x6eb   :  { %5371 = vmatpush1.bf16.msra.mxu0 %v9149_v46  ;;  %5435 = vmatpush1.bf16.msra.mxu1 %v9150_v15  ;;  %v9160_v46 = vld [vmem:[#allocation75_spill] sm:$0xff]  ;;  %v9161_v15 = vld [vmem:[#allocation76_spill] sm:$0xff] }
 0x6ec   :  { %5373 = vmatprep.subr.bf16.mxu0 %v9151_v20  ;;  %5437 = vmatprep.subr.bf16.mxu1 %v9152_v5  ;;  %v9162_v20 = vld [vmem:[#allocation77_spill] sm:$0xff]  ;;  %v9163_v5 = vld [vmem:[#allocation78_spill] sm:$0xff] }
 0x6ef   :  { %5375 = vmatpush1.bf16.msra.mxu0 %v9153_v36  ;;  %5439 = vmatpush1.bf16.msra.mxu1 %v9154_v39  ;;  %v9164_v36 = vld [vmem:[#allocation79_spill] sm:$0xff] }
 0x6f0   :  { %5377 = vmatprep.subr.bf16.mxu0 %v9155_v51  ;;  %5441 = vmatprep.subr.bf16.mxu1 %v9156_v44 }
 0x6f3   :  { %5379 = vmatpush1.bf16.msra.mxu0 %v9157_v2  ;;  %5443 = vmatpush1.bf16.msra.mxu1 %v9158_v42  ;;  %v265_v2 = vpop.permute.xlu0 %264  ;;  %v219_v42 = vmul.f32 %v9165_v33, %v93_v6 }
 0x6f4   :  { %5381 = vmatprep.subr.bf16.mxu0 %v9159_v52  ;;  %5445 = vmatprep.subr.bf16.mxu1 %v9160_v46  ;;  %v387_v52 = vmul.f32 %v9166_v41, %v265_v2  ;;  %v221_v46 = vmul.f32 %v9167_v23, %v93_v6  ;;  %v390_v55 = vmul.f32 %v9172_v7, %v265_v2 }
 0x6f6   :  { %v451_v38 = vadd.f32 %v387_v52, %v219_v42 }
 0x6f7   :  { %5383 = vmatpush1.bf16.msra.mxu0 %v9161_v15  ;;  %5447 = vmatpush1.bf16.msra.mxu1 %v9162_v20  ;;  %v389_v15 = vmul.f32 %v9168_v13, %v265_v2  ;;  %v220_v20 = vmul.f32 %v9169_v49, %v93_v6 }
 0x6f8   :  { %5449 = vmatprep.subr.bf16.mxu0 %v9163_v5  ;;  %5513 = vmatprep.subr.bf16.mxu1 %v9164_v36  ;;  %v388_v5 = vmul.f32 %v9170_v0, %v265_v2  ;;  %v222_v36 = vmul.f32 %v9171_v10, %v93_v6  ;;  %v557_v33 = vadd.f32 %v6902_v3, %v451_v38 }
 0x6f9   :  { %v453_v57 = vadd.f32 %v389_v15, %v221_v46  ;;  %v223_v38 = vmul.f32 %v6932_v54, %v93_v6 }
 0x6fa   :  { %v452_v26 = vadd.f32 %v388_v5, %v220_v20  ;;  %v454_v11 = vadd.f32 %v390_v55, %v222_v36  ;;  %v225_v55 = vmul.f32 %v6938_v48, %v93_v6 }
 0x6fb   :  { %v559_v41 = vadd.f32 %v6906_v21, %v453_v57  ;;  %v391_v57 = vmul.f32 %v6935_v58, %v265_v2 }
 0x6fc   :  { %v558_v23 = vadd.f32 %v6910_v19, %v452_v26  ;;  %v560_v49 = vadd.f32 %v6914_v14, %v454_v11  ;;  %v393_v26 = vmul.f32 %v6941_v53, %v265_v2  ;;  %v224_v11 = vmul.f32 %v8693_v8, %v93_v6 }
 0x74d   :  { %v2603_v39 = vpop.f32.mrb[20].mxu0  ;;  %v2674_v51 = vpop.f32.mrb[20].mxu1 }
 0x74e   :  { %v2605_v35 = vpop.f32.mrb[21].mxu0  ;;  %v2676_v44 = vpop.f32.mrb[21].mxu1  ;;  %v2821_v45 = vadd.f32 %v2603_v39, %v557_v33  ;;  %v2823_v13 = vadd.f32 %v2674_v51, %v559_v41 }
 0x74f   :  { %v2822_v34 = vadd.f32 %v2605_v35, %v558_v23  ;;  %v2824_v0 = vadd.f32 %v2676_v44, %v560_v49  ;;  %v455_v49 = vadd.f32 %v391_v57, %v223_v38 }
 0x750   :  { %v3766_v47 = vmul.f32 -1.442695, %v2821_v45  ;;  %v3768_v10 = vmul.f32 -1.442695, %v2823_v13  ;;  %v392_v45 = vmul.f32 %v8694_v17, %v265_v2  ;;  %v457_v13 = vadd.f32 %v393_v26, %v225_v55 }
 0x751   :  { %v3767_v61 = vmul.f32 -1.442695, %v2822_v34  ;;  %v3769_v7 = vmul.f32 -1.442695, %v2824_v0  ;;  %v226_v34 = vmul.f32 %v6950_v12, %v93_v6  ;;  %v561_v15 = vadd.f32 %v6973_v24, %v455_v49 }
 0x752   :  { %6072 = vpow2.f32 %v3766_v47  ;;  %v394_v47 = vmul.f32 %v8695_v40, %v265_v2  ;;  %v456_v33 = vadd.f32 %v392_v45, %v224_v11  ;;  %v563_v20 = vadd.f32 %v6977_v31, %v457_v13 }
 0x753   :  { %6074 = vpow2.f32 %v3768_v10 }
 0x754   :  { %6076 = vpow2.f32 %v3767_v61  ;;  %v458_v42 = vadd.f32 %v394_v47, %v226_v34  ;;  %v562_v2 = vadd.f32 %v6981_v63, %v456_v33 }
 0x755   :  { %6078 = vpow2.f32 %v3769_v7 }
 0x756   :  { %v564_v36 = vadd.f32 %v6985_v62, %v458_v42 }
 0x75c   :  { %v6073_v41 = vpop.eup %6072 }
 0x75d   :  { %v6075_v10 = vpop.eup %6074  ;;  %v2835_v0 = vadd.f32 1.0, %v6073_v41 }
 0x75e   :  { %v6077_v61 = vpop.eup %6076  ;;  %v2847_v23 = vadd.f32 1.0, %v6075_v10 }
 0x75f   :  { %v6079_v7 = vpop.eup %6078  ;;  %v2836_v52 = vadd.f32 1.0, %v6077_v61  ;;  %6080 = vrcp.f32 %v2835_v0 }
 0x760   :  { %v2848_v46 = vadd.f32 1.0, %v6079_v7  ;;  %6082 = vrcp.f32 %v2847_v23 }
 0x761   :  { %6084 = vrcp.f32 %v2836_v52 }
 0x762   :  { %6086 = vrcp.f32 %v2848_v46 }
 0x769   :  { %v6081_v41 = vpop.eup %6080 }
 0x76a   :  { %v6083_v11 = vpop.eup %6082 }
 0x76b   :  { %v6085_v45 = vpop.eup %6084  ;;  %v2867_v61 = vmul.f32 %v6083_v11, %v7655_v30  ;;  %v9184_v11 = vld [vmem:[#allocation107_spill] sm:$0xff] }
 0x76c   :  { %v6087_v34 = vpop.eup %6086 }
 0x76d   :  { %v2868_v49 = vmul.f32 %v6087_v34, %v7657_v56  ;;  %v9186_v34 = vld [vmem:[#allocation109_spill] sm:$0xff] }
 0x78d   :  { %v2745_v6 = vpop.f32.mrb[22].mxu0  ;;  %v2816_v5 = vpop.f32.mrb[22].mxu1 }
 0x78e   :  { %v2825_v35 = vadd.f32 %v2745_v6, %v561_v15  ;;  %v2827_v39 = vadd.f32 %v2816_v5, %v563_v20  ;;  %v2747_v44 = vpop.f32.mrb[23].mxu0  ;;  %v2818_v51 = vpop.f32.mrb[23].mxu1 }
 0x78f   :  { %v2826_v38 = vadd.f32 %v2747_v44, %v562_v2  ;;  %v2828_v57 = vadd.f32 %v2818_v51, %v564_v36  ;;  %v9173_v2 = vld [vmem:[#allocation96_spill] sm:$0xff]  ;;  %v9174_v36 = vld [vmem:[#allocation97_spill] sm:$0xff] }
 0x790   :  { %6088 = vtanh.f32 %v2825_v35  ;;  %v3770_v55 = vmul.f32 -1.442695, %v2827_v39  ;;  %v9175_v35 = vld [vmem:[#allocation98_spill] sm:$0xff]  ;;  %v9176_v39 = vld [vmem:[#allocation99_spill] sm:$0xff]  ;;  %v9177_v44 = vld [vmem:[#allocation100_spill] sm:$0xff] }
 0x791   :  { %6090 = vtanh.f32 %v2826_v38  ;;  %v3771_v26 = vmul.f32 -1.442695, %v2828_v57  ;;  %v9178_v51 = vld [vmem:[#allocation101_spill] sm:$0xff]  ;;  %v9179_v38 = vld [vmem:[#allocation102_spill] sm:$0xff]  ;;  %v9180_v57 = vld [vmem:[#allocation103_spill] sm:$0xff] }
 0x792   :  { %6092 = vpow2.f32 %v3770_v55  ;;  %v9181_v55 = vld [vmem:[#allocation104_spill] sm:$0xff] }
 0x793   :  { %6094 = vpow2.f32 %v3771_v26  ;;  %v9182_v26 = vld [vmem:[#allocation105_spill] sm:$0xff] }
 0x79a   :  { %v6089_v47 = vpop.eup %6088 }
 0x79b   :  { %v6091_v10 = vpop.eup %6090  ;;  %v2869_v7 = vmul.f32 %v6089_v47, %v6081_v41  ;;  %v9183_v41 = vld [vmem:[#allocation106_spill] sm:$0xff] }
 0x79c   :  { %v6093_v0 = vpop.eup %6092  ;;  %v2870_v13 = vmul.f32 %v6091_v10, %v6085_v45  ;;  %v9185_v45 = vld [vmem:[#allocation108_spill] sm:$0xff]  ;;  %v9187_v47 = vld [vmem:[#allocation110_spill] sm:$0xff]  ;;  %v9188_v10 = vld [vmem:[#allocation111_spill] sm:$0xff] }
 0x79d   :  { %v6095_v23 = vpop.eup %6094  ;;  %v7821_v33 = vadd.f32 %v2869_v7, %v2867_v61  ;;  %v2861_v42 = vadd.f32 1.0, %v6093_v0  ;;  %v9189_v61 = vld [vmem:[#allocation112_spill] sm:$0xff]  ;;  %v9190_v7 = vld [vmem:[#allocation113_spill] sm:$0xff]  ;;  %v9191_v0 = vld [vmem:[#allocation114_spill] sm:$0xff] }
 0x79e   :  { %v7823_v52 = vadd.f32 %v2870_v13, %v2868_v49  ;;  %v2862_v46 = vadd.f32 1.0, %v6095_v23  ;;  %v9192_v49 = vld [vmem:[#allocation115_spill] sm:$0xff]  ;;  %v9193_v13 = vld [vmem:[#allocation116_spill] sm:$0xff]  ;;  %v9194_v23 = vld [vmem:[#allocation117_spill] sm:$0xff] }
 0x79f   :  { %6096 = vtanh.f32 %v7821_v33 }
 0x7a0   :  { %6098 = vrcp.f32 %v2861_v42  ;;  %v9195_v42 = vld [vmem:[#allocation118_spill] sm:$0xff] }
 0x7a1   :  { %6100 = vtanh.f32 %v7823_v52 }
 0x7a2   :  { %6102 = vrcp.f32 %v2862_v46  ;;  %v9196_v46 = vld [vmem:[#allocation119_spill] sm:$0xff] }
 0x7a9   :  { %v6097_v15 = vpop.eup %6096 }
 0x7aa   :  { %v6099_v30 = vpop.eup %6098 }
 0x7ab   :  { %v6101_v20 = vpop.eup %6100  ;;  %v7827_v56 = vmul.f32 %v6099_v30, %v6097_v15  ;;  %v9197_v15 = vld [vmem:[#allocation120_spill] sm:$0xff]  ;;  %v9198_v30 = vld [vmem:[#allocation121_spill] sm:$0xff] }
 0x7ac   :  { %v6103_v6 = vpop.eup %6102 }
 0x7ad   :  { %v2876_v5 = vmul.f32 %v6103_v6, %v6101_v20  ;;  %v9199_v20 = vld [vmem:[#allocation122_spill] sm:$0xff]  ;;  %v9200_v6 = vld [vmem:[#allocation123_spill] sm:$0xff] }
 0x7af   :  { %2941 = vmatprep.mubr.f32.mxu0 %v2876_v5  ;;  %3012 = vmatprep.mubr.f32.mxu1 %v2876_v5 }
 0x7b0   :  { %2942 = vmatmul.mubr.f32.vlgmr.msra.gmra.mrb[24].mxu0 %v7827_v56  ;;  %3013 = vmatmul.mubr.f32.vlgmr.msra.gmra.mrb[24].mxu1 %v7827_v56 }
 0x7b1   :  { %5451 = vmatpush1.bf16.msra.mxu0 %v8585_v25  ;;  %5515 = vmatpush1.bf16.msra.mxu1 %v8586_v59 }
 0x7b2   :  { %3083 = vmatprep.mubr.f32.mxu0 %v2876_v5  ;;  %3154 = vmatprep.mubr.f32.mxu1 %v2876_v5  ;;  %v9201_v5 = vld [vmem:[#allocation124_spill] sm:$0xff] }
 0x7b3   :  { %5453 = vmatprep.subr.bf16.mxu0 %v8587_v29  ;;  %5517 = vmatprep.subr.bf16.mxu1 %v8588_v50 }
 0x7b5   :  { %5455 = vmatpush1.bf16.msra.mxu0 %v8589_v43  ;;  %5519 = vmatpush1.bf16.msra.mxu1 %v8590_v1 }
 0x7b6   :  { %5457 = vmatprep.subr.bf16.mxu0 %v8591_v60  ;;  %5521 = vmatprep.subr.bf16.mxu1 %v8592_v37 }
 0x7b9   :  { %5459 = vmatpush1.bf16.msra.mxu0 %v8593_v16  ;;  %5523 = vmatpush1.bf16.msra.mxu1 %v8696_v18 }
 0x7ba   :  { %5461 = vmatprep.subr.bf16.mxu0 %v8697_v22  ;;  %5525 = vmatprep.subr.bf16.mxu1 %v8698_v27 }
 0x7bd   :  { %5463 = vmatpush1.bf16.msra.mxu0 %v8699_v28  ;;  %5527 = vmatpush1.bf16.msra.mxu1 %v8700_v9 }
 0x7be   :  { %5465 = vmatprep.subr.bf16.mxu0 %v8701_v4  ;;  %5529 = vmatprep.subr.bf16.mxu1 %v8702_v32 }
 0x7c1   :  { %5467 = vmatpush1.bf16.msra.mxu0 %v9173_v2  ;;  %5531 = vmatpush1.bf16.msra.mxu1 %v9174_v36 }
 0x7c2   :  { %5469 = vmatprep.subr.bf16.mxu0 %v9175_v35  ;;  %5533 = vmatprep.subr.bf16.mxu1 %v9176_v39 }
 0x7c5   :  { %5471 = vmatpush1.bf16.msra.mxu0 %v9177_v44  ;;  %5535 = vmatpush1.bf16.msra.mxu1 %v9178_v51 }
 0x7c6   :  { %5473 = vmatprep.subr.bf16.mxu0 %v9179_v38  ;;  %5537 = vmatprep.subr.bf16.mxu1 %v9180_v57 }
 0x7c9   :  { %5475 = vmatpush1.bf16.msra.mxu0 %v9181_v55  ;;  %5539 = vmatpush1.bf16.msra.mxu1 %v9182_v26  ;;  %v9292_v26 = vld [vmem:[#allocation151_spill] sm:$0xff] }
 0x7ca   :  { %5477 = vmatprep.subr.bf16.mxu0 %v9183_v41  ;;  %5541 = vmatprep.subr.bf16.mxu1 %v9184_v11  ;;  %v9290_v11 = vld [vmem:[#allocation149_spill] sm:$0xff]  ;;  %v9291_v41 = vld [vmem:[#allocation150_spill] sm:$0xff] }
 0x7cd   :  { %5479 = vmatpush1.bf16.msra.mxu0 %v9185_v45  ;;  %5543 = vmatpush1.bf16.msra.mxu1 %v9186_v34  ;;  %v9288_v34 = vld [vmem:[#allocation147_spill] sm:$0xff]  ;;  %v9289_v45 = vld [vmem:[#allocation148_spill] sm:$0xff] }
 0x7ce   :  { %5481 = vmatprep.subr.bf16.mxu0 %v9187_v47  ;;  %5545 = vmatprep.subr.bf16.mxu1 %v9188_v10  ;;  %v9286_v10 = vld [vmem:[#allocation145_spill] sm:$0xff]  ;;  %v9287_v47 = vld [vmem:[#allocation146_spill] sm:$0xff] }
 0x7d1   :  { %5483 = vmatpush1.bf16.msra.mxu0 %v9189_v61  ;;  %5547 = vmatpush1.bf16.msra.mxu1 %v9190_v7  ;;  %v98_v7 = vpop.permute.xlu1 %97  ;;  %v9285_v61 = vld [vmem:[#allocation144_spill] sm:$0xff] }
 0x7d2   :  { %5485 = vmatprep.subr.bf16.mxu0 %v9191_v0  ;;  %5549 = vmatprep.subr.bf16.mxu1 %v9192_v49  ;;  %v9202_v0 = vld [vmem:[#allocation125_spill] sm:$0xff]  ;;  %v9203_v49 = vld [vmem:[#allocation126_spill] sm:$0xff] }
 0x7d5   :  { %5487 = vmatpush1.bf16.msra.mxu0 %v9193_v13  ;;  %5551 = vmatpush1.bf16.msra.mxu1 %v9194_v23  ;;  %v9204_v13 = vld [vmem:[#allocation127_spill] sm:$0xff]  ;;  %v9205_v23 = vld [vmem:[#allocation128_spill] sm:$0xff] }
 0x7d6   :  { %5489 = vmatprep.subr.bf16.mxu0 %v9195_v42  ;;  %5553 = vmatprep.subr.bf16.mxu1 %v9196_v46  ;;  %v9206_v42 = vld [vmem:[#allocation129_spill] sm:$0xff]  ;;  %v9207_v46 = vld [vmem:[#allocation130_spill] sm:$0xff] }
 0x7d9   :  { %5491 = vmatpush1.bf16.msra.mxu0 %v9197_v15  ;;  %5555 = vmatpush1.bf16.msra.mxu1 %v9198_v30  ;;  %v9208_v15 = vld [vmem:[#allocation131_spill] sm:$0xff]  ;;  %v9209_v30 = vld [vmem:[#allocation132_spill] sm:$0xff] }
 0x7da   :  { %5493 = vmatprep.subr.bf16.mxu0 %v9199_v20  ;;  %5557 = vmatprep.subr.bf16.mxu1 %v9200_v6  ;;  %v9210_v20 = vld [vmem:[#allocation133_spill] sm:$0xff]  ;;  %v9211_v6 = vld [vmem:[#allocation134_spill] sm:$0xff] }
 0x7dd   :  { %5495 = vmatpush1.bf16.msra.mxu0 %v9201_v5  ;;  %5559 = vmatpush1.bf16.msra.mxu1 %v9202_v0  ;;  %v9212_v5 = vld [vmem:[#allocation135_spill] sm:$0xff]  ;;  %v9213_v0 = vld [vmem:[#allocation136_spill] sm:$0xff] }
 0x7de   :  { %5497 = vmatprep.subr.bf16.mxu0 %v9203_v49  ;;  %5561 = vmatprep.subr.bf16.mxu1 %v9204_v13  ;;  %v9214_v49 = vld [vmem:[#allocation137_spill] sm:$0xff]  ;;  %v9215_v13 = vld [vmem:[#allocation138_spill] sm:$0xff] }
 0x7e1   :  { %5499 = vmatpush1.bf16.msra.mxu0 %v9205_v23  ;;  %5563 = vmatpush1.bf16.msra.mxu1 %v9206_v42  ;;  %v9216_v23 = vld [vmem:[#allocation139_spill] sm:$0xff]  ;;  %v9217_v42 = vld [vmem:[#allocation140_spill] sm:$0xff] }
 0x7e2   :  { %5501 = vmatprep.subr.bf16.mxu0 %v9207_v46  ;;  %5565 = vmatprep.subr.bf16.mxu1 %v9208_v15  ;;  %v9218_v46 = vld [vmem:[#allocation141_spill] sm:$0xff]  ;;  %v9219_v15 = vld [vmem:[#allocation14_spill] sm:$0xff] }
 0x7e5   :  { %5503 = vmatpush1.bf16.msra.mxu0 %v9209_v30  ;;  %5567 = vmatpush1.bf16.msra.mxu1 %v9210_v20  ;;  %v9220_v30 = vld [vmem:[#allocation15_spill] sm:$0xff] }
 0x7e6   :  { %5505 = vmatprep.subr.bf16.mxu0 %v9211_v6  ;;  %5569 = vmatprep.subr.bf16.mxu1 %v9212_v5  ;;  %v9221_v5 = vld [vmem:[#allocation16_spill] sm:$0xff]  ;;  %v9230_v6 = vld [vmem:[#allocation25_spill] sm:$0xff] }
 0x7e9   :  { %5507 = vmatpush1.bf16.msra.mxu0 %v9213_v0  ;;  %5571 = vmatpush1.bf16.msra.mxu1 %v9214_v49  ;;  %v9222_v0 = vld [vmem:[#allocation17_spill] sm:$0xff]  ;;  %v9223_v49 = vld [vmem:[#allocation18_spill] sm:$0xff] }
 0x7ea   :  { %5509 = vmatprep.subr.bf16.mxu0 %v9215_v13  ;;  %5573 = vmatprep.subr.bf16.mxu1 %v9216_v23  ;;  %v9224_v13 = vld [vmem:[#allocation19_spill] sm:$0xff]  ;;  %v9225_v23 = vld [vmem:[#allocation20_spill] sm:$0xff] }
 0x7ed   :  { %5511 = vmatpush1.bf16.msra.mxu0 %v9217_v42  ;;  %5575 = vmatpush1.bf16.msra.mxu1 %v9218_v46  ;;  %v9226_v42 = vld [vmem:[#allocation21_spill] sm:$0xff]  ;;  %v9227_v46 = vld [vmem:[#allocation22_spill] sm:$0xff] }
 0x7ee   :  { %5577 = vmatprep.subr.bf16.mxu0 %v9219_v15  ;;  %5641 = vmatprep.subr.bf16.mxu1 %v9220_v30  ;;  %v9228_v15 = vld [vmem:[#allocation23_spill] sm:$0xff]  ;;  %v9229_v30 = vld [vmem:[#allocation24_spill] sm:$0xff] }
 0x7f0   :  { %3084 = vmatmul.mubr.f32.vlgmr.msra.gmra.mrb[26].mxu0 %v7827_v56  ;;  %3155 = vmatmul.mubr.f32.vlgmr.msra.gmra.mrb[26].mxu1 %v7827_v56  ;;  %v9231_v56 = vld [vmem:[#allocation26_spill] sm:$0xff] }
 0x7f1   :  { %5579 = vmatpush1.bf16.msra.mxu0 %v9221_v5  ;;  %5643 = vmatpush1.bf16.msra.mxu1 %v9222_v0  ;;  %v9232_v5 = vld [vmem:[#allocation27_spill] sm:$0xff]  ;;  %v9233_v0 = vld [vmem:[#allocation28_spill] sm:$0xff] }
 0x7f2   :  { %5581 = vmatprep.subr.bf16.mxu0 %v9223_v49  ;;  %5645 = vmatprep.subr.bf16.mxu1 %v9224_v13  ;;  %v9234_v49 = vld [vmem:[#allocation29_spill] sm:$0xff]  ;;  %v9235_v13 = vld [vmem:[#allocation30_spill] sm:$0xff] }
 0x7f5   :  { %5583 = vmatpush1.bf16.msra.mxu0 %v9225_v23  ;;  %5647 = vmatpush1.bf16.msra.mxu1 %v9226_v42  ;;  %v9236_v23 = vld [vmem:[#allocation31_spill] sm:$0xff]  ;;  %v9237_v42 = vld [vmem:[#allocation32_spill] sm:$0xff] }
 0x7f6   :  { %5585 = vmatprep.subr.bf16.mxu0 %v9227_v46  ;;  %5649 = vmatprep.subr.bf16.mxu1 %v9228_v15  ;;  %v9238_v46 = vld [vmem:[#allocation33_spill] sm:$0xff]  ;;  %v9239_v15 = vld [vmem:[#allocation34_spill] sm:$0xff] }
 0x7f9   :  { %5587 = vmatpush1.bf16.msra.mxu0 %v9229_v30  ;;  %5651 = vmatpush1.bf16.msra.mxu1 %v9230_v6  ;;  %v9240_v30 = vld [vmem:[#allocation35_spill] sm:$0xff]  ;;  %v9241_v6 = vld [vmem:[#allocation36_spill] sm:$0xff] }
 0x7fa   :  { %5589 = vmatprep.subr.bf16.mxu0 %v9231_v56  ;;  %5653 = vmatprep.subr.bf16.mxu1 %v9232_v5  ;;  %v9242_v56 = vld [vmem:[#allocation37_spill] sm:$0xff]  ;;  %v9243_v5 = vld [vmem:[#allocation38_spill] sm:$0xff] }
 0x7fd   :  { %5591 = vmatpush1.bf16.msra.mxu0 %v9233_v0  ;;  %5655 = vmatpush1.bf16.msra.mxu1 %v9234_v49  ;;  %v9244_v0 = vld [vmem:[#allocation39_spill] sm:$0xff]  ;;  %v9245_v49 = vld [vmem:[#allocation40_spill] sm:$0xff] }
 0x7fe   :  { %5593 = vmatprep.subr.bf16.mxu0 %v9235_v13  ;;  %5657 = vmatprep.subr.bf16.mxu1 %v9236_v23  ;;  %v9246_v13 = vld [vmem:[#allocation41_spill] sm:$0xff]  ;;  %v9247_v23 = vld [vmem:[#allocation42_spill] sm:$0xff] }
 0x801   :  { %5595 = vmatpush1.bf16.msra.mxu0 %v9237_v42  ;;  %5659 = vmatpush1.bf16.msra.mxu1 %v9238_v46  ;;  %v9248_v42 = vld [vmem:[#allocation43_spill] sm:$0xff]  ;;  %v9249_v46 = vld [vmem:[#allocation44_spill] sm:$0xff] }
 0x802   :  { %5597 = vmatprep.subr.bf16.mxu0 %v9239_v15  ;;  %5661 = vmatprep.subr.bf16.mxu1 %v9240_v30  ;;  %v9250_v15 = vld [vmem:[#allocation45_spill] sm:$0xff]  ;;  %v9251_v30 = vld [vmem:[#allocation46_spill] sm:$0xff] }
 0x805   :  { %5599 = vmatpush1.bf16.msra.mxu0 %v9241_v6  ;;  %5663 = vmatpush1.bf16.msra.mxu1 %v9242_v56  ;;  %v9252_v6 = vld [vmem:[#allocation47_spill] sm:$0xff]  ;;  %v9253_v56 = vld [vmem:[#allocation48_spill] sm:$0xff] }
 0x806   :  { %5601 = vmatprep.subr.bf16.mxu0 %v9243_v5  ;;  %5665 = vmatprep.subr.bf16.mxu1 %v9244_v0  ;;  %v9254_v5 = vld [vmem:[#allocation49_spill] sm:$0xff]  ;;  %v9255_v0 = vld [vmem:[#allocation50_spill] sm:$0xff] }
 0x809   :  { %5603 = vmatpush1.bf16.msra.mxu0 %v9245_v49  ;;  %5667 = vmatpush1.bf16.msra.mxu1 %v9246_v13  ;;  %v9256_v49 = vld [vmem:[#allocation51_spill] sm:$0xff]  ;;  %v9257_v13 = vld [vmem:[#allocation52_spill] sm:$0xff] }
 0x80a   :  { %5605 = vmatprep.subr.bf16.mxu0 %v9247_v23  ;;  %5669 = vmatprep.subr.bf16.mxu1 %v9248_v42  ;;  %v9258_v23 = vld [vmem:[#allocation53_spill] sm:$0xff]  ;;  %v9259_v42 = vld [vmem:[#allocation54_spill] sm:$0xff] }
 0x80d   :  { %5607 = vmatpush1.bf16.msra.mxu0 %v9249_v46  ;;  %5671 = vmatpush1.bf16.msra.mxu1 %v9250_v15  ;;  %v9260_v46 = vld [vmem:[#allocation55_spill] sm:$0xff]  ;;  %v9261_v15 = vld [vmem:[#allocation56_spill] sm:$0xff] }
 0x80e   :  { %5609 = vmatprep.subr.bf16.mxu0 %v9251_v30  ;;  %5673 = vmatprep.subr.bf16.mxu1 %v9252_v6  ;;  %v9262_v30 = vld [vmem:[#allocation57_spill] sm:$0xff]  ;;  %v9263_v6 = vld [vmem:[#allocation58_spill] sm:$0xff] }
 0x811   :  { %5611 = vmatpush1.bf16.msra.mxu0 %v9253_v56  ;;  %5675 = vmatpush1.bf16.msra.mxu1 %v9254_v5  ;;  %v9264_v56 = vld [vmem:[#allocation59_spill] sm:$0xff]  ;;  %v9265_v5 = vld [vmem:[#allocation60_spill] sm:$0xff] }
 0x812   :  { %5613 = vmatprep.subr.bf16.mxu0 %v9255_v0  ;;  %5677 = vmatprep.subr.bf16.mxu1 %v9256_v49  ;;  %v9266_v0 = vld [vmem:[#allocation61_spill] sm:$0xff]  ;;  %v9267_v49 = vld [vmem:[#allocation62_spill] sm:$0xff] }
 0x815   :  { %5615 = vmatpush1.bf16.msra.mxu0 %v9257_v13  ;;  %5679 = vmatpush1.bf16.msra.mxu1 %v9258_v23  ;;  %v9268_v13 = vld [vmem:[#allocation63_spill] sm:$0xff]  ;;  %v9269_v23 = vld [vmem:[#allocation64_spill] sm:$0xff] }
 0x816   :  { %5617 = vmatprep.subr.bf16.mxu0 %v9259_v42  ;;  %5681 = vmatprep.subr.bf16.mxu1 %v9260_v46  ;;  %v9270_v42 = vld [vmem:[#allocation65_spill] sm:$0xff]  ;;  %v9271_v46 = vld [vmem:[#allocation66_spill] sm:$0xff] }
 0x819   :  { %5619 = vmatpush1.bf16.msra.mxu0 %v9261_v15  ;;  %5683 = vmatpush1.bf16.msra.mxu1 %v9262_v30  ;;  %v9272_v15 = vld [vmem:[#allocation67_spill] sm:$0xff]  ;;  %v9273_v30 = vld [vmem:[#allocation68_spill] sm:$0xff] }
 0x81a   :  { %5621 = vmatprep.subr.bf16.mxu0 %v9263_v6  ;;  %5685 = vmatprep.subr.bf16.mxu1 %v9264_v56  ;;  %v9274_v6 = vld [vmem:[#allocation69_spill] sm:$0xff]  ;;  %v9275_v56 = vld [vmem:[#allocation70_spill] sm:$0xff] }
 0x81d   :  { %5623 = vmatpush1.bf16.msra.mxu0 %v9265_v5  ;;  %5687 = vmatpush1.bf16.msra.mxu1 %v9266_v0  ;;  %v9276_v5 = vld [vmem:[#allocation71_spill] sm:$0xff]  ;;  %v9277_v0 = vld [vmem:[#allocation72_spill] sm:$0xff] }
 0x81e   :  { %5625 = vmatprep.subr.bf16.mxu0 %v9267_v49  ;;  %5689 = vmatprep.subr.bf16.mxu1 %v9268_v13  ;;  %v9278_v49 = vld [vmem:[#allocation73_spill] sm:$0xff]  ;;  %v9279_v13 = vld [vmem:[#allocation74_spill] sm:$0xff] }
 0x821   :  { %5627 = vmatpush1.bf16.msra.mxu0 %v9269_v23  ;;  %5691 = vmatpush1.bf16.msra.mxu1 %v9270_v42  ;;  %v9280_v23 = vld [vmem:[#allocation75_spill] sm:$0xff]  ;;  %v9281_v42 = vld [vmem:[#allocation76_spill] sm:$0xff] }
 0x822   :  { %5629 = vmatprep.subr.bf16.mxu0 %v9271_v46  ;;  %5693 = vmatprep.subr.bf16.mxu1 %v9272_v15  ;;  %v9282_v46 = vld [vmem:[#allocation77_spill] sm:$0xff]  ;;  %v9283_v15 = vld [vmem:[#allocation78_spill] sm:$0xff] }
 0x825   :  { %5631 = vmatpush1.bf16.msra.mxu0 %v9273_v30  ;;  %5695 = vmatpush1.bf16.msra.mxu1 %v9274_v6  ;;  %v9284_v30 = vld [vmem:[#allocation79_spill] sm:$0xff] }
 0x826   :  { %5633 = vmatprep.subr.bf16.mxu0 %v9275_v56  ;;  %5697 = vmatprep.subr.bf16.mxu1 %v9276_v5 }
 0x829   :  { %5635 = vmatpush1.bf16.msra.mxu0 %v9277_v0  ;;  %5699 = vmatpush1.bf16.msra.mxu1 %v9278_v49  ;;  %v269_v0 = vpop.permute.xlu0 %268  ;;  %v227_v49 = vmul.f32 %v9285_v61, %v98_v7 }
 0x82a   :  { %5637 = vmatprep.subr.bf16.mxu0 %v9279_v13  ;;  %5701 = vmatprep.subr.bf16.mxu1 %v9280_v23  ;;  %v395_v13 = vmul.f32 %v9286_v10, %v269_v0  ;;  %v229_v23 = vmul.f32 %v9287_v47, %v98_v7  ;;  %v398_v55 = vmul.f32 %v9292_v26, %v269_v0 }
 0x82c   :  { %v459_v57 = vadd.f32 %v395_v13, %v227_v49 }
 0x82d   :  { %5639 = vmatpush1.bf16.msra.mxu0 %v9281_v42  ;;  %5703 = vmatpush1.bf16.msra.mxu1 %v9282_v46  ;;  %v397_v42 = vmul.f32 %v9288_v34, %v269_v0  ;;  %v228_v46 = vmul.f32 %v9289_v45, %v98_v7 }
 0x82e   :  { %5705 = vmatprep.subr.bf16.mxu0 %v9283_v15  ;;  %5769 = vmatprep.subr.bf16.mxu1 %v9284_v30  ;;  %v396_v15 = vmul.f32 %v9290_v11, %v269_v0  ;;  %v230_v30 = vmul.f32 %v9291_v41, %v98_v7  ;;  %v565_v61 = vadd.f32 %v6902_v3, %v459_v57 }
 0x82f   :  { %v461_v38 = vadd.f32 %v397_v42, %v229_v23  ;;  %v231_v57 = vmul.f32 %v6932_v54, %v98_v7 }
 0x830   :  { %v460_v51 = vadd.f32 %v396_v15, %v228_v46  ;;  %v462_v44 = vadd.f32 %v398_v55, %v230_v30  ;;  %v233_v55 = vmul.f32 %v6938_v48, %v98_v7 }
 0x831   :  { %v567_v10 = vadd.f32 %v6906_v21, %v461_v38  ;;  %v399_v38 = vmul.f32 %v6935_v58, %v269_v0 }
 0x832   :  { %v566_v47 = vadd.f32 %v6910_v19, %v460_v51  ;;  %v568_v45 = vadd.f32 %v6914_v14, %v462_v44  ;;  %v401_v51 = vmul.f32 %v6941_v53, %v269_v0  ;;  %v232_v44 = vmul.f32 %v8693_v8, %v98_v7 }
 0x883   :  { %v2943_v6 = vpop.f32.mrb[24].mxu0  ;;  %v3014_v56 = vpop.f32.mrb[24].mxu1 }
 0x884   :  { %v2945_v20 = vpop.f32.mrb[25].mxu0  ;;  %v3016_v5 = vpop.f32.mrb[25].mxu1  ;;  %v3161_v39 = vadd.f32 %v2943_v6, %v565_v61  ;;  %v3163_v34 = vadd.f32 %v3014_v56, %v567_v10 }
 0x885   :  { %v3162_v35 = vadd.f32 %v2945_v20, %v566_v47  ;;  %v3164_v11 = vadd.f32 %v3016_v5, %v568_v45  ;;  %v463_v45 = vadd.f32 %v399_v38, %v231_v57 }
 0x886   :  { %v3772_v36 = vmul.f32 -1.442695, %v3161_v39  ;;  %v3774_v41 = vmul.f32 -1.442695, %v3163_v34  ;;  %v400_v39 = vmul.f32 %v8694_v17, %v269_v0  ;;  %v465_v34 = vadd.f32 %v401_v51, %v233_v55 }
 0x887   :  { %v3773_v2 = vmul.f32 -1.442695, %v3162_v35  ;;  %v3775_v26 = vmul.f32 -1.442695, %v3164_v11  ;;  %v234_v35 = vmul.f32 %v6950_v12, %v98_v7  ;;  %v569_v5 = vadd.f32 %v6973_v24, %v463_v45 }
 0x888   :  { %6104 = vpow2.f32 %v3772_v36  ;;  %v402_v36 = vmul.f32 %v8695_v40, %v269_v0  ;;  %v464_v61 = vadd.f32 %v400_v39, %v232_v44  ;;  %v571_v49 = vadd.f32 %v6977_v31, %v465_v34 }
 0x889   :  { %6106 = vpow2.f32 %v3774_v41 }
 0x88a   :  { %6108 = vpow2.f32 %v3773_v2  ;;  %v466_v20 = vadd.f32 %v402_v36, %v234_v35  ;;  %v570_v0 = vadd.f32 %v6981_v63, %v464_v61 }
 0x88b   :  { %6110 = vpow2.f32 %v3775_v26 }
 0x88c   :  { %v572_v23 = vadd.f32 %v6985_v62, %v466_v20 }
 0x892   :  { %v6105_v10 = vpop.eup %6104 }
 0x893   :  { %v6107_v41 = vpop.eup %6106  ;;  %v3175_v11 = vadd.f32 1.0, %v6105_v10 }
 0x894   :  { %v6109_v2 = vpop.eup %6108  ;;  %v3187_v47 = vadd.f32 1.0, %v6107_v41 }
 0x895   :  { %v6111_v26 = vpop.eup %6110  ;;  %v3176_v6 = vadd.f32 1.0, %v6109_v2  ;;  %6112 = vrcp.f32 %v3175_v11 }
 0x896   :  { %v3188_v56 = vadd.f32 1.0, %v6111_v26  ;;  %6114 = vrcp.f32 %v3187_v47 }
 0x897   :  { %6116 = vrcp.f32 %v3176_v6 }
 0x898   :  { %6118 = vrcp.f32 %v3188_v56 }
 0x89f   :  { %v6113_v10 = vpop.eup %6112 }
 0x8a0   :  { %v6115_v44 = vpop.eup %6114 }
 0x8a1   :  { %v6117_v39 = vpop.eup %6116  ;;  %v3207_v2 = vmul.f32 %v6115_v44, %v7821_v33  ;;  %v9320_v44 = vld [vmem:[#allocation123_spill] sm:$0xff] }
 0x8a2   :  { %v6119_v35 = vpop.eup %6118 }
 0x8a3   :  { %v3208_v45 = vmul.f32 %v6119_v35, %v7823_v52  ;;  %v9322_v35 = vld [vmem:[#allocation125_spill] sm:$0xff] }
 0x8c3   :  { %v3085_v7 = vpop.f32.mrb[26].mxu0  ;;  %v3156_v13 = vpop.f32.mrb[26].mxu1 }
 0x8c4   :  { %v3165_v42 = vadd.f32 %v3085_v7, %v569_v5  ;;  %v3167_v46 = vadd.f32 %v3156_v13, %v571_v49  ;;  %v3087_v15 = vpop.f32.mrb[27].mxu0  ;;  %v3158_v30 = vpop.f32.mrb[27].mxu1 }
 0x8c5   :  { %v3166_v57 = vadd.f32 %v3087_v15, %v570_v0  ;;  %v3168_v38 = vadd.f32 %v3158_v30, %v572_v23  ;;  %v9309_v0 = vld [vmem:[#allocation112_spill] sm:$0xff]  ;;  %v9310_v23 = vld [vmem:[#allocation113_spill] sm:$0xff] }
 0x8c6   :  { %6120 = vtanh.f32 %v3165_v42  ;;  %v3776_v55 = vmul.f32 -1.442695, %v3167_v46  ;;  %v9311_v42 = vld [vmem:[#allocation114_spill] sm:$0xff]  ;;  %v9312_v46 = vld [vmem:[#allocation115_spill] sm:$0xff]  ;;  %v9313_v15 = vld [vmem:[#allocation116_spill] sm:$0xff] }
 0x8c7   :  { %6122 = vtanh.f32 %v3166_v57  ;;  %v3777_v51 = vmul.f32 -1.442695, %v3168_v38  ;;  %v9314_v30 = vld [vmem:[#allocation117_spill] sm:$0xff]  ;;  %v9315_v57 = vld [vmem:[#allocation118_spill] sm:$0xff]  ;;  %v9316_v38 = vld [vmem:[#allocation119_spill] sm:$0xff] }
 0x8c8   :  { %6124 = vpow2.f32 %v3776_v55  ;;  %v9317_v55 = vld [vmem:[#allocation120_spill] sm:$0xff] }
 0x8c9   :  { %6126 = vpow2.f32 %v3777_v51  ;;  %v9318_v51 = vld [vmem:[#allocation121_spill] sm:$0xff] }
 0x8d0   :  { %v6121_v36 = vpop.eup %6120 }
 0x8d1   :  { %v6123_v41 = vpop.eup %6122  ;;  %v3209_v26 = vmul.f32 %v6121_v36, %v6113_v10  ;;  %v9319_v10 = vld [vmem:[#allocation122_spill] sm:$0xff] }
 0x8d2   :  { %v6125_v11 = vpop.eup %6124  ;;  %v3210_v34 = vmul.f32 %v6123_v41, %v6117_v39  ;;  %v9321_v39 = vld [vmem:[#allocation124_spill] sm:$0xff]  ;;  %v9323_v36 = vld [vmem:[#allocation126_spill] sm:$0xff]  ;;  %v9324_v41 = vld [vmem:[#allocation127_spill] sm:$0xff] }
 0x8d3   :  { %v6127_v47 = vpop.eup %6126  ;;  %v7987_v61 = vadd.f32 %v3209_v26, %v3207_v2  ;;  %v3201_v20 = vadd.f32 1.0, %v6125_v11  ;;  %v9325_v2 = vld [vmem:[#allocation128_spill] sm:$0xff]  ;;  %v9326_v26 = vld [vmem:[#allocation129_spill] sm:$0xff]  ;;  %v9327_v11 = vld [vmem:[#allocation130_spill] sm:$0xff] }
 0x8d4   :  { %v7989_v6 = vadd.f32 %v3210_v34, %v3208_v45  ;;  %v3202_v56 = vadd.f32 1.0, %v6127_v47  ;;  %v9328_v45 = vld [vmem:[#allocation131_spill] sm:$0xff]  ;;  %v9329_v34 = vld [vmem:[#allocation132_spill] sm:$0xff]  ;;  %v9330_v47 = vld [vmem:[#allocation133_spill] sm:$0xff] }
 0x8d5   :  { %6128 = vtanh.f32 %v7987_v61 }
 0x8d6   :  { %6130 = vrcp.f32 %v3201_v20  ;;  %v9331_v20 = vld [vmem:[#allocation134_spill] sm:$0xff] }
 0x8d7   :  { %6132 = vtanh.f32 %v7989_v6 }
 0x8d8   :  { %6134 = vrcp.f32 %v3202_v56  ;;  %v9332_v56 = vld [vmem:[#allocation135_spill] sm:$0xff] }
 0x8df   :  { %v6129_v5 = vpop.eup %6128 }
 0x8e0   :  { %v6131_v33 = vpop.eup %6130 }
 0x8e1   :  { %v6133_v49 = vpop.eup %6132  ;;  %v7993_v52 = vmul.f32 %v6131_v33, %v6129_v5  ;;  %v9333_v5 = vld [vmem:[#allocation136_spill] sm:$0xff]  ;;  %v9334_v33 = vld [vmem:[#allocation137_spill] sm:$0xff] }
 0x8e2   :  { %v6135_v7 = vpop.eup %6134 }
 0x8e3   :  { %v3216_v13 = vmul.f32 %v6135_v7, %v6133_v49  ;;  %v9335_v49 = vld [vmem:[#allocation138_spill] sm:$0xff]  ;;  %v9336_v7 = vld [vmem:[#allocation139_spill] sm:$0xff] }
 0x8e5   :  { %3281 = vmatprep.mubr.f32.mxu0 %v3216_v13  ;;  %3352 = vmatprep.mubr.f32.mxu1 %v3216_v13 }
 0x8e6   :  { %3282 = vmatmul.mubr.f32.vlgmr.msra.gmra.mrb[28].mxu0 %v7993_v52  ;;  %3353 = vmatmul.mubr.f32.vlgmr.msra.gmra.mrb[28].mxu1 %v7993_v52 }
 0x8e7   :  { %5707 = vmatpush1.bf16.msra.mxu0 %v8585_v25  ;;  %5771 = vmatpush1.bf16.msra.mxu1 %v8586_v59  ;;  %v9293_v25 = vld [vmem:[#allocation96_spill] sm:$0xff]  ;;  %v9294_v59 = vld [vmem:[#allocation97_spill] sm:$0xff] }
 0x8e8   :  { %3423 = vmatprep.mubr.f32.mxu0 %v3216_v13  ;;  %3494 = vmatprep.mubr.f32.mxu1 %v3216_v13  ;;  %v9337_v13 = vld [vmem:[#allocation140_spill] sm:$0xff] }
 0x8e9   :  { %5709 = vmatprep.subr.bf16.mxu0 %v8587_v29  ;;  %5773 = vmatprep.subr.bf16.mxu1 %v8588_v50  ;;  %v9295_v29 = vld [vmem:[#allocation98_spill] sm:$0xff]  ;;  %v9296_v50 = vld [vmem:[#allocation99_spill] sm:$0xff] }
 0x8eb   :  { %5711 = vmatpush1.bf16.msra.mxu0 %v8589_v43  ;;  %5775 = vmatpush1.bf16.msra.mxu1 %v8590_v1  ;;  %v9297_v43 = vld [vmem:[#allocation100_spill] sm:$0xff]  ;;  %v9298_v1 = vld [vmem:[#allocation101_spill] sm:$0xff] }
 0x8ec   :  { %5713 = vmatprep.subr.bf16.mxu0 %v8591_v60  ;;  %5777 = vmatprep.subr.bf16.mxu1 %v8592_v37  ;;  %v9299_v60 = vld [vmem:[#allocation102_spill] sm:$0xff]  ;;  %v9300_v37 = vld [vmem:[#allocation103_spill] sm:$0xff] }
 0x8ef   :  { %5715 = vmatpush1.bf16.msra.mxu0 %v8593_v16  ;;  %5779 = vmatpush1.bf16.msra.mxu1 %v8696_v18  ;;  %v9301_v16 = vld [vmem:[#allocation104_spill] sm:$0xff]  ;;  %v9302_v18 = vld [vmem:[#allocation105_spill] sm:$0xff] }
 0x8f0   :  { %5717 = vmatprep.subr.bf16.mxu0 %v8697_v22  ;;  %5781 = vmatprep.subr.bf16.mxu1 %v8698_v27  ;;  %v9303_v22 = vld [vmem:[#allocation106_spill] sm:$0xff]  ;;  %v9304_v27 = vld [vmem:[#allocation107_spill] sm:$0xff] }
 0x8f3   :  { %5719 = vmatpush1.bf16.msra.mxu0 %v8699_v28  ;;  %5783 = vmatpush1.bf16.msra.mxu1 %v8700_v9  ;;  %v9305_v28 = vld [vmem:[#allocation108_spill] sm:$0xff]  ;;  %v9306_v9 = vld [vmem:[#allocation109_spill] sm:$0xff] }
 0x8f4   :  { %5721 = vmatprep.subr.bf16.mxu0 %v8701_v4  ;;  %5785 = vmatprep.subr.bf16.mxu1 %v8702_v32  ;;  %v9307_v4 = vld [vmem:[#allocation110_spill] sm:$0xff]  ;;  %v9308_v32 = vld [vmem:[#allocation111_spill] sm:$0xff] }
 0x8f7   :  { %5723 = vmatpush1.bf16.msra.mxu0 %v9293_v25  ;;  %5787 = vmatpush1.bf16.msra.mxu1 %v9294_v59  ;;  %v9338_v25 = vld [vmem:[#allocation141_spill] sm:$0xff]  ;;  %v3558_v59 = vld [vmem:[#allocation5 + $0x8] sm:$0xff] }
 0x8f8   :  { %5725 = vmatprep.subr.bf16.mxu0 %v9295_v29  ;;  %5789 = vmatprep.subr.bf16.mxu1 %v9296_v50  ;;  %v3560_v29 = vld [vmem:[#allocation5 + $0x18] sm:$0xff] }
 0x8f9   :  { %v5832_v50 = vpack.c.bf16 %v3560_v29, %v3558_v59  ;;  %v3587_v59 = vld [vmem:[#allocation5 + $0xf0] sm:$0xff] }
 0x8fb   :  { %5727 = vmatpush1.bf16.msra.mxu0 %v9297_v43  ;;  %5791 = vmatpush1.bf16.msra.mxu1 %v9298_v1  ;;  %v3557_v43 = vld [vmem:[#allocation5] sm:$0xff]  ;;  %v3559_v1 = vld [vmem:[#allocation5 + $0x10] sm:$0xff] }
 0x8fc   :  { %5729 = vmatprep.subr.bf16.mxu0 %v9299_v60  ;;  %5793 = vmatprep.subr.bf16.mxu1 %v9300_v37  ;;  %v3562_v60 = vld [vmem:[#allocation5 + $0x28] sm:$0xff]  ;;  %v5834_v37 = vpack.c.bf16 %v3559_v1, %v3557_v43  ;;  %v3592_v43 = vld [vmem:[#allocation5 + $0x118] sm:$0xff] }
 0x8ff   :  { %5731 = vmatpush1.bf16.msra.mxu0 %v9301_v16  ;;  %5795 = vmatpush1.bf16.msra.mxu1 %v9302_v18  ;;  %v3564_v16 = vld [vmem:[#allocation5 + $0x38] sm:$0xff]  ;;  %v3561_v18 = vld [vmem:[#allocation5 + $0x20] sm:$0xff] }
 0x900   :  { %5733 = vmatprep.subr.bf16.mxu0 %v9303_v22  ;;  %5797 = vmatprep.subr.bf16.mxu1 %v9304_v27  ;;  %v3563_v22 = vld [vmem:[#allocation5 + $0x30] sm:$0xff]  ;;  %v5836_v27 = vpack.c.bf16 %v3564_v16, %v3562_v60  ;;  %v3589_v60 = vld [vmem:[#allocation5 + $0x100] sm:$0xff] }
 0x903   :  { %5735 = vmatpush1.bf16.msra.mxu0 %v9305_v28  ;;  %5799 = vmatpush1.bf16.msra.mxu1 %v9306_v9  ;;  %v3566_v28 = vld [vmem:[#allocation5 + $0x48] sm:$0xff]  ;;  %v3568_v9 = vld [vmem:[#allocation5 + $0x58] sm:$0xff] }
 0x904   :  { %5737 = vmatprep.subr.bf16.mxu0 %v9307_v4  ;;  %5801 = vmatprep.subr.bf16.mxu1 %v9308_v32  ;;  %v5838_v4 = vpack.c.bf16 %v3563_v22, %v3561_v18  ;;  %v5840_v32 = vpack.c.bf16 %v3568_v9, %v3566_v28  ;;  %v3594_v18 = vld [vmem:[#allocation5 + $0x128] sm:$0xff]  ;;  %v3596_v22 = vld [vmem:[#allocation5 + $0x138] sm:$0xff]  ;;  %v3593_v28 = vld [vmem:[#allocation5 + $0x120] sm:$0xff] }
 0x905   :  { %v3595_v9 = vld [vmem:[#allocation5 + $0x130] sm:$0xff] }
 0x907   :  { %5739 = vmatpush1.bf16.msra.mxu0 %v9309_v0  ;;  %5803 = vmatpush1.bf16.msra.mxu1 %v9310_v23  ;;  %v3565_v0 = vld [vmem:[#allocation5 + $0x40] sm:$0xff]  ;;  %v3570_v23 = vld [vmem:[#allocation5 + $0x68] sm:$0xff] }
 0x908   :  { %5741 = vmatprep.subr.bf16.mxu0 %v9311_v42  ;;  %5805 = vmatprep.subr.bf16.mxu1 %v9312_v46  ;;  %v3572_v42 = vld [vmem:[#allocation5 + $0x78] sm:$0xff] }
 0x90b   :  { %5743 = vmatpush1.bf16.msra.mxu0 %v9313_v15  ;;  %5807 = vmatpush1.bf16.msra.mxu1 %v9314_v30  ;;  %v5844_v15 = vpack.c.bf16 %v3572_v42, %v3570_v23  ;;  %v3569_v30 = vld [vmem:[#allocation5 + $0x60] sm:$0xff]  ;;  %v3599_v42 = vld [vmem:[#allocation5 + $0x150] sm:$0xff] }
 0x90c   :  { %5745 = vmatprep.subr.bf16.mxu0 %v9315_v57  ;;  %5809 = vmatprep.subr.bf16.mxu1 %v9316_v38  ;;  %v3571_v57 = vld [vmem:[#allocation5 + $0x70] sm:$0xff]  ;;  %v3574_v38 = vld [vmem:[#allocation5 + $0x88] sm:$0xff]  ;;  %v3597_v23 = vld [vmem:[#allocation5 + $0x140] sm:$0xff] }
 0x90f   :  { %5747 = vmatpush1.bf16.msra.mxu0 %v9317_v55  ;;  %5811 = vmatpush1.bf16.msra.mxu1 %v9318_v51  ;;  %v3576_v55 = vld [vmem:[#allocation5 + $0x98] sm:$0xff]  ;;  %v5846_v51 = vpack.c.bf16 %v3571_v57, %v3569_v30 }
 0x910   :  { %5749 = vmatprep.subr.bf16.mxu0 %v9319_v10  ;;  %5813 = vmatprep.subr.bf16.mxu1 %v9320_v44  ;;  %v5848_v10 = vpack.c.bf16 %v3576_v55, %v3574_v38  ;;  %v3573_v44 = vld [vmem:[#allocation5 + $0x80] sm:$0xff]  ;;  %v3604_v30 = vld [vmem:[#allocation5 + $0x178] sm:$0xff]  ;;  %v3603_v55 = vld [vmem:[#allocation5 + $0x170] sm:$0xff] }
 0x911   :  { %v3601_v38 = vld [vmem:[#allocation5 + $0x160] sm:$0xff] }
 0x913   :  { %5751 = vmatpush1.bf16.msra.mxu0 %v9321_v39  ;;  %5815 = vmatpush1.bf16.msra.mxu1 %v9322_v35  ;;  %v3575_v39 = vld [vmem:[#allocation5 + $0x90] sm:$0xff]  ;;  %v3578_v35 = vld [vmem:[#allocation5 + $0xa8] sm:$0xff] }
 0x914   :  { %5753 = vmatprep.subr.bf16.mxu0 %v9323_v36  ;;  %5817 = vmatprep.subr.bf16.mxu1 %v9324_v41  ;;  %v3580_v36 = vld [vmem:[#allocation5 + $0xb8] sm:$0xff]  ;;  %v5850_v41 = vpack.c.bf16 %v3575_v39, %v3573_v44 }
 0x915   :  { %v3608_v44 = vld [vmem:[#allocation5 + $0x198] sm:$0xff] }
 0x917   :  { %5755 = vmatpush1.bf16.msra.mxu0 %v9325_v2  ;;  %5819 = vmatpush1.bf16.msra.mxu1 %v9326_v26  ;;  %v5852_v2 = vpack.c.bf16 %v3580_v36, %v3578_v35  ;;  %v3577_v26 = vld [vmem:[#allocation5 + $0xa0] sm:$0xff]  ;;  %v3607_v36 = vld [vmem:[#allocation5 + $0x190] sm:$0xff] }
 0x918   :  { %5757 = vmatprep.subr.bf16.mxu0 %v9327_v11  ;;  %5821 = vmatprep.subr.bf16.mxu1 %v9328_v45  ;;  %v3579_v11 = vld [vmem:[#allocation5 + $0xb0] sm:$0xff]  ;;  %v3582_v45 = vld [vmem:[#allocation5 + $0xc8] sm:$0xff]  ;;  %v3605_v35 = vld [vmem:[#allocation5 + $0x180] sm:$0xff] }
 0x91b   :  { %5759 = vmatpush1.bf16.msra.mxu0 %v9329_v34  ;;  %5823 = vmatpush1.bf16.msra.mxu1 %v9330_v47  ;;  %v3584_v34 = vld [vmem:[#allocation5 + $0xd8] sm:$0xff]  ;;  %v5854_v47 = vpack.c.bf16 %v3579_v11, %v3577_v26 }
 0x91c   :  { %5761 = vmatprep.subr.bf16.mxu0 %v9331_v20  ;;  %5825 = vmatprep.subr.bf16.mxu1 %v9332_v56  ;;  %v5856_v20 = vpack.c.bf16 %v3584_v34, %v3582_v45  ;;  %v3581_v56 = vld [vmem:[#allocation5 + $0xc0] sm:$0xff]  ;;  %v3612_v26 = vld [vmem:[#allocation5 + $0x1b8] sm:$0xff]  ;;  %v3611_v34 = vld [vmem:[#allocation5 + $0x1b0] sm:$0xff] }
 0x91d   :  { %v3609_v45 = vld [vmem:[#allocation5 + $0x1a0] sm:$0xff] }
 0x91f   :  { %5763 = vmatpush1.bf16.msra.mxu0 %v9333_v5  ;;  %5827 = vmatpush1.bf16.msra.mxu1 %v9334_v33  ;;  %v3583_v5 = vld [vmem:[#allocation5 + $0xd0] sm:$0xff]  ;;  %v3586_v33 = vld [vmem:[#allocation5 + $0xe8] sm:$0xff] }
 0x920   :  { %5765 = vmatprep.subr.bf16.mxu0 %v9335_v49  ;;  %5829 = vmatprep.subr.bf16.mxu1 %v9336_v7  ;;  %v3588_v49 = vld [vmem:[#allocation5 + $0xf8] sm:$0xff]  ;;  %v5858_v7 = vpack.c.bf16 %v3583_v5, %v3581_v56  ;;  %v3613_v5 = vld [vmem:[#allocation5 + $0x1c0] sm:$0xff] }
 0x921   :  { %v3616_v56 = vld [vmem:[#allocation5 + $0x1d8] sm:$0xff] }
 0x923   :  { %5767 = vmatpush1.bf16.msra.mxu0 %v9337_v13  ;;  %5831 = vmatpush1.bf16.msra.mxu1 %v9338_v25  ;;  %v5860_v13 = vpack.c.bf16 %v3588_v49, %v3586_v33  ;;  %v3585_v25 = vld [vmem:[#allocation5 + $0xe0] sm:$0xff]  ;;  %v3615_v33 = vld [vmem:[#allocation5 + $0x1d0] sm:$0xff] }
 0x924   :  { %5833 = vmatprep.subr.bf16.mxu0 %v5832_v50  ;;  %v5862_v29 = vpack.c.bf16 %v3587_v59, %v3585_v25  ;;  %v3590_v50 = vld [vmem:[#allocation5 + $0x108] sm:$0xff]  ;;  %v5890_v25 = vpack.c.bf16 %v3615_v33, %v3613_v5 }
 0x925   :  { %v5864_v1 = vpack.c.bf16 %v3592_v43, %v3590_v50  ;;  %v3619_v50 = vld [vmem:[#allocation5 + $0x1f0] sm:$0xff] }
 0x926   :  { %3424 = vmatmul.mubr.f32.vlgmr.msra.gmra.mrb[30].mxu0 %v7993_v52  ;;  %3495 = vmatmul.mubr.f32.vlgmr.msra.gmra.mrb[30].mxu1 %v7993_v52  ;;  %v3567_v52 = vld [vmem:[#allocation5 + $0x50] sm:$0xff] }
 0x927   :  { %5835 = vmatpush1.bf16.msra.mxu0 %v5834_v37  ;;  %v5842_v46 = vpack.c.bf16 %v3567_v52, %v3565_v0  ;;  %v3591_v37 = vld [vmem:[#allocation5 + $0x110] sm:$0xff]  ;;  %v3600_v0 = vld [vmem:[#allocation5 + $0x158] sm:$0xff] }
 0x928   :  { %5837 = vmatprep.subr.bf16.mxu0 %v5836_v27  ;;  %v5866_v16 = vpack.c.bf16 %v3591_v37, %v3589_v60  ;;  %v5868_v27 = vpack.c.bf16 %v3596_v22, %v3594_v18  ;;  %v103_v18 = vpop.permute.xlu1 %102  ;;  %v273_v22 = vpop.permute.xlu0 %272 }
 0x92b   :  { %5839 = vmatpush1.bf16.msra.mxu0 %v5838_v4  ;;  %v5870_v4 = vpack.c.bf16 %v3595_v9, %v3593_v28  ;;  %v9340_v9 = vld [vmem:[#allocation145_spill] sm:$0xff] }
 0x92c   :  { %5841 = vmatprep.subr.bf16.mxu0 %v5840_v32  ;;  %v3598_v32 = vld [vmem:[#allocation5 + $0x148] sm:$0xff] }
 0x92d   :  { %v5872_v52 = vpack.c.bf16 %v3600_v0, %v3598_v32  ;;  %v9341_v32 = vld [vmem:[#allocation146_spill] sm:$0xff] }
 0x92e   :  { %v237_v0 = vmul.f32 %v9341_v32, %v103_v18 }
 0x92f   :  { %5843 = vmatpush1.bf16.msra.mxu0 %v5842_v46  ;;  %v5874_v46 = vpack.c.bf16 %v3599_v42, %v3597_v23  ;;  %v9343_v42 = vld [vmem:[#allocation148_spill] sm:$0xff] }
 0x930   :  { %5845 = vmatprep.subr.bf16.mxu0 %v5844_v15  ;;  %v3602_v15 = vld [vmem:[#allocation5 + $0x168] sm:$0xff] }
 0x931   :  { %v5876_v57 = vpack.c.bf16 %v3604_v30, %v3602_v15  ;;  %v9344_v15 = vld [vmem:[#allocation149_spill] sm:$0xff] }
 0x932   :  { %v404_v30 = vmul.f32 %v9344_v15, %v273_v22 }
 0x933   :  { %5847 = vmatpush1.bf16.msra.mxu0 %v5846_v51  ;;  %v5878_v51 = vpack.c.bf16 %v3603_v55, %v3601_v38  ;;  %v9346_v55 = vld [vmem:[#allocation151_spill] sm:$0xff] }
 0x934   :  { %5849 = vmatprep.subr.bf16.mxu0 %v5848_v10  ;;  %v3606_v10 = vld [vmem:[#allocation5 + $0x188] sm:$0xff] }
 0x935   :  { %v5880_v39 = vpack.c.bf16 %v3608_v44, %v3606_v10 }
 0x937   :  { %5851 = vmatpush1.bf16.msra.mxu0 %v5850_v41  ;;  %v5882_v41 = vpack.c.bf16 %v3607_v36, %v3605_v35 }
 0x938   :  { %5853 = vmatprep.subr.bf16.mxu0 %v5852_v2  ;;  %v3610_v2 = vld [vmem:[#allocation5 + $0x1a8] sm:$0xff] }
 0x939   :  { %v5884_v11 = vpack.c.bf16 %v3612_v26, %v3610_v2 }
 0x93b   :  { %5855 = vmatpush1.bf16.msra.mxu0 %v5854_v47  ;;  %v3614_v47 = vld [vmem:[#allocation5 + $0x1c8] sm:$0xff] }
 0x93c   :  { %5857 = vmatprep.subr.bf16.mxu0 %v5856_v20  ;;  %v5886_v20 = vpack.c.bf16 %v3611_v34, %v3609_v45  ;;  %v5888_v49 = vpack.c.bf16 %v3616_v56, %v3614_v47 }
 0x93f   :  { %5859 = vmatpush1.bf16.msra.mxu0 %v5858_v7  ;;  %v3618_v7 = vld [vmem:[#allocation5 + $0x1e8] sm:$0xff] }
 0x940   :  { %5861 = vmatprep.subr.bf16.mxu0 %v5860_v13  ;;  %v3620_v13 = vld [vmem:[#allocation5 + $0x1f8] sm:$0xff] }
 0x941   :  { %v5892_v59 = vpack.c.bf16 %v3620_v13, %v3618_v7  ;;  %v408_v13 = vmul.f32 %v8694_v17, %v273_v22 }
 0x943   :  { %5863 = vmatpush1.bf16.msra.mxu0 %v5862_v29  ;;  %v3617_v29 = vld [vmem:[#allocation5 + $0x1e0] sm:$0xff] }
 0x944   :  { %5865 = vmatprep.subr.bf16.mxu0 %v5864_v1  ;;  %v5894_v43 = vpack.c.bf16 %v3619_v50, %v3617_v29 }
 0x947   :  { %5867 = vmatpush1.bf16.msra.mxu0 %v5866_v16 }
 0x948   :  { %5869 = vmatprep.subr.bf16.mxu0 %v5868_v27  ;;  %v9339_v27 = vld [vmem:[#allocation144_spill] sm:$0xff] }
 0x949   :  { %v235_v28 = vmul.f32 %v9339_v27, %v103_v18 }
 0x94b   :  { %5871 = vmatpush1.bf16.msra.mxu0 %v5870_v4  ;;  %v403_v4 = vmul.f32 %v9340_v9, %v273_v22 }
 0x94c   :  { %5873 = vmatprep.subr.bf16.mxu0 %v5872_v52  ;;  %v9342_v52 = vld [vmem:[#allocation147_spill] sm:$0xff] }
 0x94d   :  { %v405_v23 = vmul.f32 %v9342_v52, %v273_v22  ;;  %v467_v10 = vadd.f32 %v403_v4, %v235_v28 }
 0x94f   :  { %5875 = vmatpush1.bf16.msra.mxu0 %v5874_v46  ;;  %v236_v46 = vmul.f32 %v9343_v42, %v103_v18  ;;  %v469_v44 = vadd.f32 %v405_v23, %v237_v0  ;;  %v573_v36 = vadd.f32 %v6902_v3, %v467_v10  ;;  %v239_v3 = vmul.f32 %v6932_v54, %v103_v18 }
 0x950   :  { %5877 = vmatprep.subr.bf16.mxu0 %v5876_v57  ;;  %v9345_v57 = vld [vmem:[#allocation150_spill] sm:$0xff] }
 0x951   :  { %v238_v38 = vmul.f32 %v9345_v57, %v103_v18 }
 0x953   :  { %5879 = vmatpush1.bf16.msra.mxu0 %v5878_v51  ;;  %v406_v51 = vmul.f32 %v9346_v55, %v273_v22 }
 0x954   :  { %5881 = vmatprep.subr.bf16.mxu0 %v5880_v39  ;;  %v468_v39 = vadd.f32 %v404_v30, %v236_v46 }
 0x955   :  { %v470_v35 = vadd.f32 %v406_v51, %v238_v38 }
 0x956   :  { %v574_v26 = vadd.f32 %v6910_v19, %v468_v39  ;;  %v409_v19 = vmul.f32 %v6941_v53, %v273_v22 }
 0x957   :  { %5883 = vmatpush1.bf16.msra.mxu0 %v5882_v41  ;;  %v575_v41 = vadd.f32 %v6906_v21, %v469_v44  ;;  %v576_v45 = vadd.f32 %v6914_v14, %v470_v35  ;;  %v407_v21 = vmul.f32 %v6935_v58, %v273_v22  ;;  %v240_v14 = vmul.f32 %v8693_v8, %v103_v18 }
 0x958   :  { %5885 = vmatprep.subr.bf16.mxu0 %v5884_v11 }
 0x959   :  { %v471_v54 = vadd.f32 %v407_v21, %v239_v3 }
 0x95b   :  { %5887 = vmatpush1.bf16.msra.mxu0 %v5886_v20  ;;  %v577_v8 = vadd.f32 %v6973_v24, %v471_v54 }
 0x95c   :  { %5889 = vmatprep.subr.bf16.mxu0 %v5888_v49  ;;  %v241_v49 = vmul.f32 %v6938_v48, %v103_v18 }
 0x95f   :  { %5891 = vmatpush1.bf16.msra.mxu0 %v5890_v25  ;;  %v242_v25 = vmul.f32 %v6950_v12, %v103_v18 }
 0x960   :  { %5893 = vmatprep.subr.bf16.mxu0 %v5892_v59  ;;  %v410_v59 = vmul.f32 %v8695_v40, %v273_v22 }
 0x962   :  { %v474_v48 = vadd.f32 %v410_v59, %v242_v25 }
 0x963   :  { %5895 = vmatpush1.bf16.msra.mxu0 %v5894_v43 }
 0x964   :  { %v580_v22 = vadd.f32 %v6985_v62, %v474_v48 }
 0x9b9   :  { %v3283_v1 = vpop.f32.mrb[28].mxu0  ;;  %v3354_v60 = vpop.f32.mrb[28].mxu1 }
 0x9ba   :  { %v3285_v37 = vpop.f32.mrb[29].mxu0  ;;  %v3356_v16 = vpop.f32.mrb[29].mxu1  ;;  %v3501_v2 = vadd.f32 %v3283_v1, %v573_v36  ;;  %v3503_v11 = vadd.f32 %v3354_v60, %v575_v41  ;;  %v473_v60 = vadd.f32 %v409_v19, %v241_v49 }
 0x9bb   :  { %v3502_v34 = vadd.f32 %v3285_v37, %v574_v26  ;;  %v3504_v47 = vadd.f32 %v3356_v16, %v576_v45  ;;  %v472_v37 = vadd.f32 %v408_v13, %v240_v14  ;;  %v9347_v45 = vld [vmem:[#allocation142_spill] sm:$0xff] }
 0x9bc   :  { %v3778_v20 = vmul.f32 -1.442695, %v3501_v2  ;;  %v3780_v56 = vmul.f32 -1.442695, %v3503_v11  ;;  %v579_v17 = vadd.f32 %v6977_v31, %v473_v60 }
 0x9bd   :  { %v3779_v5 = vmul.f32 -1.442695, %v3502_v34  ;;  %v3781_v33 = vmul.f32 -1.442695, %v3504_v47  ;;  %v578_v40 = vadd.f32 %v6981_v63, %v472_v37  ;;  %v9348_v47 = vld [vmem:[#allocation143_spill] sm:$0xff] }
 0x9be   :  { %6136 = vpow2.f32 %v3778_v20 }
 0x9bf   :  { %6138 = vpow2.f32 %v3780_v56 }
 0x9c0   :  { %6140 = vpow2.f32 %v3779_v5 }
 0x9c1   :  { %6142 = vpow2.f32 %v3781_v33 }
 0x9c8   :  { %v6137_v7 = vpop.eup %6136 }
 0x9c9   :  { %v6139_v29 = vpop.eup %6138  ;;  %v3515_v1 = vadd.f32 1.0, %v6137_v7 }
 0x9ca   :  { %v6141_v50 = vpop.eup %6140  ;;  %v3527_v58 = vadd.f32 1.0, %v6139_v29 }
 0x9cb   :  { %v6143_v43 = vpop.eup %6142  ;;  %v3516_v16 = vadd.f32 1.0, %v6141_v50  ;;  %6144 = vrcp.f32 %v3515_v1 }
 0x9cc   :  { %v3528_v53 = vadd.f32 1.0, %v6143_v43  ;;  %6146 = vrcp.f32 %v3527_v58 }
 0x9cd   :  { %6148 = vrcp.f32 %v3516_v16 }
 0x9ce   :  { %6150 = vrcp.f32 %v3528_v53 }
 0x9d5   :  { %v6145_v31 = vpop.eup %6144 }
 0x9d6   :  { %v6147_v23 = vpop.eup %6146 }
 0x9d7   :  { %v6149_v42 = vpop.eup %6148  ;;  %v3547_v15 = vmul.f32 %v6147_v23, %v7987_v61 }
 0x9d8   :  { %v6151_v63 = vpop.eup %6150 }
 0x9d9   :  { %v3548_v38 = vmul.f32 %v6151_v63, %v7989_v6  ;;  %v3621_v6 = vld [vmem:[%s8121_s5] sm:$0x3] }
 0x9da   :  { %v3626_v34 = vrot.slane %v3621_v6, %v9347_v45  ;;  %v3630_v20 = vrot.slane %v3621_v6, %v9348_v47 }
 0x9f9   :  { %v3425_v12 = vpop.f32.mrb[30].mxu0  ;;  %v3496_v18 = vpop.f32.mrb[30].mxu1 }
 0x9fa   :  { %v3505_v27 = vadd.f32 %v3425_v12, %v577_v8  ;;  %v3507_v28 = vadd.f32 %v3496_v18, %v579_v17  ;;  %v3427_v9 = vpop.f32.mrb[31].mxu0  ;;  %v3498_v4 = vpop.f32.mrb[31].mxu1 }
 0x9fb   :  { %v3506_v32 = vadd.f32 %v3427_v9, %v578_v40  ;;  %v3508_v0 = vadd.f32 %v3498_v4, %v580_v22 }
 0x9fc   :  { %6152 = vtanh.f32 %v3505_v27  ;;  %v3782_v52 = vmul.f32 -1.442695, %v3507_v28 }
 0x9fd   :  { %6154 = vtanh.f32 %v3506_v32  ;;  %v3783_v24 = vmul.f32 -1.442695, %v3508_v0 }
 0x9fe   :  { %6156 = vpow2.f32 %v3782_v52 }
 0x9ff   :  { %6158 = vpow2.f32 %v3783_v24 }
 0xa06   :  { %v6153_v46 = vpop.eup %6152 }
 0xa07   :  { %v6155_v62 = vpop.eup %6154  ;;  %v3549_v30 = vmul.f32 %v6153_v46, %v6145_v31 }
 0xa08   :  { %v6157_v57 = vpop.eup %6156  ;;  %v3550_v55 = vmul.f32 %v6155_v62, %v6149_v42 }
 0xa09   :  { %v6159_v51 = vpop.eup %6158  ;;  %v3551_v10 = vadd.f32 %v3549_v30, %v3547_v15  ;;  %v3541_v44 = vadd.f32 1.0, %v6157_v57 }
 0xa0a   :  { %v3552_v39 = vadd.f32 %v3550_v55, %v3548_v38  ;;  %v3542_v35 = vadd.f32 1.0, %v6159_v51 }
 0xa0b   :  { %6160 = vtanh.f32 %v3551_v10 }
 0xa0c   :  { %6162 = vrcp.f32 %v3541_v44 }
 0xa0d   :  { %6164 = vtanh.f32 %v3552_v39 }
 0xa0e   :  { %6166 = vrcp.f32 %v3542_v35 }
 0xa15   :  { %v6161_v36 = vpop.eup %6160 }
 0xa16   :  { %v6163_v41 = vpop.eup %6162 }
 0xa17   :  { %v6165_v2 = vpop.eup %6164  ;;  %v3555_v26 = vmul.f32 %v6163_v41, %v6161_v36 }
 0xa18   :  { %v6167_v11 = vpop.eup %6166 }
 0xa19   :  { %v3556_v61 = vmul.f32 %v6167_v11, %v6165_v2 }
 0xa1b   :  { %3697 = vmatprep.mubr.f32.mxu0 %v3556_v61 }
 0xa1c   :  { %3698 = vmatmul.mubr.f32.vlgmr.msra.gmra.mrb[32].mxu0 %v3555_v26 }
 0xaef   :  { %v3699_v56 = vpop.f32.mrb[32].mxu0 }
 0xaf0   :  { %v3700_v5 = vadd.f32 %v3699_v56, %v3626_v34  ;;  %v3701_v33 = vpop.f32.mrb[33].mxu0 }
 0xaf1   :  { %v3702_v3 = vadd.f32 %v3701_v33, %v3630_v20 }
 0xaf2   :  { %3704 = vst [vmem:[#allocation7] sm:$0x3] %v3700_v5 }
 0xaf3   :  { %3705 = vst [vmem:[#allocation8] sm:$0x3] %v3702_v3 }
 0xaf4   :  { %6223 = shalt.err (!%p6220_p6)
}
 0xaf5   :  { %s6224_s29 = scalar_lea.hbm %s8122_s6, 32 }
 0xaf6   :  { %p6225_p7 = scmp.ne.s32.totalorder %s8122_s6, %s6224_s29  ;;  %p6228_p8 = scmp.lt.u32.totalorder %s6224_s29, %s8122_s6 }
 0xaf8   :  { %p6230_p9 = pnand %p6228_p8, %p6225_p7 }
 0xafa   :  { %6233 = shalt.err (!%p6230_p9)
}
 0xafb   :  { %3715 = dma.vmem_to_hbm [thread:$0]  %s3713_s25, 32, %s8122_s6, [#allocation4]  }
 0xafc   :  { %s6234_s13 = scalar_lea.vmem %s3723_s27, 32  ;;  %p6239_p11 = scmp.lt.s32.totalorder %s3723_s27, %s3723_s27 }
 0xafd   :  { %p6235_p10 = scmp.ne.s32.totalorder %s3723_s27, %s6234_s13  ;;  %p6240_p12 = scmp.lt.s32.totalorder %s6234_s13, %s6234_s13 }
 0xaff   :  { %p6241_p13 = por %p6240_p12, %p6239_p11 }
 0xb01   :  { %p6242_p0 = pnand %p6241_p13, %p6235_p10 }
 0xb03   :  { %6245 = shalt.err (!%p6242_p0)
}
 0xb04   :  { %s6246_s16 = scalar_lea.hbm %s8123_s7, 32 }
 0xb05   :  { %p6247_p1 = scmp.ne.s32.totalorder %s8123_s7, %s6246_s16  ;;  %p6250_p2 = scmp.lt.u32.totalorder %s6246_s16, %s8123_s7 }
 0xb07   :  { %p6252_p3 = pnand %p6250_p2, %p6247_p1 }
 0xb09   :  { %6255 = shalt.err (!%p6252_p3)
}
 0xb0a   :  { %3725 = dma.vmem_to_hbm [thread:$0]  %s3723_s27, 32, %s8123_s7, [#allocation9]  }
 0xb0b   :  { %6260 = dma.done.wait [#allocation4], 32  }
 0xb0c   :  { %6261 = vsyncadd [#allocation4], 4294967264 }
 0xb0d   :  { %6262 = dma.done.wait [#allocation9], 32  }
 0xb0e   :  { %6263 = vsyncadd [#allocation9], 4294967264 }
 0xb0f   :  { %3732 = vsyncpa [#allocation3], 1 }
 0xb10   :  { %3733 = vsyncpa [#allocation6], 1 }
 0xb11   :  { %3734 = vsyncpa [#allocation4], 1 }
 0xb12   :  { %3735 = vsyncpa [#allocation9], 1 }

</bundles_post_ra>
